<compile_context>
chip_gen: v5e
topology: v5e:2x2
jax: 0.10.0
libtpu: 0.0.40
codegen_flags: <defaults>
</compile_context>

<pallas_src>
import functools

import jax
import jax.numpy as jnp
from jax.experimental import pallas as pl
from jax.experimental.pallas import tpu as pltpu

IN_FEATURES = 2500          # 50 * 50
K_PAD = 2560                # 2500 rounded up to a multiple of 128
H1 = 2500
H1_PAD = 2560
H2 = 128
H3 = 128
OUT = 10
OUT_PAD = 128
M_PAD = 16                  # bf16 sublane packing friendly batch padding
TN_LAYER1 = 512             # lane-dense output tile for layer1 (5 blocks)


def _round_up(x, m):
    return (x + m - 1) // m * m


# --------------------------------------------------------------------------
# Kernel 1: big linear (layer1):  y = relu(x @ W + b), one large N tile/step
# --------------------------------------------------------------------------
def _linear_kernel(x_ref, w_ref, b_ref, o_ref, *, apply_relu):
    y = jnp.dot(x_ref[...], w_ref[...], preferred_element_type=jnp.float32)
    y = y + b_ref[...]                       # bias broadcast over rows (f32)
    if apply_relu:
        y = jnp.maximum(y, 0.0)
    o_ref[...] = y.astype(o_ref.dtype)


def pallas_linear_big(x, w, b, *, apply_relu, tn=TN_LAYER1,
                      out_dtype=jnp.bfloat16):
    """x:(Mp,Kp) bf16, w:(Kp,Np) bf16, b:(1,Np) f32; Np % tn == 0."""
    Mp, Kp = x.shape
    Kw, Np = w.shape
    assert Kp == Kw and b.shape == (1, Np) and Np % tn == 0

    grid = (Np // tn,)
    return pl.pallas_call(
        functools.partial(_linear_kernel, apply_relu=apply_relu),
        out_shape=jax.ShapeDtypeStruct((Mp, Np), out_dtype),
        grid_spec=pltpu.PrefetchScalarGridSpec(
            num_scalar_prefetch=0,
            grid=grid,
            in_specs=[
                pl.BlockSpec((Mp, Kp), lambda j: (0, 0)),   # whole x each step
                pl.BlockSpec((Kp, tn), lambda j: (0, j)),   # stream weight tile
                pl.BlockSpec((1, tn), lambda j: (0, j)),
            ],
            out_specs=pl.BlockSpec((Mp, tn), lambda j: (0, j)),
        ),
        compiler_params=pltpu.CompilerParams(
            dimension_semantics=("parallel",),   # megacore-shardable on v7x
        ),
    )(x, w, b)


# --------------------------------------------------------------------------
# Kernel 2: fused layers 2, 3 and output_layer (single grid step)
# --------------------------------------------------------------------------
def _mlp_tail_kernel(h_ref, w2_ref, b2_ref, w3_ref, b3_ref, w4_ref, b4_ref,
                     o_ref):
    h2 = jnp.dot(h_ref[...], w2_ref[...],
                 preferred_element_type=jnp.float32) + b2_ref[...]
    h2 = jnp.maximum(h2, 0.0).astype(jnp.bfloat16)
    h3 = jnp.dot(h2, w3_ref[...],
                 preferred_element_type=jnp.float32) + b3_ref[...]
    h3 = jnp.maximum(h3, 0.0).astype(jnp.bfloat16)
    y = jnp.dot(h3, w4_ref[...],
                preferred_element_type=jnp.float32) + b4_ref[...]
    o_ref[...] = y.astype(o_ref.dtype)


def pallas_mlp_tail(h1, w2, b2, w3, b3, w4, b4):
    Mp, K2 = h1.shape
    args = (h1, w2, b2, w3, b3, w4, b4)
    full = lambda a: pl.BlockSpec(a.shape, lambda i: (0,) * a.ndim)
    return pl.pallas_call(
        _mlp_tail_kernel,
        out_shape=jax.ShapeDtypeStruct((Mp, OUT_PAD), jnp.float32),
        grid_spec=pltpu.PrefetchScalarGridSpec(
            num_scalar_prefetch=0,
            grid=(1,),
            in_specs=[full(a) for a in args],
            out_specs=pl.BlockSpec((Mp, OUT_PAD), lambda i: (0, 0)),
        ),
        compiler_params=pltpu.CompilerParams(
            dimension_semantics=("arbitrary",),
        ),
    )(*args)


# --------------------------------------------------------------------------
# Parameters
# --------------------------------------------------------------------------
def init_params(key, input_dim=IN_FEATURES):
    """Deterministic init mimicking nn.Linear: U(-1/sqrt(fan_in), +...)."""
    dims = [(input_dim, H1), (H1, H2), (H2, H3), (H3, OUT)]
    params = []
    for i, (fan_in, fan_out) in enumerate(dims):
        kw, kb = jax.random.split(jax.random.fold_in(key, i))
        bound = 1.0 / jnp.sqrt(jnp.float32(fan_in))
        w = jax.random.uniform(kw, (fan_in, fan_out), jnp.float32,
                               minval=-bound, maxval=bound)
        bvec = jax.random.uniform(kb, (fan_out,), jnp.float32,
                                  minval=-bound, maxval=bound)
        params.append((w, bvec))
    return params


def prepare_pallas_params(params):
    """One-time pad to TPU-aligned shapes + bf16 cast (hoisted out of forward)."""
    (w1, b1), (w2, b2), (w3, b3), (w4, b4) = params

    def pad_w(w, rows, cols):
        out = jnp.zeros((rows, cols), jnp.float32)
        return out.at[: w.shape[0], : w.shape[1]].set(w).astype(jnp.bfloat16)

    def pad_b(b, cols):
        return jnp.zeros((1, cols), jnp.float32).at[0, : b.shape[0]].set(b)

    return (
        pad_w(w1, K_PAD, H1_PAD), pad_b(b1, H1_PAD),
        pad_w(w2, H1_PAD, H2),    pad_b(b2, H2),
        pad_w(w3, H2, H3),        pad_b(b3, H3),
        pad_w(w4, H3, OUT_PAD),   pad_b(b4, OUT_PAD),
    )


# --------------------------------------------------------------------------
# Forward pass (matches CNN.forward, dropout = identity at inference)
# --------------------------------------------------------------------------
def _pad_input(x):
    """view(-1, 50*50), pad batch->16 and features->2560, cast to bf16."""
    b = x.shape[0]
    h = x.reshape(b, -1)
    mp = _round_up(max(b, M_PAD), M_PAD)
    hp = jnp.zeros((mp, K_PAD), jnp.bfloat16)
    return hp.at[:b, : h.shape[1]].set(h.astype(jnp.bfloat16))


def cnn_forward(x, prepared):
    w1p, b1p, w2p, b2p, w3p, b3p, w4p, b4p = prepared
    b = x.shape[0]
    hp = _pad_input(x)                                    # (Mp, 2560) bf16
    h1 = pallas_linear_big(hp, w1p, b1p, apply_relu=True)  # layer1 + relu
    # dropout(p=0.2): identity in inference mode
    y = pallas_mlp_tail(h1, w2p, b2p, w3p, b3p, w4p, b4p)  # layers 2,3,out
    # dropout(p=0.2) before output_layer: identity in inference mode
    return y[:b, :OUT]


if __name__ == "__main__":
    key = jax.random.PRNGKey(0)
    k_x, k_p = jax.random.split(key)

    # Batch 2 of 50x50 single-channel images (flattens to 2500 features).
    x = jax.random.normal(k_x, (2, 1, 50, 50), jnp.float32)
    params = init_params(k_p)
    prepared = prepare_pallas_params(params)

    fwd = jax.jit(cnn_forward)
    out = jax.block_until_ready(fwd(x, prepared))
    assert out.shape == (2, OUT), out.shape

    # --- reference 1: exact emulation of the kernel's bf16/f32-acc math ----
    w1p, b1p, w2p, b2p, w3p, b3p, w4p, b4p = prepared
    hp = _pad_input(x)
    r1 = jnp.maximum(jnp.dot(hp, w1p, preferred_element_type=jnp.float32)
                     + b1p, 0.0).astype(jnp.bfloat16)
    r2 = jnp.maximum(jnp.dot(r1, w2p, preferred_element_type=jnp.float32)
                     + b2p, 0.0).astype(jnp.bfloat16)
    r3 = jnp.maximum(jnp.dot(r2, w3p, preferred_element_type=jnp.float32)
                     + b3p, 0.0).astype(jnp.bfloat16)
    ref_bf16 = (jnp.dot(r3, w4p, preferred_element_type=jnp.float32)
                + b4p)[:2, :OUT]
    assert jnp.allclose(out, ref_bf16, atol=2e-3, rtol=2e-3)

    # --- reference 2: full-precision f32 forward (loose sanity check) ------
    (w1, b1), (w2, b2), (w3, b3), (w4, b4) = params
    hi = jax.lax.Precision.HIGHEST
    h = x.reshape(2, IN_FEATURES)
    h = jnp.maximum(jnp.dot(h, w1, precision=hi) + b1, 0.0)
    h = jnp.maximum(jnp.dot(h, w2, precision=hi) + b2, 0.0)
    h = jnp.maximum(jnp.dot(h, w3, precision=hi) + b3, 0.0)
    ref_f32 = jnp.dot(h, w4, precision=hi) + b4
    assert jnp.allclose(out, ref_f32, atol=5e-2, rtol=5e-2)

    print("KERNEL_OK")
</pallas_src>

<mosaic_0001>
module attributes {stable_mosaic.version = 11 : i64} {
  func.func @_linear_kernel(%arg0: i32, %arg1: memref<16x2560xbf16, #tpu.memory_space<vmem>>, %arg2: memref<2560x512xbf16, #tpu.memory_space<vmem>>, %arg3: memref<1x512xf32, #tpu.memory_space<vmem>>, %arg4: memref<16x512xbf16, #tpu.memory_space<vmem>>) attributes {dimension_semantics = [#tpu.dimension_semantics<parallel>], iteration_bounds = array<i64: 5>, scalar_prefetch = 0 : i64, scratch_operands = 0 : i64, tpu.core_type = #tpu.core_type<tc>, window_params = [{pipeline_mode = #tpu.pipeline_mode<synchronous>, transform_indices = @transform_0, window_bounds = array<i64: 16, 2560>}, {transform_indices = @transform_1, window_bounds = array<i64: 2560, 512>}, {transform_indices = @transform_2, window_bounds = array<i64: 1, 512>}, {transform_indices = @transform_3, window_bounds = array<i64: 16, 512>}]} {
    %c0 = arith.constant 0 : index
    %c0_0 = arith.constant 0 : index
    %0 = vector.load %arg1[%c0, %c0_0] : memref<16x2560xbf16, #tpu.memory_space<vmem>>, vector<16x2560xbf16>
    %c0_1 = arith.constant 0 : index
    %c0_2 = arith.constant 0 : index
    %1 = vector.load %arg2[%c0_1, %c0_2] : memref<2560x512xbf16, #tpu.memory_space<vmem>>, vector<2560x512xbf16>
    %cst = arith.constant dense<0.000000e+00> : vector<16x512xf32>
    %2 = tpu.matmul %0, %1, %cst {dimension_numbers = #tpu.dot_dimension_numbers<[1], [0], [0], [1], [0, 0, 1, 1], [], []>} : vector<16x2560xbf16>, vector<2560x512xbf16>, vector<16x512xf32> -> vector<16x512xf32>
    %c0_3 = arith.constant 0 : index
    %c0_4 = arith.constant 0 : index
    %3 = vector.load %arg3[%c0_3, %c0_4] : memref<1x512xf32, #tpu.memory_space<vmem>>, vector<1x512xf32>
    %4 = vector.broadcast %3 : vector<1x512xf32> to vector<16x512xf32>
    %5 = arith.addf %2, %4 : vector<16x512xf32>
    %cst_5 = arith.constant 0.000000e+00 : f32
    %6 = vector.broadcast %cst_5 : f32 to vector<16x512xf32>
    %7 = arith.maximumf %5, %6 : vector<16x512xf32>
    %8 = arith.truncf %7 : vector<16x512xf32> to vector<16x512xbf16>
    %c0_6 = arith.constant 0 : index
    %c0_7 = arith.constant 0 : index
    %9 = vector.load %arg4[%c0_6, %c0_7] : memref<16x512xbf16, #tpu.memory_space<vmem>>, vector<16x512xbf16>
    tpu.vector_store %arg4[%c0_6, %c0_7], %8 {strides = array<i32>} : memref<16x512xbf16, #tpu.memory_space<vmem>>, vector<16x512xbf16>,
    return
  }
  func.func @transform_0(%arg0: i32) -> (i32, i32) {
    %c0_i32 = arith.constant 0 : i32
    %c0_i32_0 = arith.constant 0 : i32
    %c0_i32_1 = arith.constant 0 : i32
    return %c0_i32, %c0_i32_0 : i32, i32
  }
  func.func @transform_1(%arg0: i32) -> (i32, i32) {
    %c0_i32 = arith.constant 0 : i32
    %c0_i32_0 = arith.constant 0 : i32
    return %c0_i32, %arg0 : i32, i32
  }
  func.func @transform_2(%arg0: i32) -> (i32, i32) {
    %c0_i32 = arith.constant 0 : i32
    %c0_i32_0 = arith.constant 0 : i32
    return %c0_i32, %arg0 : i32, i32
  }
  func.func @transform_3(%arg0: i32) -> (i32, i32) {
    %c0_i32 = arith.constant 0 : i32
    %c0_i32_0 = arith.constant 0 : i32
    return %c0_i32, %arg0 : i32, i32
  }
}

module attributes {stable_mosaic.version = 11 : i64} {
  func.func @_mlp_tail_kernel(%arg0: i32, %arg1: memref<16x2560xbf16, #tpu.memory_space<vmem>>, %arg2: memref<2560x128xbf16, #tpu.memory_space<vmem>>, %arg3: memref<1x128xf32, #tpu.memory_space<vmem>>, %arg4: memref<128x128xbf16, #tpu.memory_space<vmem>>, %arg5: memref<1x128xf32, #tpu.memory_space<vmem>>, %arg6: memref<128x128xbf16, #tpu.memory_space<vmem>>, %arg7: memref<1x128xf32, #tpu.memory_space<vmem>>, %arg8: memref<16x128xf32, #tpu.memory_space<vmem>>) attributes {dimension_semantics = [#tpu.dimension_semantics<arbitrary>], iteration_bounds = array<i64: 1>, scalar_prefetch = 0 : i64, scratch_operands = 0 : i64, tpu.core_type = #tpu.core_type<tc>, window_params = [{pipeline_mode = #tpu.pipeline_mode<synchronous>, transform_indices = @transform_0, window_bounds = array<i64: 16, 2560>}, {pipeline_mode = #tpu.pipeline_mode<synchronous>, transform_indices = @transform_1, window_bounds = array<i64: 2560, 128>}, {pipeline_mode = #tpu.pipeline_mode<synchronous>, transform_indices = @transform_2, window_bounds = array<i64: 1, 128>}, {pipeline_mode = #tpu.pipeline_mode<synchronous>, transform_indices = @transform_3, window_bounds = array<i64: 128, 128>}, {pipeline_mode = #tpu.pipeline_mode<synchronous>, transform_indices = @transform_4, window_bounds = array<i64: 1, 128>}, {pipeline_mode = #tpu.pipeline_mode<synchronous>, transform_indices = @transform_5, window_bounds = array<i64: 128, 128>}, {pipeline_mode = #tpu.pipeline_mode<synchronous>, transform_indices = @transform_6, window_bounds = array<i64: 1, 128>}, {pipeline_mode = #tpu.pipeline_mode<synchronous>, transform_indices = @transform_7, window_bounds = array<i64: 16, 128>}]} {
    %c0 = arith.constant 0 : index
    %c0_0 = arith.constant 0 : index
    %0 = vector.load %arg1[%c0, %c0_0] : memref<16x2560xbf16, #tpu.memory_space<vmem>>, vector<16x2560xbf16>
    %c0_1 = arith.constant 0 : index
    %c0_2 = arith.constant 0 : index
    %1 = vector.load %arg2[%c0_1, %c0_2] : memref<2560x128xbf16, #tpu.memory_space<vmem>>, vector<2560x128xbf16>
    %cst = arith.constant dense<0.000000e+00> : vector<16x128xf32>
    %2 = tpu.matmul %0, %1, %cst {dimension_numbers = #tpu.dot_dimension_numbers<[1], [0], [0], [1], [0, 0, 1, 1], [], []>} : vector<16x2560xbf16>, vector<2560x128xbf16>, vector<16x128xf32> -> vector<16x128xf32>
    %c0_3 = arith.constant 0 : index
    %c0_4 = arith.constant 0 : index
    %3 = vector.load %arg3[%c0_3, %c0_4] : memref<1x128xf32, #tpu.memory_space<vmem>>, vector<1x128xf32>
    %4 = vector.broadcast %3 : vector<1x128xf32> to vector<16x128xf32>
    %5 = arith.addf %2, %4 : vector<16x128xf32>
    %cst_5 = arith.constant 0.000000e+00 : f32
    %6 = vector.broadcast %cst_5 : f32 to vector<16x128xf32>
    %7 = arith.maximumf %5, %6 : vector<16x128xf32>
    %8 = arith.truncf %7 : vector<16x128xf32> to vector<16x128xbf16>
    %c0_6 = arith.constant 0 : index
    %c0_7 = arith.constant 0 : index
    %9 = vector.load %arg4[%c0_6, %c0_7] : memref<128x128xbf16, #tpu.memory_space<vmem>>, vector<128x128xbf16>
    %cst_8 = arith.constant dense<0.000000e+00> : vector<16x128xf32>
    %10 = tpu.matmul %8, %9, %cst_8 {dimension_numbers = #tpu.dot_dimension_numbers<[1], [0], [0], [1], [0, 0, 1, 1], [], []>} : vector<16x128xbf16>, vector<128x128xbf16>, vector<16x128xf32> -> vector<16x128xf32>
    %c0_9 = arith.constant 0 : index
    %c0_10 = arith.constant 0 : index
    %11 = vector.load %arg5[%c0_9, %c0_10] : memref<1x128xf32, #tpu.memory_space<vmem>>, vector<1x128xf32>
    %12 = vector.broadcast %11 : vector<1x128xf32> to vector<16x128xf32>
    %13 = arith.addf %10, %12 : vector<16x128xf32>
    %cst_11 = arith.constant 0.000000e+00 : f32
    %14 = vector.broadcast %cst_11 : f32 to vector<16x128xf32>
    %15 = arith.maximumf %13, %14 : vector<16x128xf32>
    %16 = arith.truncf %15 : vector<16x128xf32> to vector<16x128xbf16>
    %c0_12 = arith.constant 0 : index
    %c0_13 = arith.constant 0 : index
    %17 = vector.load %arg6[%c0_12, %c0_13] : memref<128x128xbf16, #tpu.memory_space<vmem>>, vector<128x128xbf16>
    %cst_14 = arith.constant dense<0.000000e+00> : vector<16x128xf32>
    %18 = tpu.matmul %16, %17, %cst_14 {dimension_numbers = #tpu.dot_dimension_numbers<[1], [0], [0], [1], [0, 0, 1, 1], [], []>} : vector<16x128xbf16>, vector<128x128xbf16>, vector<16x128xf32> -> vector<16x128xf32>
    %c0_15 = arith.constant 0 : index
    %c0_16 = arith.constant 0 : index
    %19 = vector.load %arg7[%c0_15, %c0_16] : memref<1x128xf32, #tpu.memory_space<vmem>>, vector<1x128xf32>
    %20 = vector.broadcast %19 : vector<1x128xf32> to vector<16x128xf32>
    %21 = arith.addf %18, %20 : vector<16x128xf32>
    %c0_17 = arith.constant 0 : index
    %c0_18 = arith.constant 0 : index
    %22 = vector.load %arg8[%c0_17, %c0_18] : memref<16x128xf32, #tpu.memory_space<vmem>>, vector<16x128xf32>
    tpu.vector_store %arg8[%c0_17, %c0_18], %21 {strides = array<i32>} : memref<16x128xf32, #tpu.memory_space<vmem>>, vector<16x128xf32>,
    return
  }
  func.func @transform_0(%arg0: i32) -> (i32, i32) {
    %c0_i32 = arith.constant 0 : i32
    %c0_i32_0 = arith.constant 0 : i32
    %c0_i32_1 = arith.constant 0 : i32
    return %c0_i32, %c0_i32_0 : i32, i32
  }
  func.func @transform_1(%arg0: i32) -> (i32, i32) {
    %c0_i32 = arith.constant 0 : i32
    %c0_i32_0 = arith.constant 0 : i32
    %c0_i32_1 = arith.constant 0 : i32
    return %c0_i32, %c0_i32_0 : i32, i32
  }
  func.func @transform_2(%arg0: i32) -> (i32, i32) {
    %c0_i32 = arith.constant 0 : i32
    %c0_i32_0 = arith.constant 0 : i32
    %c0_i32_1 = arith.constant 0 : i32
    return %c0_i32, %c0_i32_0 : i32, i32
  }
  func.func @transform_3(%arg0: i32) -> (i32, i32) {
    %c0_i32 = arith.constant 0 : i32
    %c0_i32_0 = arith.constant 0 : i32
    %c0_i32_1 = arith.constant 0 : i32
    return %c0_i32, %c0_i32_0 : i32, i32
  }
  func.func @transform_4(%arg0: i32) -> (i32, i32) {
    %c0_i32 = arith.constant 0 : i32
    %c0_i32_0 = arith.constant 0 : i32
    %c0_i32_1 = arith.constant 0 : i32
    return %c0_i32, %c0_i32_0 : i32, i32
  }
  func.func @transform_5(%arg0: i32) -> (i32, i32) {
    %c0_i32 = arith.constant 0 : i32
    %c0_i32_0 = arith.constant 0 : i32
    %c0_i32_1 = arith.constant 0 : i32
    return %c0_i32, %c0_i32_0 : i32, i32
  }
  func.func @transform_6(%arg0: i32) -> (i32, i32) {
    %c0_i32 = arith.constant 0 : i32
    %c0_i32_0 = arith.constant 0 : i32
    %c0_i32_1 = arith.constant 0 : i32
    return %c0_i32, %c0_i32_0 : i32, i32
  }
  func.func @transform_7(%arg0: i32) -> (i32, i32) {
    %c0_i32 = arith.constant 0 : i32
    %c0_i32_0 = arith.constant 0 : i32
    %c0_i32_1 = arith.constant 0 : i32
    return %c0_i32, %c0_i32_0 : i32, i32
  }
}

</mosaic_0001>

<bundles_post_ra>
// kernel: cnn_forward.3
= control target key start
LH: loop header
LB: loop body
LE: loop exit
PB: predicated region body
PF: predicated region fallthrough
CT: control target
= control target key end

     0   :  { %12 = vsyncpa [#allocation3], 0  ;;  %s3313_s0 = inlined_call_operand.vmem [shape: bf16[16,2560], index: 0, kind: input, shape index: {}]   ;;  %s3314_s1 = inlined_call_operand.hbm [shape: bf16[2560,128], index: 1, kind: input, shape index: {}]   ;;  %s3315_s2 = inlined_call_operand.hbm [shape: f32[1,128], index: 2, kind: input, shape index: {}]   ;;  %s3316_s3 = inlined_call_operand.hbm [shape: bf16[128,128], index: 3, kind: input, shape index: {}]   ;;  %s3317_s4 = inlined_call_operand.hbm [shape: f32[1,128], index: 4, kind: input, shape index: {}]   ;;  %s3318_s5 = inlined_call_operand.hbm [shape: bf16[128,128], index: 5, kind: input, shape index: {}]   ;;  %s3319_s6 = inlined_call_operand.hbm [shape: f32[1,128], index: 6, kind: input, shape index: {}]   ;;  %s3320_s7 = inlined_call_operand.vmem [shape: f32[16,128], index: 7, kind: output, shape index: {}]  }
   0x1   :  { %13 = vsyncpa [#allocation5], 0 }
   0x2   :  { %14 = vsyncpa [#allocation8], 0  ;;  %s36_s26 = sshll.u32 %s3315_s2, 4  ;;  %s37_s26 = int_to_ptr.hbm [resolvable:$true] %s36_s26 }
   0x3   :  { %15 = vsyncpa [#allocation11], 0  ;;  %s3121_s27 = smov [#allocation4]   ;;  %s60_s8 = sshll.u32 %s3317_s4, 4  ;;  %s61_s8 = int_to_ptr.hbm [resolvable:$true] %s60_s8 }
   0x4   :  { %s38_s28 = sshll.u32 %s3121_s27, 4  ;;  %s3122_s9 = smov [#allocation7]   ;;  %s39_s28 = int_to_ptr.vmem [resolvable:$true] %s38_s28 }
   0x5   :  { %41 = dma.hbm_to_vmem [thread:$0]  %s37_s26, 16, %s39_s28, [#allocation5]  }
   0x6   :  { %s62_s10 = sshll.u32 %s3122_s9, 4  ;;  %s22_s13 = sshll.u32 %s3314_s1, 4  ;;  %s63_s10 = int_to_ptr.vmem [resolvable:$true] %s62_s10  ;;  %s23_s13 = int_to_ptr.hbm [resolvable:$true] %s22_s13 }
   0x7   :  { %65 = dma.hbm_to_vmem [thread:$0]  %s61_s8, 16, %s63_s10, [#allocation8]  }
   0x8   :  { %s3123_s2 = smov [#allocation2]   ;;  %s46_s17 = sshll.u32 %s3316_s3, 4  ;;  %s47_s17 = int_to_ptr.hbm [resolvable:$true] %s46_s17 }
   0x9   :  { %s24_s14 = sshll.u32 %s3123_s2, 4  ;;  %s3124_s18 = smov 64   ;;  %s25_s14 = int_to_ptr.vmem [resolvable:$true] %s24_s14 }
   0xa   :  { %s3125_s4 = smov 4   ;;  %s3126_s19 = smov [#allocation6]  }
   0xb   :  { %30 = dma.hbm_to_vmem [thread:$0]  %s23_s13, 20480, %s25_s14, [#allocation3], %s3124_s18, %s3124_s18, %s3125_s4  }
   0xc   :  { %s48_s20 = sshll.u32 %s3126_s19, 4  ;;  %s70_s1 = sshll.u32 %s3318_s5, 4  ;;  %s49_s20 = int_to_ptr.vmem [resolvable:$true] %s48_s20  ;;  %s71_s1 = int_to_ptr.hbm [resolvable:$true] %s70_s1 }
   0xd   :  { %54 = dma.hbm_to_vmem [thread:$0]  %s47_s17, 1024, %s49_s20, [#allocation5], %s3124_s18, %s3124_s18, %s3125_s4  }
   0xe   :  { %s84_s25 = sshll.u32 %s3319_s6, 4  ;;  %s3127_s26 = smov [#allocation9]   ;;  %s85_s25 = int_to_ptr.hbm [resolvable:$true] %s84_s25 }
   0xf   :  { %s72_s27 = sshll.u32 %s3127_s26, 4  ;;  %s3128_s3 = smov [#allocation10]   ;;  %s73_s27 = int_to_ptr.vmem [resolvable:$true] %s72_s27 }
  0x10   :  { %78 = dma.hbm_to_vmem [thread:$0]  %s71_s1, 1024, %s73_s27, [#allocation8], %s3124_s18, %s3124_s18, %s3125_s4  }
  0x11   :  { %s86_s28 = sshll.u32 %s3128_s3, 4  ;;  %s87_s28 = int_to_ptr.vmem [resolvable:$true] %s86_s28 }
  0x12   :  { %89 = dma.hbm_to_vmem [thread:$0]  %s85_s25, 16, %s87_s28, [#allocation11]  }
  0x13   :  { %3113 = dma.done.wait [#allocation3], 20480  }
  0x14   :  { %3114 = vsyncadd [#allocation3], 4294946816 }
  0x15   :  { %3115 = dma.done.wait [#allocation5], 1040  }
  0x16   :  { %3116 = vsyncadd [#allocation5], 4294966256 }
  0x17   :  { %3117 = dma.done.wait [#allocation8], 1040  }
  0x18   :  { %3118 = vsyncadd [#allocation8], 4294966256 }
  0x19   :  { %3119 = dma.done.wait [#allocation11], 16  }
  0x1a   :  { %3120 = vsyncadd [#allocation11], 4294967280  ;;  %v2789_v0 = vld [vmem:[#allocation2 + $0x38] sm:$0xff]  ;;  %v2788_v4 = vld [vmem:[#allocation2 + $0x30] sm:$0xff] }
  0x1b   :  { %v2797_v1 = vld [vmem:[#allocation2 + $0x78] sm:$0xff]  ;;  %1518 = vmatpush.bf16.msra.mxu0 %v2789_v0  ;;  %v2796_v5 = vld [vmem:[#allocation2 + $0x70] sm:$0xff]  ;;  %v2787_v8 = vld [vmem:[#allocation2 + $0x28] sm:$0xff] }
  0x1c   :  { %v2805_v2 = vld [vmem:[#allocation2 + $0xb8] sm:$0xff]  ;;  %1532 = vmatpush.bf16.msra.mxu1 %v2797_v1  ;;  %v2804_v6 = vld [vmem:[#allocation2 + $0xb0] sm:$0xff]  ;;  %v2795_v9 = vld [vmem:[#allocation2 + $0x68] sm:$0xff] }
  0x1d   :  { %v2813_v3 = vld [vmem:[#allocation2 + $0xf8] sm:$0xff]  ;;  %1546 = vmatpush.bf16.msra.mxu2 %v2805_v2  ;;  %v2812_v7 = vld [vmem:[#allocation2 + $0xf0] sm:$0xff]  ;;  %v2803_v10 = vld [vmem:[#allocation2 + $0xa8] sm:$0xff] }
  0x1e   :  { %1560 = vmatpush.bf16.msra.mxu3 %v2813_v3  ;;  %v2811_v11 = vld [vmem:[#allocation2 + $0xe8] sm:$0xff]  ;;  %v2786_v12 = vld [vmem:[#allocation2 + $0x20] sm:$0xff]  ;;  %v2785_v16 = vld [vmem:[#allocation2 + $0x18] sm:$0xff] }
  0x1f   :  { %1519 = vmatpush.bf16.msra.mxu0 %v2788_v4  ;;  %v2794_v13 = vld [vmem:[#allocation2 + $0x60] sm:$0xff]  ;;  %v2793_v17 = vld [vmem:[#allocation2 + $0x58] sm:$0xff]  ;;  %v2784_v20 = vld [vmem:[#allocation2 + $0x10] sm:$0xff] }
  0x20   :  { %1533 = vmatpush.bf16.msra.mxu1 %v2796_v5  ;;  %v2802_v14 = vld [vmem:[#allocation2 + $0xa0] sm:$0xff]  ;;  %v2801_v18 = vld [vmem:[#allocation2 + $0x98] sm:$0xff]  ;;  %v2792_v21 = vld [vmem:[#allocation2 + $0x50] sm:$0xff] }
  0x21   :  { %1547 = vmatpush.bf16.msra.mxu2 %v2804_v6  ;;  %v2810_v15 = vld [vmem:[#allocation2 + $0xe0] sm:$0xff]  ;;  %v2809_v19 = vld [vmem:[#allocation2 + $0xd8] sm:$0xff]  ;;  %v2800_v22 = vld [vmem:[#allocation2 + $0x90] sm:$0xff] }
  0x22   :  { %1561 = vmatpush.bf16.msra.mxu3 %v2812_v7  ;;  %v2808_v23 = vld [vmem:[#allocation2 + $0xd0] sm:$0xff]  ;;  %v2783_v24 = vld [vmem:[#allocation2 + $0x8] sm:$0xff]  ;;  %v2782_v28 = vld [vmem:[#allocation2] sm:$0xff] }
  0x23   :  { %1520 = vmatpush.bf16.msra.mxu0 %v2787_v8  ;;  %v2791_v25 = vld [vmem:[#allocation2 + $0x48] sm:$0xff]  ;;  %v2790_v29 = vld [vmem:[#allocation2 + $0x40] sm:$0xff]  ;;  %v2821_v32 = vld [vmem:[#allocation2 + $0x138] sm:$0xff] }
  0x24   :  { %1534 = vmatpush.bf16.msra.mxu1 %v2795_v9  ;;  %v2799_v26 = vld [vmem:[#allocation2 + $0x88] sm:$0xff]  ;;  %v2798_v30 = vld [vmem:[#allocation2 + $0x80] sm:$0xff]  ;;  %v2829_v33 = vld [vmem:[#allocation2 + $0x178] sm:$0xff] }
  0x25   :  { %1548 = vmatpush.bf16.msra.mxu2 %v2803_v10  ;;  %v2807_v27 = vld [vmem:[#allocation2 + $0xc8] sm:$0xff]  ;;  %v2806_v31 = vld [vmem:[#allocation2 + $0xc0] sm:$0xff]  ;;  %v2772_v35 = vld [vmem:[%s3313_s0 + $0x4c] sm:$0xf0] }
  0x26   :  { %1562 = vmatpush.bf16.msra.mxu3 %v2811_v11  ;;  %v1980_v34 = vld [vmem:[%s3313_s0] sm:$0xf]  ;;  %v1988_v36 = vld [vmem:[%s3313_s0 + $0x8] sm:$0xf]  ;;  %v2773_v37 = vld [vmem:[%s3313_s0 + $0x54] sm:$0xf0] }
  0x27   :  { %1521 = vmatpush.bf16.msra.mxu0 %v2786_v12  ;;  %v2762_v38 = vld [vmem:[%s3313_s0 + $0x4] sm:$0xf]  ;;  %v1982_v39 = vld [vmem:[%s3313_s0 + $0x50] sm:$0xf0]  ;;  %v2763_v40 = vld [vmem:[%s3313_s0 + $0xc] sm:$0xf]  ;;  %v1981_v44 = vor.u32 %v2772_v35, %v1980_v34  ;;  %v1989_v45 = vor.u32 %v2773_v37, %v1988_v36 }
  0x28   :  { %1535 = vmatpush.bf16.msra.mxu1 %v2794_v13  ;;  %v1990_v41 = vld [vmem:[%s3313_s0 + $0x58] sm:$0xf0]  ;;  %v1985_v46 = vor.u32 %v2762_v38, %v1982_v39  ;;  %v2820_v48 = vld [vmem:[#allocation2 + $0x130] sm:$0xff]  ;;  %v2819_v52 = vld [vmem:[#allocation2 + $0x128] sm:$0xff] }
  0x29   :  { %1549 = vmatpush.bf16.msra.mxu2 %v2802_v14  ;;  %v2837_v42 = vld [vmem:[#allocation2 + $0x1b8] sm:$0xff]  ;;  %v1993_v47 = vor.u32 %v2763_v40, %v1990_v41  ;;  %v2828_v49 = vld [vmem:[#allocation2 + $0x170] sm:$0xff]  ;;  %v2827_v53 = vld [vmem:[#allocation2 + $0x168] sm:$0xff] }
  0x2a   :  { %1563 = vmatpush.bf16.msra.mxu3 %v2810_v15  ;;  %v2845_v43 = vld [vmem:[#allocation2 + $0x1f8] sm:$0xff]  ;;  %v2836_v50 = vld [vmem:[#allocation2 + $0x1b0] sm:$0xff]  ;;  %v2835_v54 = vld [vmem:[#allocation2 + $0x1a8] sm:$0xff] }
  0x2b   :  { %1522 = vmatpush.bf16.msra.mxu0 %v2785_v16  ;;  %v2844_v51 = vld [vmem:[#allocation2 + $0x1f0] sm:$0xff]  ;;  %v2843_v55 = vld [vmem:[#allocation2 + $0x1e8] sm:$0xff]  ;;  %v2818_v56 = vld [vmem:[#allocation2 + $0x120] sm:$0xff] }
  0x2c   :  { %1536 = vmatpush.bf16.msra.mxu1 %v2793_v17  ;;  %v2826_v57 = vld [vmem:[#allocation2 + $0x160] sm:$0xff]  ;;  %v2817_v60 = vld [vmem:[#allocation2 + $0x118] sm:$0xff]  ;;  %v2816_v0 = vld [vmem:[#allocation2 + $0x110] sm:$0xff] }
  0x2d   :  { %1550 = vmatpush.bf16.msra.mxu2 %v2801_v18  ;;  %v2834_v58 = vld [vmem:[#allocation2 + $0x1a0] sm:$0xff]  ;;  %v2825_v61 = vld [vmem:[#allocation2 + $0x158] sm:$0xff]  ;;  %v2824_v1 = vld [vmem:[#allocation2 + $0x150] sm:$0xff] }
  0x2e   :  { %1564 = vmatpush.bf16.msra.mxu3 %v2809_v19  ;;  %v2842_v59 = vld [vmem:[#allocation2 + $0x1e0] sm:$0xff]  ;;  %v2833_v62 = vld [vmem:[#allocation2 + $0x198] sm:$0xff]  ;;  %v2832_v2 = vld [vmem:[#allocation2 + $0x190] sm:$0xff] }
  0x2f   :  { %1523 = vmatpush.bf16.msra.mxu0 %v2784_v20  ;;  %v2841_v63 = vld [vmem:[#allocation2 + $0x1d8] sm:$0xff]  ;;  %v2840_v3 = vld [vmem:[#allocation2 + $0x1d0] sm:$0xff]  ;;  %v2815_v4 = vld [vmem:[#allocation2 + $0x108] sm:$0xff] }
  0x30   :  { %1537 = vmatpush.bf16.msra.mxu1 %v2792_v21  ;;  %v2823_v5 = vld [vmem:[#allocation2 + $0x148] sm:$0xff]  ;;  %v2814_v8 = vld [vmem:[#allocation2 + $0x100] sm:$0xff]  ;;  %v2853_v12 = vld [vmem:[#allocation2 + $0x238] sm:$0xff] }
  0x31   :  { %1551 = vmatpush.bf16.msra.mxu2 %v2800_v22  ;;  %v2831_v6 = vld [vmem:[#allocation2 + $0x188] sm:$0xff]  ;;  %v2822_v9 = vld [vmem:[#allocation2 + $0x140] sm:$0xff]  ;;  %v2861_v13 = vld [vmem:[#allocation2 + $0x278] sm:$0xff] }
  0x32   :  { %1565 = vmatpush.bf16.msra.mxu3 %v2808_v23  ;;  %v2839_v7 = vld [vmem:[#allocation2 + $0x1c8] sm:$0xff]  ;;  %v2830_v10 = vld [vmem:[#allocation2 + $0x180] sm:$0xff]  ;;  %v1996_v14 = vld [vmem:[%s3313_s0 + $0x10] sm:$0xf] }
  0x33   :  { %1524 = vmatpush.bf16.msra.mxu0 %v2783_v24  ;;  %v2838_v11 = vld [vmem:[#allocation2 + $0x1c0] sm:$0xff]  ;;  %v2004_v16 = vld [vmem:[%s3313_s0 + $0x18] sm:$0xf]  ;;  %v2775_v17 = vld [vmem:[%s3313_s0 + $0x64] sm:$0xf0] }
  0x34   :  { %1538 = vmatpush.bf16.msra.mxu1 %v2791_v25  ;;  %v2774_v15 = vld [vmem:[%s3313_s0 + $0x5c] sm:$0xf0]  ;;  %v2764_v18 = vld [vmem:[%s3313_s0 + $0x14] sm:$0xf]  ;;  %v1998_v19 = vld [vmem:[%s3313_s0 + $0x60] sm:$0xf0]  ;;  %v2005_v25 = vor.u32 %v2775_v17, %v2004_v16 }
  0x35   :  { %1552 = vmatpush.bf16.msra.mxu2 %v2799_v26  ;;  %v2765_v20 = vld [vmem:[%s3313_s0 + $0x1c] sm:$0xf]  ;;  %v2006_v21 = vld [vmem:[%s3313_s0 + $0x68] sm:$0xf0]  ;;  %v1997_v24 = vor.u32 %v2774_v15, %v1996_v14  ;;  %v2001_v26 = vor.u32 %v2764_v18, %v1998_v19  ;;  %v2850_v36 = vld [vmem:[#allocation2 + $0x220] sm:$0xff] }
  0x36   :  { %1566 = vmatpush.bf16.msra.mxu3 %v2807_v27  ;;  %v2869_v22 = vld [vmem:[#allocation2 + $0x2b8] sm:$0xff]  ;;  %v2009_v27 = vor.u32 %v2765_v20, %v2006_v21  ;;  %v2867_v34 = vld [vmem:[#allocation2 + $0x2a8] sm:$0xff]  ;;  %v2858_v37 = vld [vmem:[#allocation2 + $0x260] sm:$0xff] }
  0x37   :  { %1525 = vmatpush.bf16.msra.mxu0 %v2782_v28  ;;  %v2877_v23 = vld [vmem:[#allocation2 + $0x2f8] sm:$0xff]  ;;  %v2852_v28 = vld [vmem:[#allocation2 + $0x230] sm:$0xff]  ;;  %v2875_v35 = vld [vmem:[#allocation2 + $0x2e8] sm:$0xff] }
  0x38   :  { %1539 = vmatpush.bf16.msra.mxu1 %v2790_v29  ;;  %v2860_v29 = vld [vmem:[#allocation2 + $0x270] sm:$0xff]  ;;  %v2866_v38 = vld [vmem:[#allocation2 + $0x2a0] sm:$0xff]  ;;  %v2849_v40 = vld [vmem:[#allocation2 + $0x218] sm:$0xff] }
  0x39   :  { %1553 = vmatpush.bf16.msra.mxu2 %v2798_v30  ;;  %v2868_v30 = vld [vmem:[#allocation2 + $0x2b0] sm:$0xff]  ;;  %v2874_v39 = vld [vmem:[#allocation2 + $0x2e0] sm:$0xff]  ;;  %v2857_v41 = vld [vmem:[#allocation2 + $0x258] sm:$0xff] }
  0x3a   :  { %1567 = vmatpush.bf16.msra.mxu3 %v2806_v31  ;;  %1526 = vmatmul.bf16.vlgmr.msra.gmra.mxu0 %v1981_v44  ;;  %v2876_v31 = vld [vmem:[#allocation2 + $0x2f0] sm:$0xff]  ;;  %v2899_v14 = vld [vmem:[#allocation2 + $0x3a8] sm:$0xff]  ;;  %v2882_v16 = vld [vmem:[#allocation2 + $0x320] sm:$0xff] }
  0x3b   :  { %1574 = vmatpush.bf16.msrb.mxu0 %v2821_v32  ;;  %1540 = vmatmul.bf16.vlgmr.msra.gmra.mxu1 %v1985_v46  ;;  %v2851_v32 = vld [vmem:[#allocation2 + $0x228] sm:$0xff]  ;;  %v2848_v44 = vld [vmem:[#allocation2 + $0x210] sm:$0xff]  ;;  %v2890_v17 = vld [vmem:[#allocation2 + $0x360] sm:$0xff] }
  0x3c   :  { %1588 = vmatpush.bf16.msrb.mxu1 %v2829_v33  ;;  %1554 = vmatmul.bf16.vlgmr.msra.gmra.mxu2 %v1989_v45  ;;  %v2859_v33 = vld [vmem:[#allocation2 + $0x268] sm:$0xff]  ;;  %v2856_v45 = vld [vmem:[#allocation2 + $0x250] sm:$0xff]  ;;  %v2898_v18 = vld [vmem:[#allocation2 + $0x3a0] sm:$0xff] }
  0x3d   :  { %1602 = vmatpush.bf16.msrb.mxu2 %v2837_v42  ;;  %1568 = vmatmul.bf16.vlgmr.msra.gmra.mxu3 %v1993_v47  ;;  %v2865_v42 = vld [vmem:[#allocation2 + $0x298] sm:$0xff]  ;;  %v2864_v46 = vld [vmem:[#allocation2 + $0x290] sm:$0xff]  ;;  %v2907_v15 = vld [vmem:[#allocation2 + $0x3e8] sm:$0xff] }
  0x3e   :  { %1616 = vmatpush.bf16.msrb.mxu3 %v2845_v43  ;;  %v2873_v43 = vld [vmem:[#allocation2 + $0x2d8] sm:$0xff]  ;;  %v2872_v47 = vld [vmem:[#allocation2 + $0x2d0] sm:$0xff]  ;;  %v2906_v19 = vld [vmem:[#allocation2 + $0x3e0] sm:$0xff] }
  0x3f   :  { %1575 = vmatpush.bf16.msrb.mxu0 %v2820_v48  ;;  %v2847_v48 = vld [vmem:[#allocation2 + $0x208] sm:$0xff]  ;;  %v2881_v20 = vld [vmem:[#allocation2 + $0x318] sm:$0xff] }
  0x40   :  { %1589 = vmatpush.bf16.msrb.mxu1 %v2828_v49  ;;  %v2855_v49 = vld [vmem:[#allocation2 + $0x248] sm:$0xff]  ;;  %v2889_v21 = vld [vmem:[#allocation2 + $0x358] sm:$0xff] }
  0x41   :  { %1603 = vmatpush.bf16.msrb.mxu2 %v2836_v50  ;;  %v2863_v50 = vld [vmem:[#allocation2 + $0x288] sm:$0xff] }
  0x42   :  { %1617 = vmatpush.bf16.msrb.mxu3 %v2844_v51  ;;  %v2871_v51 = vld [vmem:[#allocation2 + $0x2c8] sm:$0xff] }
  0x43   :  { %1576 = vmatpush.bf16.msrb.mxu0 %v2819_v52  ;;  %v2846_v52 = vld [vmem:[#allocation2 + $0x200] sm:$0xff] }
  0x44   :  { %1590 = vmatpush.bf16.msrb.mxu1 %v2827_v53  ;;  %v2854_v53 = vld [vmem:[#allocation2 + $0x240] sm:$0xff] }
  0x45   :  { %1604 = vmatpush.bf16.msrb.mxu2 %v2835_v54  ;;  %v2862_v54 = vld [vmem:[#allocation2 + $0x280] sm:$0xff] }
  0x46   :  { %1618 = vmatpush.bf16.msrb.mxu3 %v2843_v55  ;;  %v2870_v55 = vld [vmem:[#allocation2 + $0x2c0] sm:$0xff] }
  0x47   :  { %1577 = vmatpush.bf16.msrb.mxu0 %v2818_v56  ;;  %v2885_v56 = vld [vmem:[#allocation2 + $0x338] sm:$0xff] }
  0x48   :  { %1591 = vmatpush.bf16.msrb.mxu1 %v2826_v57  ;;  %v2893_v57 = vld [vmem:[#allocation2 + $0x378] sm:$0xff] }
  0x49   :  { %1605 = vmatpush.bf16.msrb.mxu2 %v2834_v58  ;;  %v2012_v58 = vld [vmem:[%s3313_s0 + $0x20] sm:$0xf] }
  0x4a   :  { %1619 = vmatpush.bf16.msrb.mxu3 %v2842_v59  ;;  %v2776_v59 = vld [vmem:[%s3313_s0 + $0x6c] sm:$0xf0] }
  0x4b   :  { %1578 = vmatpush.bf16.msrb.mxu0 %v2817_v60  ;;  %v2020_v60 = vld [vmem:[%s3313_s0 + $0x28] sm:$0xf] }
  0x4c   :  { %1592 = vmatpush.bf16.msrb.mxu1 %v2825_v61  ;;  %v2777_v61 = vld [vmem:[%s3313_s0 + $0x74] sm:$0xf0] }
  0x4d   :  { %1606 = vmatpush.bf16.msrb.mxu2 %v2833_v62  ;;  %v2766_v62 = vld [vmem:[%s3313_s0 + $0x24] sm:$0xf] }
  0x4e   :  { %1620 = vmatpush.bf16.msrb.mxu3 %v2841_v63  ;;  %v2014_v63 = vld [vmem:[%s3313_s0 + $0x70] sm:$0xf0] }
  0x4f   :  { %1579 = vmatpush.bf16.msrb.mxu0 %v2816_v0  ;;  %v2767_v0 = vld [vmem:[%s3313_s0 + $0x2c] sm:$0xf] }
  0x50   :  { %1593 = vmatpush.bf16.msrb.mxu1 %v2824_v1  ;;  %v2022_v1 = vld [vmem:[%s3313_s0 + $0x78] sm:$0xf0] }
  0x51   :  { %1607 = vmatpush.bf16.msrb.mxu2 %v2832_v2  ;;  %v2901_v2 = vld [vmem:[#allocation2 + $0x3b8] sm:$0xff] }
  0x52   :  { %1621 = vmatpush.bf16.msrb.mxu3 %v2840_v3  ;;  %v2909_v3 = vld [vmem:[#allocation2 + $0x3f8] sm:$0xff] }
  0x53   :  { %1580 = vmatpush.bf16.msrb.mxu0 %v2815_v4  ;;  %v2013_v4 = vor.u32 %v2776_v59, %v2012_v58  ;;  %v2931_v58 = vld [vmem:[#allocation2 + $0x4a8] sm:$0xff] }
  0x54   :  { %1594 = vmatpush.bf16.msrb.mxu1 %v2823_v5  ;;  %v2021_v5 = vor.u32 %v2777_v61, %v2020_v60  ;;  %v2939_v59 = vld [vmem:[#allocation2 + $0x4e8] sm:$0xff]  ;;  %v2914_v60 = vld [vmem:[#allocation2 + $0x420] sm:$0xff] }
  0x55   :  { %1608 = vmatpush.bf16.msrb.mxu2 %v2831_v6  ;;  %v2017_v6 = vor.u32 %v2766_v62, %v2014_v63  ;;  %v2922_v61 = vld [vmem:[#allocation2 + $0x460] sm:$0xff] }
  0x56   :  { %1622 = vmatpush.bf16.msrb.mxu3 %v2839_v7  ;;  %v2025_v7 = vor.u32 %v2767_v0, %v2022_v1  ;;  %v2930_v62 = vld [vmem:[#allocation2 + $0x4a0] sm:$0xff]  ;;  %v2913_v0 = vld [vmem:[#allocation2 + $0x418] sm:$0xff] }
  0x57   :  { %1581 = vmatpush.bf16.msrb.mxu0 %v2814_v8  ;;  %v2884_v8 = vld [vmem:[#allocation2 + $0x330] sm:$0xff]  ;;  %v2938_v63 = vld [vmem:[#allocation2 + $0x4e0] sm:$0xff]  ;;  %v2921_v1 = vld [vmem:[#allocation2 + $0x458] sm:$0xff] }
  0x58   :  { %1595 = vmatpush.bf16.msrb.mxu1 %v2822_v9  ;;  %v2892_v9 = vld [vmem:[#allocation2 + $0x370] sm:$0xff] }
  0x59   :  { %1609 = vmatpush.bf16.msrb.mxu2 %v2830_v10  ;;  %v2900_v10 = vld [vmem:[#allocation2 + $0x3b0] sm:$0xff] }
  0x5a   :  { %1623 = vmatpush.bf16.msrb.mxu3 %v2838_v11  ;;  %1582 = vmatmul.bf16.vlgmr.msrb.gmra.mxu0 %v1997_v24  ;;  %v2908_v11 = vld [vmem:[#allocation2 + $0x3f0] sm:$0xff] }
  0x5b   :  { %1630 = vmatpush.bf16.msra.mxu0 %v2853_v12  ;;  %1596 = vmatmul.bf16.vlgmr.msrb.gmra.mxu1 %v2001_v26  ;;  %v2883_v12 = vld [vmem:[#allocation2 + $0x328] sm:$0xff]  ;;  %v2880_v24 = vld [vmem:[#allocation2 + $0x310] sm:$0xff] }
  0x5c   :  { %1644 = vmatpush.bf16.msra.mxu1 %v2861_v13  ;;  %1610 = vmatmul.bf16.vlgmr.msrb.gmra.mxu2 %v2005_v25  ;;  %v2891_v13 = vld [vmem:[#allocation2 + $0x368] sm:$0xff]  ;;  %v2888_v25 = vld [vmem:[#allocation2 + $0x350] sm:$0xff] }
  0x5d   :  { %1658 = vmatpush.bf16.msra.mxu2 %v2869_v22  ;;  %1624 = vmatmul.bf16.vlgmr.msrb.gmra.mxu3 %v2009_v27  ;;  %v2897_v22 = vld [vmem:[#allocation2 + $0x398] sm:$0xff]  ;;  %v2896_v26 = vld [vmem:[#allocation2 + $0x390] sm:$0xff] }
  0x5e   :  { %1672 = vmatpush.bf16.msra.mxu3 %v2877_v23  ;;  %v2905_v23 = vld [vmem:[#allocation2 + $0x3d8] sm:$0xff]  ;;  %v2904_v27 = vld [vmem:[#allocation2 + $0x3d0] sm:$0xff] }
  0x5f   :  { %1631 = vmatpush.bf16.msra.mxu0 %v2852_v28  ;;  %v2879_v28 = vld [vmem:[#allocation2 + $0x308] sm:$0xff] }
  0x60   :  { %1645 = vmatpush.bf16.msra.mxu1 %v2860_v29  ;;  %v2887_v29 = vld [vmem:[#allocation2 + $0x348] sm:$0xff] }
  0x61   :  { %1659 = vmatpush.bf16.msra.mxu2 %v2868_v30  ;;  %v2895_v30 = vld [vmem:[#allocation2 + $0x388] sm:$0xff] }
  0x62   :  { %1673 = vmatpush.bf16.msra.mxu3 %v2876_v31  ;;  %v2903_v31 = vld [vmem:[#allocation2 + $0x3c8] sm:$0xff] }
  0x63   :  { %1632 = vmatpush.bf16.msra.mxu0 %v2851_v32  ;;  %v2878_v32 = vld [vmem:[#allocation2 + $0x300] sm:$0xff] }
  0x64   :  { %1646 = vmatpush.bf16.msra.mxu1 %v2859_v33  ;;  %v2886_v33 = vld [vmem:[#allocation2 + $0x340] sm:$0xff] }
  0x65   :  { %1660 = vmatpush.bf16.msra.mxu2 %v2867_v34  ;;  %v2894_v34 = vld [vmem:[#allocation2 + $0x380] sm:$0xff] }
  0x66   :  { %1674 = vmatpush.bf16.msra.mxu3 %v2875_v35  ;;  %v2902_v35 = vld [vmem:[#allocation2 + $0x3c0] sm:$0xff] }
  0x67   :  { %1633 = vmatpush.bf16.msra.mxu0 %v2850_v36  ;;  %v2917_v36 = vld [vmem:[#allocation2 + $0x438] sm:$0xff] }
  0x68   :  { %1647 = vmatpush.bf16.msra.mxu1 %v2858_v37  ;;  %v2925_v37 = vld [vmem:[#allocation2 + $0x478] sm:$0xff] }
  0x69   :  { %1661 = vmatpush.bf16.msra.mxu2 %v2866_v38  ;;  %v2028_v38 = vld [vmem:[%s3313_s0 + $0x30] sm:$0xf] }
  0x6a   :  { %1675 = vmatpush.bf16.msra.mxu3 %v2874_v39  ;;  %v2778_v39 = vld [vmem:[%s3313_s0 + $0x7c] sm:$0xf0] }
  0x6b   :  { %1634 = vmatpush.bf16.msra.mxu0 %v2849_v40  ;;  %v2036_v40 = vld [vmem:[%s3313_s0 + $0x38] sm:$0xf] }
  0x6c   :  { %1648 = vmatpush.bf16.msra.mxu1 %v2857_v41  ;;  %v2779_v41 = vld [vmem:[%s3313_s0 + $0x84] sm:$0xf0] }
  0x6d   :  { %1662 = vmatpush.bf16.msra.mxu2 %v2865_v42  ;;  %v2768_v42 = vld [vmem:[%s3313_s0 + $0x34] sm:$0xf] }
  0x6e   :  { %1676 = vmatpush.bf16.msra.mxu3 %v2873_v43  ;;  %v2030_v43 = vld [vmem:[%s3313_s0 + $0x80] sm:$0xf0] }
  0x6f   :  { %1635 = vmatpush.bf16.msra.mxu0 %v2848_v44  ;;  %v2769_v44 = vld [vmem:[%s3313_s0 + $0x3c] sm:$0xf] }
  0x70   :  { %1649 = vmatpush.bf16.msra.mxu1 %v2856_v45  ;;  %v2038_v45 = vld [vmem:[%s3313_s0 + $0x88] sm:$0xf0] }
  0x71   :  { %1663 = vmatpush.bf16.msra.mxu2 %v2864_v46  ;;  %v2933_v46 = vld [vmem:[#allocation2 + $0x4b8] sm:$0xff] }
  0x72   :  { %1677 = vmatpush.bf16.msra.mxu3 %v2872_v47  ;;  %v2941_v47 = vld [vmem:[#allocation2 + $0x4f8] sm:$0xff] }
  0x73   :  { %1636 = vmatpush.bf16.msra.mxu0 %v2847_v48  ;;  %v2029_v48 = vor.u32 %v2778_v39, %v2028_v38 }
  0x74   :  { %1650 = vmatpush.bf16.msra.mxu1 %v2855_v49  ;;  %v2037_v49 = vor.u32 %v2779_v41, %v2036_v40 }
  0x75   :  { %1664 = vmatpush.bf16.msra.mxu2 %v2863_v50  ;;  %v2033_v50 = vor.u32 %v2768_v42, %v2030_v43 }
  0x76   :  { %1678 = vmatpush.bf16.msra.mxu3 %v2871_v51  ;;  %v2041_v51 = vor.u32 %v2769_v44, %v2038_v45  ;;  %v2949_v44 = vld [vmem:[#allocation6 + $0x38] sm:$0xff] }
  0x77   :  { %1637 = vmatpush.bf16.msra.mxu0 %v2846_v52  ;;  %v2916_v52 = vld [vmem:[#allocation2 + $0x430] sm:$0xff] }
  0x78   :  { %1651 = vmatpush.bf16.msra.mxu1 %v2854_v53  ;;  %v2924_v53 = vld [vmem:[#allocation2 + $0x470] sm:$0xff] }
  0x79   :  { %1665 = vmatpush.bf16.msra.mxu2 %v2862_v54  ;;  %v2932_v54 = vld [vmem:[#allocation2 + $0x4b0] sm:$0xff] }
  0x7a   :  { %1679 = vmatpush.bf16.msra.mxu3 %v2870_v55  ;;  %1638 = vmatmul.bf16.vlgmr.msra.gmra.mxu0 %v2013_v4  ;;  %v2940_v55 = vld [vmem:[#allocation2 + $0x4f0] sm:$0xff] }
  0x7b   :  { %1686 = vmatpush.bf16.msrb.mxu0 %v2885_v56  ;;  %1652 = vmatmul.bf16.vlgmr.msra.gmra.mxu1 %v2017_v6  ;;  %v2915_v56 = vld [vmem:[#allocation2 + $0x428] sm:$0xff]  ;;  %v2912_v4 = vld [vmem:[#allocation2 + $0x410] sm:$0xff] }
  0x7c   :  { %1700 = vmatpush.bf16.msrb.mxu1 %v2893_v57  ;;  %1666 = vmatmul.bf16.vlgmr.msra.gmra.mxu2 %v2021_v5  ;;  %v2923_v57 = vld [vmem:[#allocation2 + $0x468] sm:$0xff]  ;;  %v2920_v5 = vld [vmem:[#allocation2 + $0x450] sm:$0xff] }
  0x7d   :  { %1714 = vmatpush.bf16.msrb.mxu2 %v2901_v2  ;;  %1680 = vmatmul.bf16.vlgmr.msra.gmra.mxu3 %v2025_v7  ;;  %v2929_v2 = vld [vmem:[#allocation2 + $0x498] sm:$0xff]  ;;  %v2928_v6 = vld [vmem:[#allocation2 + $0x490] sm:$0xff] }
  0x7e   :  { %1728 = vmatpush.bf16.msrb.mxu3 %v2909_v3  ;;  %v2937_v3 = vld [vmem:[#allocation2 + $0x4d8] sm:$0xff]  ;;  %v2936_v7 = vld [vmem:[#allocation2 + $0x4d0] sm:$0xff] }
  0x7f   :  { %1687 = vmatpush.bf16.msrb.mxu0 %v2884_v8  ;;  %v2911_v8 = vld [vmem:[#allocation2 + $0x408] sm:$0xff] }
  0x80   :  { %1701 = vmatpush.bf16.msrb.mxu1 %v2892_v9  ;;  %v2919_v9 = vld [vmem:[#allocation2 + $0x448] sm:$0xff] }
  0x81   :  { %1715 = vmatpush.bf16.msrb.mxu2 %v2900_v10  ;;  %v2927_v10 = vld [vmem:[#allocation2 + $0x488] sm:$0xff] }
  0x82   :  { %1729 = vmatpush.bf16.msrb.mxu3 %v2908_v11  ;;  %v2935_v11 = vld [vmem:[#allocation2 + $0x4c8] sm:$0xff] }
  0x83   :  { %1688 = vmatpush.bf16.msrb.mxu0 %v2883_v12  ;;  %v2910_v12 = vld [vmem:[#allocation2 + $0x400] sm:$0xff] }
  0x84   :  { %1702 = vmatpush.bf16.msrb.mxu1 %v2891_v13  ;;  %v2918_v13 = vld [vmem:[#allocation2 + $0x440] sm:$0xff] }
  0x85   :  { %1716 = vmatpush.bf16.msrb.mxu2 %v2899_v14  ;;  %v2926_v14 = vld [vmem:[#allocation2 + $0x480] sm:$0xff] }
  0x86   :  { %1730 = vmatpush.bf16.msrb.mxu3 %v2907_v15  ;;  %v2934_v15 = vld [vmem:[#allocation2 + $0x4c0] sm:$0xff] }
  0x87   :  { %1689 = vmatpush.bf16.msrb.mxu0 %v2882_v16  ;;  %v2044_v16 = vld [vmem:[%s3313_s0 + $0x40] sm:$0xf] }
  0x88   :  { %1703 = vmatpush.bf16.msrb.mxu1 %v2890_v17  ;;  %v2780_v17 = vld [vmem:[%s3313_s0 + $0x8c] sm:$0xf0] }
  0x89   :  { %1717 = vmatpush.bf16.msrb.mxu2 %v2898_v18  ;;  %v2770_v18 = vld [vmem:[%s3313_s0 + $0x44] sm:$0xf] }
  0x8a   :  { %1731 = vmatpush.bf16.msrb.mxu3 %v2906_v19  ;;  %v2046_v19 = vld [vmem:[%s3313_s0 + $0x90] sm:$0xf0] }
  0x8b   :  { %1690 = vmatpush.bf16.msrb.mxu0 %v2881_v20  ;;  %v2052_v20 = vld [vmem:[%s3313_s0 + $0x48] sm:$0xf] }
  0x8c   :  { %1704 = vmatpush.bf16.msrb.mxu1 %v2889_v21  ;;  %v2781_v21 = vld [vmem:[%s3313_s0 + $0x94] sm:$0xf0] }
  0x8d   :  { %1718 = vmatpush.bf16.msrb.mxu2 %v2897_v22  ;;  %v2771_v22 = vld [vmem:[%s3313_s0 + $0x4c] sm:$0xf] }
  0x8e   :  { %1732 = vmatpush.bf16.msrb.mxu3 %v2905_v23  ;;  %v2054_v23 = vld [vmem:[%s3313_s0 + $0x98] sm:$0xf0] }
  0x8f   :  { %1691 = vmatpush.bf16.msrb.mxu0 %v2880_v24  ;;  %v2045_v24 = vor.u32 %v2780_v17, %v2044_v16  ;;  %v2942_v17 = vld [vmem:[#allocation6] sm:$0xff] }
  0x90   :  { %1705 = vmatpush.bf16.msrb.mxu1 %v2888_v25  ;;  %v2049_v25 = vor.u32 %v2770_v18, %v2046_v19 }
  0x91   :  { %1719 = vmatpush.bf16.msrb.mxu2 %v2896_v26  ;;  %v2053_v26 = vor.u32 %v2781_v21, %v2052_v20 }
  0x92   :  { %1733 = vmatpush.bf16.msrb.mxu3 %v2904_v27  ;;  %v2057_v27 = vor.u32 %v2771_v22, %v2054_v23 }
  0x93   :  { %1692 = vmatpush.bf16.msrb.mxu0 %v2879_v28 }
  0x94   :  { %1706 = vmatpush.bf16.msrb.mxu1 %v2887_v29 }
  0x95   :  { %1720 = vmatpush.bf16.msrb.mxu2 %v2895_v30 }
  0x96   :  { %1734 = vmatpush.bf16.msrb.mxu3 %v2903_v31 }
  0x97   :  { %1693 = vmatpush.bf16.msrb.mxu0 %v2878_v32 }
  0x98   :  { %1707 = vmatpush.bf16.msrb.mxu1 %v2886_v33 }
  0x99   :  { %1721 = vmatpush.bf16.msrb.mxu2 %v2894_v34 }
  0x9a   :  { %1735 = vmatpush.bf16.msrb.mxu3 %v2902_v35  ;;  %1694 = vmatmul.bf16.vlgmr.msrb.gmra.mxu0 %v2029_v48 }
  0x9b   :  { %1742 = vmatpush.bf16.msra.mxu0 %v2917_v36  ;;  %1708 = vmatmul.bf16.vlgmr.msrb.gmra.mxu1 %v2033_v50 }
  0x9c   :  { %1756 = vmatpush.bf16.msra.mxu1 %v2925_v37  ;;  %1722 = vmatmul.bf16.vlgmr.msrb.gmra.mxu2 %v2037_v49  ;;  %v2966_v37 = vld [vmem:[#allocation4] ss:$0 sm:$0xff] }
  0x9d   :  { %1770 = vmatpush.bf16.msra.mxu2 %v2933_v46  ;;  %1736 = vmatmul.bf16.vlgmr.msrb.gmra.mxu3 %v2041_v51  ;;  %v2948_v46 = vld [vmem:[#allocation6 + $0x30] sm:$0xff] }
  0x9e   :  { %1784 = vmatpush.bf16.msra.mxu3 %v2941_v47 }
  0x9f   :  { %1743 = vmatpush.bf16.msra.mxu0 %v2916_v52 }
  0xa0   :  { %1757 = vmatpush.bf16.msra.mxu1 %v2924_v53 }
  0xa1   :  { %1771 = vmatpush.bf16.msra.mxu2 %v2932_v54 }
  0xa2   :  { %1785 = vmatpush.bf16.msra.mxu3 %v2940_v55 }
  0xa3   :  { %1744 = vmatpush.bf16.msra.mxu0 %v2915_v56  ;;  %v2947_v56 = vld [vmem:[#allocation6 + $0x28] sm:$0xff] }
  0xa4   :  { %1758 = vmatpush.bf16.msra.mxu1 %v2923_v57 }
  0xa5   :  { %1772 = vmatpush.bf16.msra.mxu2 %v2931_v58 }
  0xa6   :  { %1786 = vmatpush.bf16.msra.mxu3 %v2939_v59 }
  0xa7   :  { %1745 = vmatpush.bf16.msra.mxu0 %v2914_v60 }
  0xa8   :  { %1759 = vmatpush.bf16.msra.mxu1 %v2922_v61  ;;  %v2946_v61 = vld [vmem:[#allocation6 + $0x20] sm:$0xff] }
  0xa9   :  { %1773 = vmatpush.bf16.msra.mxu2 %v2930_v62 }
  0xaa   :  { %1787 = vmatpush.bf16.msra.mxu3 %v2938_v63 }
  0xab   :  { %1746 = vmatpush.bf16.msra.mxu0 %v2913_v0 }
  0xac   :  { %1760 = vmatpush.bf16.msra.mxu1 %v2921_v1  ;;  %v2945_v1 = vld [vmem:[#allocation6 + $0x18] sm:$0xff] }
  0xad   :  { %1774 = vmatpush.bf16.msra.mxu2 %v2929_v2 }
  0xae   :  { %1788 = vmatpush.bf16.msra.mxu3 %v2937_v3 }
  0xaf   :  { %1747 = vmatpush.bf16.msra.mxu0 %v2912_v4 }
  0xb0   :  { %1761 = vmatpush.bf16.msra.mxu1 %v2920_v5  ;;  %v2944_v5 = vld [vmem:[#allocation6 + $0x10] sm:$0xff] }
  0xb1   :  { %1775 = vmatpush.bf16.msra.mxu2 %v2928_v6 }
  0xb2   :  { %1789 = vmatpush.bf16.msra.mxu3 %v2936_v7 }
  0xb3   :  { %1748 = vmatpush.bf16.msra.mxu0 %v2911_v8 }
  0xb4   :  { %1762 = vmatpush.bf16.msra.mxu1 %v2919_v9 }
  0xb5   :  { %1776 = vmatpush.bf16.msra.mxu2 %v2927_v10 }
  0xb6   :  { %1790 = vmatpush.bf16.msra.mxu3 %v2935_v11 }
  0xb7   :  { %1749 = vmatpush.bf16.msra.mxu0 %v2910_v12  ;;  %v1527_v28 = vpop.f32.mrf.mxu0  ;;  %v2943_v12 = vld [vmem:[#allocation6 + $0x8] sm:$0xff] }
  0xb8   :  { %1763 = vmatpush.bf16.msra.mxu1 %v2918_v13  ;;  %v1541_v29 = vpop.f32.mrf.mxu1  ;;  %v1528_v39 = vadd.f32 %v2966_v37, %v1527_v28 }
  0xb9   :  { %1777 = vmatpush.bf16.msra.mxu2 %v2926_v14 }
  0xba   :  { %1791 = vmatpush.bf16.msra.mxu3 %v2934_v15  ;;  %1750 = vmatmul.bf16.vlgmr.msra.gmra.mxu0 %v2045_v24  ;;  %v1542_v42 = vadd.f32 %v1541_v29, %v1528_v39 }
  0xbb   :  { %1764 = vmatmul.bf16.vlgmr.msra.gmra.mxu1 %v2049_v25  ;;  %1869 = vmatpush.bf16.msrb.mxu0 %v2949_v44  ;;  %v2957_v25 = vld [vmem:[#allocation9 + $0x38] sm:$0xff] }
  0xbc   :  { %1778 = vmatmul.bf16.vlgmr.msra.gmra.mxu2 %v2053_v26  ;;  %1954 = vmatpush.bf16.msrb.mxu1 %v2957_v25 }
  0xbd   :  { %1792 = vmatmul.bf16.vlgmr.msra.gmra.mxu3 %v2057_v27  ;;  %v2956_v27 = vld [vmem:[#allocation9 + $0x30] sm:$0xff] }
  0xbf   :  { %v1555_v30 = vpop.f32.mrf.mxu2  ;;  %v1529_v32 = vpop.f32.mrf.mxu0  ;;  %1870 = vmatpush.bf16.msrb.mxu0 %v2948_v46 }
  0xc0   :  { %v1569_v31 = vpop.f32.mrf.mxu3  ;;  %v1543_v33 = vpop.f32.mrf.mxu1  ;;  %v1530_v45 = vadd.f32 %v2966_v37, %v1529_v32  ;;  %v1556_v48 = vadd.f32 %v1555_v30, %v1542_v42  ;;  %1955 = vmatpush.bf16.msrb.mxu1 %v2956_v27  ;;  %v2955_v32 = vld [vmem:[#allocation9 + $0x28] sm:$0xff] }
  0xc2   :  { %v1544_v49 = vadd.f32 %v1543_v33, %v1530_v45  ;;  %v1570_v52 = vadd.f32 %v1569_v31, %v1556_v48 }
  0xc3   :  { %1871 = vmatpush.bf16.msrb.mxu0 %v2947_v56 }
  0xc4   :  { %1956 = vmatpush.bf16.msrb.mxu1 %v2955_v32 }
  0xc7   :  { %v1557_v34 = vpop.f32.mrf.mxu2  ;;  %1872 = vmatpush.bf16.msrb.mxu0 %v2946_v61  ;;  %v2952_v61 = vld [vmem:[#allocation9 + $0x10] sm:$0xff] }
  0xc8   :  { %v1571_v35 = vpop.f32.mrf.mxu3  ;;  %v1558_v54 = vadd.f32 %v1557_v34, %v1544_v49 }
  0xca   :  { %v1572_v58 = vadd.f32 %v1571_v35, %v1558_v54 }
  0xcb   :  { %1873 = vmatpush.bf16.msrb.mxu0 %v2945_v1  ;;  %v2967_v1 = vld [vmem:[#allocation7] ss:$0 sm:$0xff] }
  0xcf   :  { %1874 = vmatpush.bf16.msrb.mxu0 %v2944_v5 }
  0xd3   :  { %1875 = vmatpush.bf16.msrb.mxu0 %v2943_v12 }
  0xd7   :  { %v1583_v36 = vpop.f32.mrf.mxu0  ;;  %1876 = vmatpush.bf16.msrb.mxu0 %v2942_v17 }
  0xd8   :  { %v1597_v38 = vpop.f32.mrf.mxu1  ;;  %v1584_v57 = vadd.f32 %v1583_v36, %v1570_v52 }
  0xda   :  { %v1598_v62 = vadd.f32 %v1597_v38, %v1584_v57  ;;  %v2954_v38 = vld [vmem:[#allocation9 + $0x20] sm:$0xff] }
  0xdb   :  { %1957 = vmatpush.bf16.msrb.mxu1 %v2954_v38 }
  0xdf   :  { %v1611_v40 = vpop.f32.mrf.mxu2  ;;  %v1585_v43 = vpop.f32.mrf.mxu0 }
  0xe0   :  { %v1625_v41 = vpop.f32.mrf.mxu3  ;;  %v1599_v47 = vpop.f32.mrf.mxu1  ;;  %v1586_v63 = vadd.f32 %v1585_v43, %v1572_v58  ;;  %v1612_v2 = vadd.f32 %v1611_v40, %v1598_v62  ;;  %v2951_v62 = vld [vmem:[#allocation9 + $0x8] sm:$0xff] }
  0xe2   :  { %v1600_v4 = vadd.f32 %v1599_v47, %v1586_v63  ;;  %v1626_v6 = vadd.f32 %v1625_v41, %v1612_v2  ;;  %v2950_v63 = vld [vmem:[#allocation9] sm:$0xff] }
  0xe7   :  { %v1613_v50 = vpop.f32.mrf.mxu2 }
  0xe8   :  { %v1627_v51 = vpop.f32.mrf.mxu3  ;;  %v1614_v7 = vadd.f32 %v1613_v50, %v1600_v4 }
  0xea   :  { %v1628_v13 = vadd.f32 %v1627_v51, %v1614_v7 }
  0xf7   :  { %v1639_v53 = vpop.f32.mrf.mxu0 }
  0xf8   :  { %v1653_v55 = vpop.f32.mrf.mxu1  ;;  %v1640_v10 = vadd.f32 %v1639_v53, %v1626_v6 }
  0xfa   :  { %v1654_v15 = vadd.f32 %v1653_v55, %v1640_v10 }
  0xff   :  { %v1667_v59 = vpop.f32.mrf.mxu2  ;;  %v1641_v0 = vpop.f32.mrf.mxu0 }
 0x100   :  { %v1681_v60 = vpop.f32.mrf.mxu3  ;;  %v1655_v3 = vpop.f32.mrf.mxu1  ;;  %v1642_v16 = vadd.f32 %v1641_v0, %v1628_v13  ;;  %v1668_v18 = vadd.f32 %v1667_v59, %v1654_v15 }
 0x102   :  { %v1656_v21 = vadd.f32 %v1655_v3, %v1642_v16  ;;  %v1682_v22 = vadd.f32 %v1681_v60, %v1668_v18  ;;  %v2953_v60 = vld [vmem:[#allocation9 + $0x18] sm:$0xff] }
 0x103   :  { %1958 = vmatpush.bf16.msrb.mxu1 %v2953_v60 }
 0x107   :  { %v1669_v8 = vpop.f32.mrf.mxu2  ;;  %1959 = vmatpush.bf16.msrb.mxu1 %v2952_v61 }
 0x108   :  { %v1683_v9 = vpop.f32.mrf.mxu3  ;;  %v1670_v23 = vadd.f32 %v1669_v8, %v1656_v21  ;;  %v2968_v8 = vld [vmem:[#allocation10] ss:$0 sm:$0xff] }
 0x10a   :  { %v1684_v29 = vadd.f32 %v1683_v9, %v1670_v23 }
 0x10b   :  { %1960 = vmatpush.bf16.msrb.mxu1 %v2951_v62 }
 0x10f   :  { %1961 = vmatpush.bf16.msrb.mxu1 %v2950_v63 }
 0x117   :  { %v1695_v11 = vpop.f32.mrf.mxu0 }
 0x118   :  { %v1709_v14 = vpop.f32.mrf.mxu1  ;;  %v1696_v26 = vadd.f32 %v1695_v11, %v1682_v22 }
 0x11a   :  { %v1710_v30 = vadd.f32 %v1709_v14, %v1696_v26 }
 0x11f   :  { %v1723_v19 = vpop.f32.mrf.mxu2  ;;  %v1697_v24 = vpop.f32.mrf.mxu0 }
 0x120   :  { %v1737_v20 = vpop.f32.mrf.mxu3  ;;  %v1711_v28 = vpop.f32.mrf.mxu1  ;;  %v1698_v31 = vadd.f32 %v1697_v24, %v1684_v29  ;;  %v1724_v35 = vadd.f32 %v1723_v19, %v1710_v30 }
 0x122   :  { %v1712_v37 = vadd.f32 %v1711_v28, %v1698_v31  ;;  %v1738_v40 = vadd.f32 %v1737_v20, %v1724_v35 }
 0x127   :  { %v1725_v33 = vpop.f32.mrf.mxu2 }
 0x128   :  { %v1739_v34 = vpop.f32.mrf.mxu3  ;;  %v1726_v41 = vadd.f32 %v1725_v33, %v1712_v37 }
 0x12a   :  { %v1740_v45 = vadd.f32 %v1739_v34, %v1726_v41 }
 0x137   :  { %v1751_v36 = vpop.f32.mrf.mxu0 }
 0x138   :  { %v1765_v39 = vpop.f32.mrf.mxu1  ;;  %v1752_v42 = vadd.f32 %v1751_v36, %v1738_v40 }
 0x13a   :  { %v1766_v47 = vadd.f32 %v1765_v39, %v1752_v42 }
 0x13f   :  { %v1779_v43 = vpop.f32.mrf.mxu2  ;;  %v1753_v46 = vpop.f32.mrf.mxu0 }
 0x140   :  { %v1793_v44 = vpop.f32.mrf.mxu3  ;;  %v1754_v48 = vadd.f32 %v1753_v46, %v1740_v45  ;;  %v1780_v49 = vadd.f32 %v1779_v43, %v1766_v47  ;;  %v1767_v50 = vpop.f32.mrf.mxu1 }
 0x142   :  { %v1768_v51 = vadd.f32 %v1767_v50, %v1754_v48  ;;  %v1794_v53 = vadd.f32 %v1793_v44, %v1780_v49 }
 0x144   :  { %v1798_v57 = vmax.f32 %v1794_v53, 0.0 }
 0x147   :  { %v1781_v52 = vpop.f32.mrf.mxu2 }
 0x148   :  { %v1782_v54 = vadd.f32 %v1781_v52, %v1768_v51  ;;  %v1795_v55 = vpop.f32.mrf.mxu3 }
 0x14a   :  { %v1796_v56 = vadd.f32 %v1795_v55, %v1782_v54 }
 0x14c   :  { %v1799_v58 = vmax.f32 %v1796_v56, 0.0 }
 0x14e   :  { %v1800_v59 = vpack.c.bf16 %v1799_v58, %v1798_v57 }
 0x150   :  { %1877 = vmatmul.bf16.vlgmr.msrb.gmra.mxu0 %v1800_v59 }
 0x1cd   :  { %v1878_v0 = vpop.f32.mrf.mxu0 }
 0x1ce   :  { %v1879_v2 = vadd.f32 %v2967_v1, %v1878_v0 }
 0x1d0   :  { %v1883_v5 = vmax.f32 %v1879_v2, 0.0 }
 0x1d5   :  { %v1880_v3 = vpop.f32.mrf.mxu0 }
 0x1d6   :  { %v1881_v4 = vadd.f32 %v2967_v1, %v1880_v3 }
 0x1d8   :  { %v1884_v6 = vmax.f32 %v1881_v4, 0.0 }
 0x1da   :  { %v1885_v7 = vpack.c.bf16 %v1884_v6, %v1883_v5 }
 0x1dc   :  { %1962 = vmatmul.bf16.vlgmr.msrb.gmra.mxu1 %v1885_v7 }
 0x259   :  { %v1963_v9 = vpop.f32.mrf.mxu1 }
 0x25a   :  { %v1964_v10 = vadd.f32 %v2968_v8, %v1963_v9 }
 0x25c   :  { %1968 = vst [vmem:[%s3320_s7] sm:$0xff] %v1964_v10 }
 0x261   :  { %v1965_v11 = vpop.f32.mrf.mxu1 }
 0x262   :  { %v1966_v12 = vadd.f32 %v2968_v8, %v1965_v11 }
 0x264   :  { %1969 = vst [vmem:[%s3320_s7 + $0x8] sm:$0xff] %v1966_v12 }
 0x265   :  { %1974 = vsyncpa [#allocation3], 1 }
 0x266   :  { %1975 = vsyncpa [#allocation5], 1 }
 0x267   :  { %1976 = vsyncpa [#allocation8], 1 }
 0x268   :  { %1977 = vsyncpa [#allocation11], 1 }

// kernel: cnn_forward.2
= control target key start
LH: loop header
LB: loop body
LE: loop exit
PB: predicated region body
PF: predicated region fallthrough
CT: control target
= control target key end

     0   :  { %8 = vsyncpa [#allocation3], 0  ;;  %s10809_s0 = inlined_call_operand.vmem [shape: bf16[16,2560], index: 0, kind: input, shape index: {}]   ;;  %s10810_s1 = inlined_call_operand.hbm [shape: bf16[2560,2560], index: 1, kind: input, shape index: {}]   ;;  %s10811_s2 = inlined_call_operand.hbm [shape: f32[1,2560], index: 2, kind: input, shape index: {}]   ;;  %s10812_s3 = inlined_call_operand.vmem [shape: bf16[16,2560], index: 3, kind: output, shape index: {}]  }
   0x1   :  { %10 = vsyncpa [#allocation3 + $0x1], 0 }
   0x2   :  { %11 = vsyncpa [#allocation5], 0 }
   0x3   :  { %13 = vsyncpa [#allocation5 + $0x1], 0  ;;  %s8944_s12 = smov 0   ;;  %s8946_s13 = smov 0  }
   0x4   :  { %s8948_s14 = smov 0   ;;  %s8950_s15 = smov 0  }
   0x5 LB: > { %s8963_s16 = sadd.s32 4294967295, %s8919_s15   ;;  %s8966_s17 = sadd.s32 1, %s8919_s15   ;;  %s8919_s15 = sphi %s8950_s15, %s10873_s15   ;;  %s8915_s14 = sphi %s8948_s14, %s10872_s14   ;;  %s8911_s13 = sphi %s8946_s13, %s10871_s13   ;;  %s8907_s12 = sphi %s8944_s12, %s10870_s12  }
   0x6   : > { %s44_s18 = ssub.s32 %s8919_s15, %s8966_s17  ;;  %s47_s19 = sadd.s32 1, %s8915_s14 }
   0x7   : > { %p45_p0 = scmp.eq.s32.totalorder %s44_s18, 0  ;;  %p54_p1 = scmp.ne.s32.totalorder %s8915_s14, %s8911_s13 }
   0x8   : > { %p55_p2 = scmp.eq.s32.totalorder %s8919_s15, 0  ;;  %p60_p3 = scmp.ne.s32.totalorder %s8911_s13, %s8907_s12 }
   0x9   : > { %s8976_s20 = scalar_select %p45_p0, %s8915_s14, %s47_s19  }
   0xa   : > { %p56_p4 = por %p55_p2, %p54_p1  ;;  %p61_p5 = scmp.eq.s32.totalorder %s8963_s16, 0 }
   0xb   : > { %p110_p6 = scmp.eq.s32.totalorder %s8963_s16, 4  ;;  %p8783_p8 = scmp.lt.s32.totalorder %s8919_s15, 5 }
   0xc   : > { %p8980_p7 = por %p61_p5, %p60_p3  ;;  %s8990_s23 = sand.u32 1, %s8915_s14  }
   0xd   : > { %p8985_p9 = por %p110_p6, %p54_p1  ;;  %s8770_s24 = smul.u32 5120, %s8990_s23 }
   0xe   : > { %s8108_s25 = sshll.u32 %s8919_s15, 4  ;;  %p8994_p10 = pnand %p8783_p8, %p56_p4 }
   0xf   : > { %s148_s29 = scalar_lea.hbm %s10810_s1, %s8108_s25  ;;  %s143_s4 = scalar_lea.vmem [#allocation2], %s8770_s24 }
  0x10   : > { %s149_s30 = sshll.u32 %s148_s29, 4  ;;  %s151_s5 = sshll.u32 %s143_s4, 4  ;;  %s150_s30 = int_to_ptr.hbm [resolvable:$true] %s149_s30  ;;  %s152_s5 = int_to_ptr.vmem [resolvable:$true] %s151_s5 }
  0x11   : > { %s140_s6 = scalar_lea.sflag [#allocation3], %s8990_s23  ;;  %s8821_s7 = sshra.s32 %s150_s30, 4  ;;  %s8822_s7 = int_to_ptr.hbm [resolvable:$true] %s8821_s7 }
  0x12   : > { %s8823_s8 = scalar_lea.hbm %s8822_s7, 5120  ;;  %p8825_p12 = pneg %p8994_p10 }
  0x13   : > { %p8824_p11 = scmp.ne.s32.totalorder %s8822_s7, %s8823_s8  ;;  %s8828_s11 = scalar_lea.hbm %s10810_s1, 25600 }
  0x14   : > { %p8829_p1 = scmp.lt.s32.totalorder %s8822_s7, %s10810_s1  ;;  %p8830_p2 = scmp.lt.s32.totalorder %s8828_s11, %s8823_s8 }
  0x15   : > { %p8826_p13 = pnand %p8825_p12, %p8824_p11 }
  0x16   : > { %p8831_p3 = por %p8830_p2, %p8829_p1 }
  0x17   : > { %p8827_p0 = pneg %p8826_p13 }
  0x19   : > { %p8832_p4 = pnand %p8831_p3, %p8827_p0 }
  0x1b   : > { %8835 = shalt.err (!%p8832_p4)
}
  0x1c   : > { %s8921_s19 = smov 1280   ;;  %s8922_s24 = smov 256  }
  0x1d   : > { %s8923_s25 = smov 16   ;;  %p5460_p5 = scmp.ge.s32.totalorder %s8919_s15, 1 }
  0x1e   : > { %8779 = dma.hbm_to_vmem [thread:$0]  (!%p8994_p10), %s150_s30, 81920, %s152_s5, %s140_s6, %s8921_s19, %s8922_s24, %s8923_s25  }
  0x1f   : > { %p178_p6 = scmp.lt.s32.totalorder %s8919_s15, 6  ;;  %s5458_s27 = sshll.u32 %s8990_s23, 2 }
  0x20   : > { %s5459_s29 = sshll.u32 %s8919_s15, 2  ;;  %s165_s4 = scalar_lea.vmem [#allocation4], %s5458_s27 }
  0x21   : > { %p9018_p8 = pnand %p5460_p5, %p178_p6  ;;  %s173_s7 = sshll.u32 %s165_s4, 4  ;;  %s174_s7 = int_to_ptr.vmem [resolvable:$true] %s173_s7 }
  0x22   : > { %s169_s10 = scalar_lea.hbm %s10811_s2, %s5459_s29  ;;  %s162_s12 = scalar_lea.sflag [#allocation5], %s8990_s23 }
  0x23   : > { %s171_s11 = sshll.u32 %s169_s10, 4  ;;  %s8858_s18 = scalar_lea.hbm %s10811_s2, 20  ;;  %s172_s11 = int_to_ptr.hbm [resolvable:$true] %s171_s11 }
  0x24   : > { %s8851_s30 = sshra.s32 %s172_s11, 4  ;;  %s8852_s30 = int_to_ptr.hbm [resolvable:$true] %s8851_s30 }
  0x25   : > { %s8853_s5 = scalar_lea.hbm %s8852_s30, 4  ;;  %p8859_p1 = scmp.lt.s32.totalorder %s8852_s30, %s10811_s2 }
  0x26   : > { %p8854_p11 = scmp.ne.s32.totalorder %s8852_s30, %s8853_s5  ;;  %p8860_p2 = scmp.lt.s32.totalorder %s8858_s18, %s8853_s5 }
  0x28   : > { %p8856_p13 = pnand %p8854_p11, %p8825_p12  ;;  %p8861_p3 = por %p8860_p2, %p8859_p1 }
  0x2a   : > { %p8857_p0 = pneg %p8856_p13 }
  0x2c   : > { %p8862_p4 = pnand %p8861_p3, %p8857_p0 }
  0x2e   : > { %8865 = shalt.err (!%p8862_p4)
}
  0x2f   : > { %8782 = dma.hbm_to_vmem [thread:$0]  (!%p8994_p10), %s172_s11, 64, %s174_s7, %s162_s12  }
  0x30   : > { %182 = sbr.rel (%p9018_p8) target bundleno = 866 (0x362), region = 32 }
  0x35   : > { %s9041_s23 = sand.u32 1, %s8911_s13  }
  0x36   : > { %s8771_s25 = smul.u32 5120, %s9041_s23  ;;  %s185_s27 = scalar_lea.sflag [#allocation3], %s9041_s23 }
  0x38   : > { %s9045_s29 = scalar_lea.vmem [#allocation2], %s8771_s25 }
  0x39   : > { %8898 = dma.done.wait (%p8980_p7), %s185_s27, 81920  }
  0x3a   : > { %8900 = vsyncadd (%p8980_p7), %s185_s27, 4294885376  ;;  %s5461_s26 = sshll.u32 %s9041_s23, 2  ;;  %s195_s28 = scalar_lea.sflag [#allocation5], %s9041_s23 }
  0x3b   : > { %s9053_s4 = scalar_lea.vmem [#allocation4], %s5461_s26 }
  0x3c   : > { %8902 = dma.done.wait (%p8980_p7), %s195_s28, 64  }
  0x3d   : > { %8904 = vsyncadd (%p8980_p7), %s195_s28, 4294967232  ;;  %v5657_v0 = vld [vmem:[%s9045_s29 + $0xe0] sm:$0xf]  ;;  %v8159_v1 = vld [vmem:[%s9045_s29 + $0xec] sm:$0xf0]  ;;  %s5462_s5 = sshll.u32 %s9041_s23, 5 }
  0x3e   : > { %v5785_v2 = vld [vmem:[%s9045_s29 + $0x1e0] sm:$0xf]  ;;  %v5658_v3 = vor.u32 %v8159_v1, %v5657_v0  ;;  %v8191_v4 = vld [vmem:[%s9045_s29 + $0x1ec] sm:$0xf0]  ;;  %s10404_s6 = scalar_lea.vmem [#allocation6], %s5462_s5  ;;  %s8769_s23 = sshll.u32 (%p8985_p9), %s8963_s16, 4 }
  0x3f   : > { %v5913_v5 = vld [vmem:[%s9045_s29 + $0x2e0] sm:$0xf]  ;;  %v8223_v6 = vld [vmem:[%s9045_s29 + $0x2ec] sm:$0xf0]  ;;  %v5786_v7 = vor.u32 %v8191_v4, %v5785_v2  ;;  %s5344_s15 = scalar_lea.vmem (%p8985_p9), %s10812_s3, %s8769_s23 }
  0x40   : > { %v5914_v8 = vor.u32 %v8223_v6, %v5913_v5  ;;  %v6041_v9 = vld [vmem:[%s9045_s29 + $0x3e0] sm:$0xf]  ;;  %v8255_v10 = vld [vmem:[%s9045_s29 + $0x3ec] sm:$0xf0]  ;;  %4199 = vmatpush.bf16.msra.mxu0 %v5658_v3 }
  0x41   : > { %v5641_v11 = vld [vmem:[%s9045_s29 + $0xc0] sm:$0xf]  ;;  %v6042_v12 = vor.u32 %v8255_v10, %v6041_v9  ;;  %v8155_v13 = vld [vmem:[%s9045_s29 + $0xcc] sm:$0xf0]  ;;  %4213 = vmatpush.bf16.msra.mxu1 %v5786_v7 }
  0x42   : > { %v5769_v14 = vld [vmem:[%s9045_s29 + $0x1c0] sm:$0xf]  ;;  %v8187_v15 = vld [vmem:[%s9045_s29 + $0x1cc] sm:$0xf0]  ;;  %4227 = vmatpush.bf16.msra.mxu2 %v5914_v8  ;;  %v5642_v16 = vor.u32 %v8155_v13, %v5641_v11 }
  0x43   : > { %v5770_v17 = vor.u32 %v8187_v15, %v5769_v14  ;;  %v5897_v18 = vld [vmem:[%s9045_s29 + $0x2c0] sm:$0xf]  ;;  %v8219_v19 = vld [vmem:[%s9045_s29 + $0x2cc] sm:$0xf0]  ;;  %4241 = vmatpush.bf16.msra.mxu3 %v6042_v12 }
  0x44   : > { %v6025_v20 = vld [vmem:[%s9045_s29 + $0x3c0] sm:$0xf]  ;;  %v5898_v21 = vor.u32 %v8219_v19, %v5897_v18  ;;  %v8251_v22 = vld [vmem:[%s9045_s29 + $0x3cc] sm:$0xf0]  ;;  %4200 = vmatpush.bf16.msra.mxu0 %v5642_v16 }
  0x45   : > { %v5625_v23 = vld [vmem:[%s9045_s29 + $0xa0] sm:$0xf]  ;;  %v8151_v24 = vld [vmem:[%s9045_s29 + $0xac] sm:$0xf0]  ;;  %v6026_v25 = vor.u32 %v8251_v22, %v6025_v20  ;;  %4214 = vmatpush.bf16.msra.mxu1 %v5770_v17 }
  0x46   : > { %v5753_v26 = vld [vmem:[%s9045_s29 + $0x1a0] sm:$0xf]  ;;  %v8183_v27 = vld [vmem:[%s9045_s29 + $0x1ac] sm:$0xf0]  ;;  %v5626_v29 = vor.u32 %v8151_v24, %v5625_v23  ;;  %4228 = vmatpush.bf16.msra.mxu2 %v5898_v21 }
  0x47   : > { %v5881_v28 = vld [vmem:[%s9045_s29 + $0x2a0] sm:$0xf]  ;;  %v8215_v30 = vld [vmem:[%s9045_s29 + $0x2ac] sm:$0xf0]  ;;  %v5754_v33 = vor.u32 %v8183_v27, %v5753_v26  ;;  %4242 = vmatpush.bf16.msra.mxu3 %v6026_v25 }
  0x48   : > { %v6009_v31 = vld [vmem:[%s9045_s29 + $0x3a0] sm:$0xf]  ;;  %v8247_v32 = vld [vmem:[%s9045_s29 + $0x3ac] sm:$0xf0]  ;;  %v5882_v34 = vor.u32 %v8215_v30, %v5881_v28  ;;  %4201 = vmatpush.bf16.msra.mxu0 %v5626_v29 }
  0x49   : > { %v5609_v35 = vld [vmem:[%s9045_s29 + $0x80] sm:$0xf]  ;;  %v8147_v36 = vld [vmem:[%s9045_s29 + $0x8c] sm:$0xf0]  ;;  %v6010_v38 = vor.u32 %v8247_v32, %v6009_v31  ;;  %4215 = vmatpush.bf16.msra.mxu1 %v5754_v33 }
  0x4a   : > { %v5737_v37 = vld [vmem:[%s9045_s29 + $0x180] sm:$0xf]  ;;  %v8179_v39 = vld [vmem:[%s9045_s29 + $0x18c] sm:$0xf0]  ;;  %v5610_v44 = vor.u32 %v8147_v36, %v5609_v35  ;;  %4229 = vmatpush.bf16.msra.mxu2 %v5882_v34 }
  0x4b   : > { %v5865_v40 = vld [vmem:[%s9045_s29 + $0x280] sm:$0xf]  ;;  %v8211_v41 = vld [vmem:[%s9045_s29 + $0x28c] sm:$0xf0]  ;;  %v5738_v45 = vor.u32 %v8179_v39, %v5737_v37  ;;  %4243 = vmatpush.bf16.msra.mxu3 %v6010_v38 }
  0x4c   : > { %v5993_v42 = vld [vmem:[%s9045_s29 + $0x380] sm:$0xf]  ;;  %v8243_v43 = vld [vmem:[%s9045_s29 + $0x38c] sm:$0xf0]  ;;  %v5866_v46 = vor.u32 %v8211_v41, %v5865_v40  ;;  %4202 = vmatpush.bf16.msra.mxu0 %v5610_v44 }
  0x4d   : > { %v5593_v47 = vld [vmem:[%s9045_s29 + $0x60] sm:$0xf]  ;;  %v8143_v48 = vld [vmem:[%s9045_s29 + $0x6c] sm:$0xf0]  ;;  %v5994_v50 = vor.u32 %v8243_v43, %v5993_v42  ;;  %4216 = vmatpush.bf16.msra.mxu1 %v5738_v45 }
  0x4e   : > { %v5721_v49 = vld [vmem:[%s9045_s29 + $0x160] sm:$0xf]  ;;  %v8175_v51 = vld [vmem:[%s9045_s29 + $0x16c] sm:$0xf0]  ;;  %v5594_v56 = vor.u32 %v8143_v48, %v5593_v47  ;;  %4230 = vmatpush.bf16.msra.mxu2 %v5866_v46 }
  0x4f   : > { %v5849_v52 = vld [vmem:[%s9045_s29 + $0x260] sm:$0xf]  ;;  %v8207_v53 = vld [vmem:[%s9045_s29 + $0x26c] sm:$0xf0]  ;;  %v5722_v57 = vor.u32 %v8175_v51, %v5721_v49  ;;  %4244 = vmatpush.bf16.msra.mxu3 %v5994_v50 }
  0x50   : > { %v5977_v54 = vld [vmem:[%s9045_s29 + $0x360] sm:$0xf]  ;;  %v8239_v55 = vld [vmem:[%s9045_s29 + $0x36c] sm:$0xf0]  ;;  %v5850_v58 = vor.u32 %v8207_v53, %v5849_v52  ;;  %4203 = vmatpush.bf16.msra.mxu0 %v5594_v56 }
  0x51   : > { %v5577_v59 = vld [vmem:[%s9045_s29 + $0x40] sm:$0xf]  ;;  %v8139_v60 = vld [vmem:[%s9045_s29 + $0x4c] sm:$0xf0]  ;;  %v5978_v62 = vor.u32 %v8239_v55, %v5977_v54  ;;  %4217 = vmatpush.bf16.msra.mxu1 %v5722_v57  ;;  %v5473_v54 = vld [vmem:[%s10809_s0 + $0x8] sm:$0xf] }
  0x52   : > { %v5705_v61 = vld [vmem:[%s9045_s29 + $0x140] sm:$0xf]  ;;  %v8171_v63 = vld [vmem:[%s9045_s29 + $0x14c] sm:$0xf0]  ;;  %v5578_v4 = vor.u32 %v8139_v60, %v5577_v59  ;;  %4231 = vmatpush.bf16.msra.mxu2 %v5850_v58  ;;  %v8120_v59 = vld [vmem:[%s10809_s0 + $0x54] sm:$0xf0] }
  0x53   : > { %v5833_v0 = vld [vmem:[%s9045_s29 + $0x240] sm:$0xf]  ;;  %v8203_v1 = vld [vmem:[%s9045_s29 + $0x24c] sm:$0xf0]  ;;  %v5706_v5 = vor.u32 %v8171_v63, %v5705_v61  ;;  %4245 = vmatpush.bf16.msra.mxu3 %v5978_v62 }
  0x54   : > { %v5961_v2 = vld [vmem:[%s9045_s29 + $0x340] sm:$0xf]  ;;  %v8235_v3 = vld [vmem:[%s9045_s29 + $0x34c] sm:$0xf0]  ;;  %v5834_v6 = vor.u32 %v8203_v1, %v5833_v0  ;;  %4204 = vmatpush.bf16.msra.mxu0 %v5578_v4  ;;  %v9158_v1 = vor.u32 %v8120_v59, %v5473_v54 }
  0x55   : > { %v5561_v7 = vld [vmem:[%s9045_s29 + $0x20] sm:$0xf]  ;;  %v8135_v8 = vld [vmem:[%s9045_s29 + $0x2c] sm:$0xf0]  ;;  %v5962_v10 = vor.u32 %v8235_v3, %v5961_v2  ;;  %4218 = vmatpush.bf16.msra.mxu1 %v5706_v5 }
  0x56   : > { %v5689_v9 = vld [vmem:[%s9045_s29 + $0x120] sm:$0xf]  ;;  %v8167_v11 = vld [vmem:[%s9045_s29 + $0x12c] sm:$0xf0]  ;;  %v5562_v16 = vor.u32 %v8135_v8, %v5561_v7  ;;  %4232 = vmatpush.bf16.msra.mxu2 %v5834_v6  ;;  %10836 = vst [vmem:[#allocation10_spill] sm:$0xff] %v9158_v1 }
  0x57   : > { %v5817_v12 = vld [vmem:[%s9045_s29 + $0x220] sm:$0xf]  ;;  %v8199_v13 = vld [vmem:[%s9045_s29 + $0x22c] sm:$0xf0]  ;;  %v5690_v19 = vor.u32 %v8167_v11, %v5689_v9  ;;  %4246 = vmatpush.bf16.msra.mxu3 %v5962_v10  ;;  %v8109_v6 = vld [vmem:[%s10809_s0 + $0x4] sm:$0xf] }
  0x58   : > { %v5945_v14 = vld [vmem:[%s9045_s29 + $0x320] sm:$0xf]  ;;  %v8231_v15 = vld [vmem:[%s9045_s29 + $0x32c] sm:$0xf0]  ;;  %v5818_v20 = vor.u32 %v8199_v13, %v5817_v12  ;;  %4205 = vmatpush.bf16.msra.mxu0 %v5562_v16  ;;  %v5467_v7 = vld [vmem:[%s10809_s0 + $0x50] sm:$0xf0] }
  0x59   : > { %v5545_v17 = vld [vmem:[%s9045_s29] sm:$0xf]  ;;  %v8131_v18 = vld [vmem:[%s9045_s29 + $0xc] sm:$0xf0]  ;;  %v5946_v24 = vor.u32 %v8231_v15, %v5945_v14  ;;  %4219 = vmatpush.bf16.msra.mxu1 %v5690_v19  ;;  %v8110_v8 = vld [vmem:[%s10809_s0 + $0xc] sm:$0xf]  ;;  %v9174_v10 = vor.u32 %v8109_v6, %v5467_v7 }
  0x5a   : > { %v5673_v21 = vld [vmem:[%s9045_s29 + $0x100] sm:$0xf]  ;;  %v8163_v22 = vld [vmem:[%s9045_s29 + $0x10c] sm:$0xf0]  ;;  %v5546_v31 = vor.u32 %v8131_v18, %v5545_v17  ;;  %4233 = vmatpush.bf16.msra.mxu2 %v5818_v20  ;;  %v5475_v11 = vld [vmem:[%s10809_s0 + $0x58] sm:$0xf0] }
  0x5b   : > { %v5801_v23 = vld [vmem:[%s9045_s29 + $0x200] sm:$0xf]  ;;  %v8195_v25 = vld [vmem:[%s9045_s29 + $0x20c] sm:$0xf0]  ;;  %v5674_v35 = vor.u32 %v8163_v22, %v5673_v21  ;;  %4247 = vmatpush.bf16.msra.mxu3 %v5946_v24  ;;  %10837 = vst [vmem:[#allocation11_spill] sm:$0xff] %v9174_v10  ;;  %v9182_v17 = vor.u32 %v8110_v8, %v5475_v11 }
  0x5c   : > { %v5929_v26 = vld [vmem:[%s9045_s29 + $0x300] sm:$0xf]  ;;  %v8227_v27 = vld [vmem:[%s9045_s29 + $0x30c] sm:$0xf0]  ;;  %v5802_v36 = vor.u32 %v8195_v25, %v5801_v23  ;;  %4206 = vmatpush.bf16.msra.mxu0 %v5546_v31 }
  0x5d   : > { %v6169_v28 = vld [vmem:[%s9045_s29 + $0x4e0] sm:$0xf]  ;;  %v8287_v29 = vld [vmem:[%s9045_s29 + $0x4ec] sm:$0xf0]  ;;  %v5930_v39 = vor.u32 %v8227_v27, %v5929_v26  ;;  %4220 = vmatpush.bf16.msra.mxu1 %v5674_v35  ;;  %10838 = vst [vmem:[#allocation12_spill] sm:$0xff] %v9182_v17 }
  0x5e   : > { %v6297_v30 = vld [vmem:[%s9045_s29 + $0x5e0] sm:$0xf]  ;;  %v8319_v32 = vld [vmem:[%s9045_s29 + $0x5ec] sm:$0xf0]  ;;  %v6170_v40 = vor.u32 %v8287_v29, %v6169_v28  ;;  %4234 = vmatpush.bf16.msra.mxu2 %v5802_v36 }
  0x5f   : > { %v6425_v33 = vld [vmem:[%s9045_s29 + $0x6e0] sm:$0xf]  ;;  %v8351_v34 = vld [vmem:[%s9045_s29 + $0x6ec] sm:$0xf0]  ;;  %v6298_v43 = vor.u32 %v8319_v32, %v6297_v30  ;;  %4248 = vmatpush.bf16.msra.mxu3 %v5930_v39 }
  0x60   : > { %v6553_v37 = vld [vmem:[%s9045_s29 + $0x7e0] sm:$0xf]  ;;  %v8383_v38 = vld [vmem:[%s9045_s29 + $0x7ec] sm:$0xf0]  ;;  %v6426_v44 = vor.u32 %v8351_v34, %v6425_v33  ;;  %4255 = vmatpush.bf16.msrb.mxu0 %v6170_v40  ;;  %4221 = vmatmul.bf16.vlgmr.msra.gmra.mxu1 %v9174_v10 }
  0x61   : > { %v6153_v41 = vld [vmem:[%s9045_s29 + $0x4c0] sm:$0xf]  ;;  %v8283_v42 = vld [vmem:[%s9045_s29 + $0x4cc] sm:$0xf0]  ;;  %v6554_v48 = vor.u32 %v8383_v38, %v6553_v37  ;;  %4269 = vmatpush.bf16.msrb.mxu1 %v6298_v43  ;;  %4235 = vmatmul.bf16.vlgmr.msra.gmra.mxu2 %v9158_v1 }
  0x62   : > { %v6281_v45 = vld [vmem:[%s9045_s29 + $0x5c0] sm:$0xf]  ;;  %v8315_v46 = vld [vmem:[%s9045_s29 + $0x5cc] sm:$0xf0]  ;;  %v6154_v55 = vor.u32 %v8283_v42, %v6153_v41  ;;  %4283 = vmatpush.bf16.msrb.mxu2 %v6426_v44  ;;  %4249 = vmatmul.bf16.vlgmr.msra.gmra.mxu3 %v9182_v17 }
  0x63   : > { %v6409_v47 = vld [vmem:[%s9045_s29 + $0x6c0] sm:$0xf]  ;;  %v8347_v49 = vld [vmem:[%s9045_s29 + $0x6cc] sm:$0xf0]  ;;  %v6282_v60 = vor.u32 %v8315_v46, %v6281_v45  ;;  %4297 = vmatpush.bf16.msrb.mxu3 %v6554_v48 }
  0x64   : > { %v6537_v50 = vld [vmem:[%s9045_s29 + $0x7c0] sm:$0xf]  ;;  %v8379_v51 = vld [vmem:[%s9045_s29 + $0x7cc] sm:$0xf0]  ;;  %v6410_v61 = vor.u32 %v8347_v49, %v6409_v47  ;;  %4256 = vmatpush.bf16.msrb.mxu0 %v6154_v55 }
  0x65   : > { %v5465_v52 = vld [vmem:[%s10809_s0] sm:$0xf]  ;;  %v8119_v53 = vld [vmem:[%s10809_s0 + $0x4c] sm:$0xf0]  ;;  %v6538_v2 = vor.u32 %v8379_v51, %v6537_v50  ;;  %4270 = vmatpush.bf16.msrb.mxu1 %v6282_v60 }
  0x66   : > { %v6137_v56 = vld [vmem:[%s9045_s29 + $0x4a0] sm:$0xf]  ;;  %v8279_v57 = vld [vmem:[%s9045_s29 + $0x4ac] sm:$0xf0]  ;;  %v9150_v58 = vor.u32 %v8119_v53, %v5465_v52  ;;  %4284 = vmatpush.bf16.msrb.mxu2 %v6410_v61 }
  0x67   : > { %v6265_v62 = vld [vmem:[%s9045_s29 + $0x5a0] sm:$0xf]  ;;  %v8311_v63 = vld [vmem:[%s9045_s29 + $0x5ac] sm:$0xf0]  ;;  %v6138_v9 = vor.u32 %v8279_v57, %v6137_v56  ;;  %4298 = vmatpush.bf16.msrb.mxu3 %v6538_v2 }
  0x68   : > { %10835 = vst [vmem:[#allocation9_spill] sm:$0xff] %v9150_v58  ;;  %v6393_v0 = vld [vmem:[%s9045_s29 + $0x6a0] sm:$0xf]  ;;  %v8343_v3 = vld [vmem:[%s9045_s29 + $0x6ac] sm:$0xf0]  ;;  %4207 = vmatmul.bf16.vlgmr.msra.gmra.mxu0 %v9150_v58  ;;  %v6266_v12 = vor.u32 %v8311_v63, %v6265_v62 }
  0x69   : > { %v6521_v4 = vld [vmem:[%s9045_s29 + $0x7a0] sm:$0xf]  ;;  %v8375_v5 = vld [vmem:[%s9045_s29 + $0x7ac] sm:$0xf0]  ;;  %v6394_v13 = vor.u32 %v8343_v3, %v6393_v0  ;;  %4257 = vmatpush.bf16.msrb.mxu0 %v6138_v9 }
  0x6a   : > { %v6121_v14 = vld [vmem:[%s9045_s29 + $0x480] sm:$0xf]  ;;  %v8275_v15 = vld [vmem:[%s9045_s29 + $0x48c] sm:$0xf0]  ;;  %v6522_v18 = vor.u32 %v8375_v5, %v6521_v4  ;;  %4271 = vmatpush.bf16.msrb.mxu1 %v6266_v12 }
  0x6b   : > { %v6249_v16 = vld [vmem:[%s9045_s29 + $0x580] sm:$0xf]  ;;  %v8307_v19 = vld [vmem:[%s9045_s29 + $0x58c] sm:$0xf0]  ;;  %v6122_v24 = vor.u32 %v8275_v15, %v6121_v14  ;;  %4285 = vmatpush.bf16.msrb.mxu2 %v6394_v13 }
  0x6c   : > { %v6377_v20 = vld [vmem:[%s9045_s29 + $0x680] sm:$0xf]  ;;  %v8339_v21 = vld [vmem:[%s9045_s29 + $0x68c] sm:$0xf0]  ;;  %v6250_v25 = vor.u32 %v8307_v19, %v6249_v16  ;;  %4299 = vmatpush.bf16.msrb.mxu3 %v6522_v18 }
  0x6d   : > { %v6505_v22 = vld [vmem:[%s9045_s29 + $0x780] sm:$0xf]  ;;  %v8371_v23 = vld [vmem:[%s9045_s29 + $0x78c] sm:$0xf0]  ;;  %v6378_v26 = vor.u32 %v8339_v21, %v6377_v20  ;;  %4258 = vmatpush.bf16.msrb.mxu0 %v6122_v24 }
  0x6e   : > { %v6105_v27 = vld [vmem:[%s9045_s29 + $0x460] sm:$0xf]  ;;  %v8271_v28 = vld [vmem:[%s9045_s29 + $0x46c] sm:$0xf0]  ;;  %v6506_v30 = vor.u32 %v8371_v23, %v6505_v22  ;;  %4272 = vmatpush.bf16.msrb.mxu1 %v6250_v25  ;;  %v5489_v25 = vld [vmem:[%s10809_s0 + $0x18] sm:$0xf] }
  0x6f   : > { %v6233_v29 = vld [vmem:[%s9045_s29 + $0x560] sm:$0xf]  ;;  %v8303_v31 = vld [vmem:[%s9045_s29 + $0x56c] sm:$0xf0]  ;;  %v6106_v36 = vor.u32 %v8271_v28, %v6105_v27  ;;  %4286 = vmatpush.bf16.msrb.mxu2 %v6378_v26  ;;  %v8122_v26 = vld [vmem:[%s10809_s0 + $0x64] sm:$0xf0] }
  0x70   : > { %v6361_v32 = vld [vmem:[%s9045_s29 + $0x660] sm:$0xf]  ;;  %v8335_v33 = vld [vmem:[%s9045_s29 + $0x66c] sm:$0xf0]  ;;  %v6234_v37 = vor.u32 %v8303_v31, %v6233_v29  ;;  %4300 = vmatpush.bf16.msrb.mxu3 %v6506_v30  ;;  %v8111_v27 = vld [vmem:[%s10809_s0 + $0x14] sm:$0xf] }
  0x71   : > { %v6489_v34 = vld [vmem:[%s9045_s29 + $0x760] sm:$0xf]  ;;  %v8367_v35 = vld [vmem:[%s9045_s29 + $0x76c] sm:$0xf0]  ;;  %v6362_v38 = vor.u32 %v8335_v33, %v6361_v32  ;;  %4259 = vmatpush.bf16.msrb.mxu0 %v6106_v36  ;;  %v5483_v30 = vld [vmem:[%s10809_s0 + $0x60] sm:$0xf0] }
  0x72   : > { %v6089_v39 = vld [vmem:[%s9045_s29 + $0x440] sm:$0xf]  ;;  %v8267_v40 = vld [vmem:[%s9045_s29 + $0x44c] sm:$0xf0]  ;;  %v6490_v42 = vor.u32 %v8367_v35, %v6489_v34  ;;  %4273 = vmatpush.bf16.msrb.mxu1 %v6234_v37  ;;  %v8112_v31 = vld [vmem:[%s10809_s0 + $0x1c] sm:$0xf] }
  0x73   : > { %v6217_v41 = vld [vmem:[%s9045_s29 + $0x540] sm:$0xf]  ;;  %v8299_v43 = vld [vmem:[%s9045_s29 + $0x54c] sm:$0xf0]  ;;  %v6090_v48 = vor.u32 %v8267_v40, %v6089_v39  ;;  %4287 = vmatpush.bf16.msrb.mxu2 %v6362_v38  ;;  %v5491_v32 = vld [vmem:[%s10809_s0 + $0x68] sm:$0xf0] }
  0x74   : > { %v6345_v44 = vld [vmem:[%s9045_s29 + $0x640] sm:$0xf]  ;;  %v8331_v45 = vld [vmem:[%s9045_s29 + $0x64c] sm:$0xf0]  ;;  %v6218_v50 = vor.u32 %v8299_v43, %v6217_v41  ;;  %4301 = vmatpush.bf16.msrb.mxu3 %v6490_v42  ;;  %v9263_v43 = vor.u32 %v8122_v26, %v5489_v25 }
  0x75   : > { %v6473_v46 = vld [vmem:[%s9045_s29 + $0x740] sm:$0xf]  ;;  %v8363_v47 = vld [vmem:[%s9045_s29 + $0x74c] sm:$0xf0]  ;;  %v6346_v51 = vor.u32 %v8331_v45, %v6345_v44  ;;  %4260 = vmatpush.bf16.msrb.mxu0 %v6090_v48  ;;  %v9265_v44 = vor.u32 %v8111_v27, %v5483_v30 }
  0x76   : > { %v6073_v49 = vld [vmem:[%s9045_s29 + $0x420] sm:$0xf]  ;;  %v8263_v52 = vld [vmem:[%s9045_s29 + $0x42c] sm:$0xf0]  ;;  %v6474_v55 = vor.u32 %v8363_v47, %v6473_v46  ;;  %4274 = vmatpush.bf16.msrb.mxu1 %v6218_v50  ;;  %10840 = vst [vmem:[#allocation14_spill] sm:$0xff] %v9263_v43  ;;  %v9269_v47 = vor.u32 %v8112_v31, %v5491_v32 }
  0x77   : > { %v6201_v53 = vld [vmem:[%s9045_s29 + $0x520] sm:$0xf]  ;;  %v8295_v54 = vld [vmem:[%s9045_s29 + $0x52c] sm:$0xf0]  ;;  %v6074_v63 = vor.u32 %v8263_v52, %v6073_v49  ;;  %4288 = vmatpush.bf16.msrb.mxu2 %v6346_v51  ;;  %10841 = vst [vmem:[#allocation15_spill] sm:$0xff] %v9265_v44 }
  0x78   : > { %v6329_v56 = vld [vmem:[%s9045_s29 + $0x620] sm:$0xf]  ;;  %v8327_v57 = vld [vmem:[%s9045_s29 + $0x62c] sm:$0xf0]  ;;  %v6202_v5 = vor.u32 %v8295_v54, %v6201_v53  ;;  %4302 = vmatpush.bf16.msrb.mxu3 %v6474_v55  ;;  %10842 = vst [vmem:[#allocation16_spill] sm:$0xff] %v9269_v47 }
  0x79   : > { %v6457_v59 = vld [vmem:[%s9045_s29 + $0x720] sm:$0xf]  ;;  %v8359_v60 = vld [vmem:[%s9045_s29 + $0x72c] sm:$0xf0]  ;;  %v6330_v6 = vor.u32 %v8327_v57, %v6329_v56  ;;  %4261 = vmatpush.bf16.msrb.mxu0 %v6074_v63 }
  0x7a   : > { %v6057_v61 = vld [vmem:[%s9045_s29 + $0x400] sm:$0xf]  ;;  %v8259_v62 = vld [vmem:[%s9045_s29 + $0x40c] sm:$0xf0]  ;;  %v6458_v11 = vor.u32 %v8359_v60, %v6457_v59  ;;  %4275 = vmatpush.bf16.msrb.mxu1 %v6202_v5 }
  0x7b   : > { %v6185_v0 = vld [vmem:[%s9045_s29 + $0x500] sm:$0xf]  ;;  %v8291_v2 = vld [vmem:[%s9045_s29 + $0x50c] sm:$0xf0]  ;;  %v6058_v19 = vor.u32 %v8259_v62, %v6057_v61  ;;  %4289 = vmatpush.bf16.msrb.mxu2 %v6330_v6 }
  0x7c   : > { %v6313_v3 = vld [vmem:[%s9045_s29 + $0x600] sm:$0xf]  ;;  %v8323_v4 = vld [vmem:[%s9045_s29 + $0x60c] sm:$0xf0]  ;;  %v6186_v23 = vor.u32 %v8291_v2, %v6185_v0  ;;  %4303 = vmatpush.bf16.msrb.mxu3 %v6458_v11 }
  0x7d   : > { %v6441_v7 = vld [vmem:[%s9045_s29 + $0x700] sm:$0xf]  ;;  %v8355_v8 = vld [vmem:[%s9045_s29 + $0x70c] sm:$0xf0]  ;;  %v6314_v24 = vor.u32 %v8323_v4, %v6313_v3  ;;  %4262 = vmatpush.bf16.msrb.mxu0 %v6058_v19 }
  0x7e   : > { %v6681_v9 = vld [vmem:[%s9045_s29 + $0x8e0] sm:$0xf]  ;;  %v8415_v12 = vld [vmem:[%s9045_s29 + $0x8ec] sm:$0xf0]  ;;  %v6442_v28 = vor.u32 %v8355_v8, %v6441_v7  ;;  %4276 = vmatpush.bf16.msrb.mxu1 %v6186_v23 }
  0x7f   : > { %v6809_v13 = vld [vmem:[%s9045_s29 + $0x9e0] sm:$0xf]  ;;  %v8447_v14 = vld [vmem:[%s9045_s29 + $0x9ec] sm:$0xf0]  ;;  %v6682_v29 = vor.u32 %v8415_v12, %v6681_v9  ;;  %4290 = vmatpush.bf16.msrb.mxu2 %v6314_v24 }
  0x80   : > { %v6937_v15 = vld [vmem:[%s9045_s29 + $0xae0] sm:$0xf]  ;;  %v8479_v16 = vld [vmem:[%s9045_s29 + $0xaec] sm:$0xf0]  ;;  %v6810_v33 = vor.u32 %v8447_v14, %v6809_v13  ;;  %4304 = vmatpush.bf16.msrb.mxu3 %v6442_v28 }
  0x81   : > { %v7065_v18 = vld [vmem:[%s9045_s29 + $0xbe0] sm:$0xf]  ;;  %v8511_v20 = vld [vmem:[%s9045_s29 + $0xbec] sm:$0xf0]  ;;  %v6938_v34 = vor.u32 %v8479_v16, %v6937_v15  ;;  %4311 = vmatpush.bf16.msra.mxu0 %v6682_v29  ;;  %4277 = vmatmul.bf16.vlgmr.msrb.gmra.mxu1 %v9265_v44 }
  0x82   : > { %v5481_v21 = vld [vmem:[%s10809_s0 + $0x10] sm:$0xf]  ;;  %v8121_v22 = vld [vmem:[%s10809_s0 + $0x5c] sm:$0xf0]  ;;  %v7066_v38 = vor.u32 %v8511_v20, %v7065_v18  ;;  %4325 = vmatpush.bf16.msra.mxu1 %v6810_v33  ;;  %4291 = vmatmul.bf16.vlgmr.msrb.gmra.mxu2 %v9263_v43 }
  0x83   : > { %v6665_v35 = vld [vmem:[%s9045_s29 + $0x8c0] sm:$0xf]  ;;  %v8411_v36 = vld [vmem:[%s9045_s29 + $0x8cc] sm:$0xf0]  ;;  %v9258_v39 = vor.u32 %v8121_v22, %v5481_v21  ;;  %4339 = vmatpush.bf16.msra.mxu2 %v6938_v34  ;;  %4305 = vmatmul.bf16.vlgmr.msrb.gmra.mxu3 %v9269_v47 }
  0x84   : > { %v6793_v37 = vld [vmem:[%s9045_s29 + $0x9c0] sm:$0xf]  ;;  %v8443_v40 = vld [vmem:[%s9045_s29 + $0x9cc] sm:$0xf0]  ;;  %v6666_v48 = vor.u32 %v8411_v36, %v6665_v35  ;;  %4353 = vmatpush.bf16.msra.mxu3 %v7066_v38 }
  0x85   : > { %10839 = vst [vmem:[#allocation13_spill] sm:$0xff] %v9258_v39  ;;  %v6921_v41 = vld [vmem:[%s9045_s29 + $0xac0] sm:$0xf]  ;;  %v8475_v42 = vld [vmem:[%s9045_s29 + $0xacc] sm:$0xf0]  ;;  %v6794_v49 = vor.u32 %v8443_v40, %v6793_v37  ;;  %4263 = vmatmul.bf16.vlgmr.msrb.gmra.mxu0 %v9258_v39 }
  0x86   : > { %v7049_v45 = vld [vmem:[%s9045_s29 + $0xbc0] sm:$0xf]  ;;  %v8507_v46 = vld [vmem:[%s9045_s29 + $0xbcc] sm:$0xf0]  ;;  %v6922_v50 = vor.u32 %v8475_v42, %v6921_v41  ;;  %4312 = vmatpush.bf16.msra.mxu0 %v6666_v48 }
  0x87   : > { %v6649_v51 = vld [vmem:[%s9045_s29 + $0x8a0] sm:$0xf]  ;;  %v8407_v52 = vld [vmem:[%s9045_s29 + $0x8ac] sm:$0xf0]  ;;  %v7050_v54 = vor.u32 %v8507_v46, %v7049_v45  ;;  %4326 = vmatpush.bf16.msra.mxu1 %v6794_v49 }
  0x88   : > { %v6777_v53 = vld [vmem:[%s9045_s29 + $0x9a0] sm:$0xf]  ;;  %v8439_v55 = vld [vmem:[%s9045_s29 + $0x9ac] sm:$0xf0]  ;;  %v6650_v61 = vor.u32 %v8407_v52, %v6649_v51  ;;  %4340 = vmatpush.bf16.msra.mxu2 %v6922_v50 }
  0x89   : > { %v6905_v56 = vld [vmem:[%s9045_s29 + $0xaa0] sm:$0xf]  ;;  %v8471_v57 = vld [vmem:[%s9045_s29 + $0xaac] sm:$0xf0]  ;;  %v6778_v62 = vor.u32 %v8439_v55, %v6777_v53  ;;  %4354 = vmatpush.bf16.msra.mxu3 %v7050_v54 }
  0x8a   : > { %v7033_v59 = vld [vmem:[%s9045_s29 + $0xba0] sm:$0xf]  ;;  %v8503_v60 = vld [vmem:[%s9045_s29 + $0xbac] sm:$0xf0]  ;;  %v6906_v63 = vor.u32 %v8471_v57, %v6905_v56  ;;  %4313 = vmatpush.bf16.msra.mxu0 %v6650_v61 }
  0x8b   : > { %v6633_v0 = vld [vmem:[%s9045_s29 + $0x880] sm:$0xf]  ;;  %v8403_v2 = vld [vmem:[%s9045_s29 + $0x88c] sm:$0xf0]  ;;  %v7034_v4 = vor.u32 %v8503_v60, %v7033_v59  ;;  %4327 = vmatpush.bf16.msra.mxu1 %v6778_v62 }
  0x8c   : > { %v6761_v3 = vld [vmem:[%s9045_s29 + $0x980] sm:$0xf]  ;;  %v8435_v5 = vld [vmem:[%s9045_s29 + $0x98c] sm:$0xf0]  ;;  %v6634_v11 = vor.u32 %v8403_v2, %v6633_v0  ;;  %4341 = vmatpush.bf16.msra.mxu2 %v6906_v63 }
  0x8d   : > { %v6889_v6 = vld [vmem:[%s9045_s29 + $0xa80] sm:$0xf]  ;;  %v8467_v7 = vld [vmem:[%s9045_s29 + $0xa8c] sm:$0xf0]  ;;  %v6762_v12 = vor.u32 %v8435_v5, %v6761_v3  ;;  %4355 = vmatpush.bf16.msra.mxu3 %v7034_v4 }
  0x8e   : > { %v7017_v8 = vld [vmem:[%s9045_s29 + $0xb80] sm:$0xf]  ;;  %v8499_v9 = vld [vmem:[%s9045_s29 + $0xb8c] sm:$0xf0]  ;;  %v6890_v13 = vor.u32 %v8467_v7, %v6889_v6  ;;  %4314 = vmatpush.bf16.msra.mxu0 %v6634_v11 }
  0x8f   : > { %v6617_v14 = vld [vmem:[%s9045_s29 + $0x860] sm:$0xf]  ;;  %v8399_v15 = vld [vmem:[%s9045_s29 + $0x86c] sm:$0xf0]  ;;  %v7018_v18 = vor.u32 %v8499_v9, %v7017_v8  ;;  %4328 = vmatpush.bf16.msra.mxu1 %v6762_v12 }
  0x90   : > { %v6745_v16 = vld [vmem:[%s9045_s29 + $0x960] sm:$0xf]  ;;  %v8431_v19 = vld [vmem:[%s9045_s29 + $0x96c] sm:$0xf0]  ;;  %v6618_v24 = vor.u32 %v8399_v15, %v6617_v14  ;;  %4342 = vmatpush.bf16.msra.mxu2 %v6890_v13 }
  0x91   : > { %v6873_v20 = vld [vmem:[%s9045_s29 + $0xa60] sm:$0xf]  ;;  %v8463_v21 = vld [vmem:[%s9045_s29 + $0xa6c] sm:$0xf0]  ;;  %v6746_v25 = vor.u32 %v8431_v19, %v6745_v16  ;;  %4356 = vmatpush.bf16.msra.mxu3 %v7018_v18  ;;  %v5505_v16 = vld [vmem:[%s10809_s0 + $0x28] sm:$0xf] }
  0x92   : > { %v7001_v22 = vld [vmem:[%s9045_s29 + $0xb60] sm:$0xf]  ;;  %v8495_v23 = vld [vmem:[%s9045_s29 + $0xb6c] sm:$0xf0]  ;;  %v6874_v26 = vor.u32 %v8463_v21, %v6873_v20  ;;  %4315 = vmatpush.bf16.msra.mxu0 %v6618_v24  ;;  %v8124_v18 = vld [vmem:[%s10809_s0 + $0x74] sm:$0xf0] }
  0x93   : > { %v6601_v27 = vld [vmem:[%s9045_s29 + $0x840] sm:$0xf]  ;;  %v8395_v28 = vld [vmem:[%s9045_s29 + $0x84c] sm:$0xf0]  ;;  %v7002_v30 = vor.u32 %v8495_v23, %v7001_v22  ;;  %4329 = vmatpush.bf16.msra.mxu1 %v6746_v25  ;;  %v8113_v19 = vld [vmem:[%s10809_s0 + $0x24] sm:$0xf] }
  0x94   : > { %v6729_v29 = vld [vmem:[%s9045_s29 + $0x940] sm:$0xf]  ;;  %v8427_v31 = vld [vmem:[%s9045_s29 + $0x94c] sm:$0xf0]  ;;  %v6602_v36 = vor.u32 %v8395_v28, %v6601_v27  ;;  %4343 = vmatpush.bf16.msra.mxu2 %v6874_v26  ;;  %v5499_v22 = vld [vmem:[%s10809_s0 + $0x70] sm:$0xf0] }
  0x95   : > { %v6857_v32 = vld [vmem:[%s9045_s29 + $0xa40] sm:$0xf]  ;;  %v8459_v33 = vld [vmem:[%s9045_s29 + $0xa4c] sm:$0xf0]  ;;  %v6730_v38 = vor.u32 %v8427_v31, %v6729_v29  ;;  %4357 = vmatpush.bf16.msra.mxu3 %v7002_v30  ;;  %v8114_v23 = vld [vmem:[%s10809_s0 + $0x2c] sm:$0xf] }
  0x96   : > { %v6985_v34 = vld [vmem:[%s9045_s29 + $0xb40] sm:$0xf]  ;;  %v8491_v35 = vld [vmem:[%s9045_s29 + $0xb4c] sm:$0xf0]  ;;  %v6858_v40 = vor.u32 %v8459_v33, %v6857_v32  ;;  %4316 = vmatpush.bf16.msra.mxu0 %v6602_v36  ;;  %v5507_v24 = vld [vmem:[%s10809_s0 + $0x78] sm:$0xf0]  ;;  %v9365_v36 = vor.u32 %v8113_v19, %v5499_v22 }
  0x97   : > { %v6585_v37 = vld [vmem:[%s9045_s29 + $0x820] sm:$0xf]  ;;  %v8391_v41 = vld [vmem:[%s9045_s29 + $0x82c] sm:$0xf0]  ;;  %v6986_v46 = vor.u32 %v8491_v35, %v6985_v34  ;;  %4330 = vmatpush.bf16.msra.mxu1 %v6730_v38  ;;  %v9363_v35 = vor.u32 %v8124_v18, %v5505_v16 }
  0x98   : > { %v6713_v42 = vld [vmem:[%s9045_s29 + $0x920] sm:$0xf]  ;;  %v8423_v45 = vld [vmem:[%s9045_s29 + $0x92c] sm:$0xf0]  ;;  %v6586_v54 = vor.u32 %v8391_v41, %v6585_v37  ;;  %4344 = vmatpush.bf16.msra.mxu2 %v6858_v40  ;;  %v9369_v40 = vor.u32 %v8114_v23, %v5507_v24 }
  0x99   : > { %v6841_v48 = vld [vmem:[%s9045_s29 + $0xa20] sm:$0xf]  ;;  %v8455_v49 = vld [vmem:[%s9045_s29 + $0xa2c] sm:$0xf0]  ;;  %v6714_v60 = vor.u32 %v8423_v45, %v6713_v42  ;;  %4358 = vmatpush.bf16.msra.mxu3 %v6986_v46 }
  0x9a   : > { %v6969_v50 = vld [vmem:[%s9045_s29 + $0xb20] sm:$0xf]  ;;  %v8487_v51 = vld [vmem:[%s9045_s29 + $0xb2c] sm:$0xf0]  ;;  %v6842_v61 = vor.u32 %v8455_v49, %v6841_v48  ;;  %4317 = vmatpush.bf16.msra.mxu0 %v6586_v54 }
  0x9b   : > { %v6569_v52 = vld [vmem:[%s9045_s29 + $0x800] sm:$0xf]  ;;  %v8387_v53 = vld [vmem:[%s9045_s29 + $0x80c] sm:$0xf0]  ;;  %v6970_v2 = vor.u32 %v8487_v51, %v6969_v50  ;;  %4331 = vmatpush.bf16.msra.mxu1 %v6714_v60 }
  0x9c   : > { %v6697_v55 = vld [vmem:[%s9045_s29 + $0x900] sm:$0xf]  ;;  %v8419_v56 = vld [vmem:[%s9045_s29 + $0x90c] sm:$0xf0]  ;;  %v6570_v9 = vor.u32 %v8387_v53, %v6569_v52  ;;  %4345 = vmatpush.bf16.msra.mxu2 %v6842_v61 }
  0x9d   : > { %v6825_v57 = vld [vmem:[%s9045_s29 + $0xa00] sm:$0xf]  ;;  %v8451_v59 = vld [vmem:[%s9045_s29 + $0xa0c] sm:$0xf0]  ;;  %v6698_v14 = vor.u32 %v8419_v56, %v6697_v55  ;;  %4359 = vmatpush.bf16.msra.mxu3 %v6970_v2 }
  0x9e   : > { %v6953_v62 = vld [vmem:[%s9045_s29 + $0xb00] sm:$0xf]  ;;  %v8483_v63 = vld [vmem:[%s9045_s29 + $0xb0c] sm:$0xf0]  ;;  %v6826_v15 = vor.u32 %v8451_v59, %v6825_v57  ;;  %4318 = vmatpush.bf16.msra.mxu0 %v6570_v9 }
  0x9f   : > { %v7193_v0 = vld [vmem:[%s9045_s29 + $0xce0] sm:$0xf]  ;;  %v8543_v3 = vld [vmem:[%s9045_s29 + $0xcec] sm:$0xf0]  ;;  %v6954_v20 = vor.u32 %v8483_v63, %v6953_v62  ;;  %4332 = vmatpush.bf16.msra.mxu1 %v6698_v14 }
  0xa0   : > { %v7321_v4 = vld [vmem:[%s9045_s29 + $0xde0] sm:$0xf]  ;;  %v8575_v5 = vld [vmem:[%s9045_s29 + $0xdec] sm:$0xf0]  ;;  %v7194_v21 = vor.u32 %v8543_v3, %v7193_v0  ;;  %4346 = vmatpush.bf16.msra.mxu2 %v6826_v15 }
  0xa1   : > { %v7449_v6 = vld [vmem:[%s9045_s29 + $0xee0] sm:$0xf]  ;;  %v8607_v7 = vld [vmem:[%s9045_s29 + $0xeec] sm:$0xf0]  ;;  %v7322_v25 = vor.u32 %v8575_v5, %v7321_v4  ;;  %4360 = vmatpush.bf16.msra.mxu3 %v6954_v20 }
  0xa2   : > { %v7577_v8 = vld [vmem:[%s9045_s29 + $0xfe0] sm:$0xf]  ;;  %v8639_v11 = vld [vmem:[%s9045_s29 + $0xfec] sm:$0xf0]  ;;  %v7450_v26 = vor.u32 %v8607_v7, %v7449_v6  ;;  %4367 = vmatpush.bf16.msrb.mxu0 %v7194_v21  ;;  %4333 = vmatmul.bf16.vlgmr.msra.gmra.mxu1 %v9365_v36 }
  0xa3   : > { %v5497_v12 = vld [vmem:[%s10809_s0 + $0x20] sm:$0xf]  ;;  %v8123_v13 = vld [vmem:[%s10809_s0 + $0x6c] sm:$0xf0]  ;;  %v7578_v30 = vor.u32 %v8639_v11, %v7577_v8  ;;  %4381 = vmatpush.bf16.msrb.mxu1 %v7322_v25  ;;  %4347 = vmatmul.bf16.vlgmr.msra.gmra.mxu2 %v9363_v35 }
  0xa4   : > { %v7177_v27 = vld [vmem:[%s9045_s29 + $0xcc0] sm:$0xf]  ;;  %v8539_v28 = vld [vmem:[%s9045_s29 + $0xccc] sm:$0xf0]  ;;  %v9358_v31 = vor.u32 %v8123_v13, %v5497_v12  ;;  %4395 = vmatpush.bf16.msrb.mxu2 %v7450_v26  ;;  %4361 = vmatmul.bf16.vlgmr.msra.gmra.mxu3 %v9369_v40 }
  0xa5   : > { %v7305_v29 = vld [vmem:[%s9045_s29 + $0xdc0] sm:$0xf]  ;;  %v8571_v32 = vld [vmem:[%s9045_s29 + $0xdcc] sm:$0xf0]  ;;  %v7178_v41 = vor.u32 %v8539_v28, %v7177_v27  ;;  %4409 = vmatpush.bf16.msrb.mxu3 %v7578_v30 }
  0xa6   : > { %v7433_v33 = vld [vmem:[%s9045_s29 + $0xec0] sm:$0xf]  ;;  %v8603_v34 = vld [vmem:[%s9045_s29 + $0xecc] sm:$0xf0]  ;;  %v7306_v42 = vor.u32 %v8571_v32, %v7305_v29  ;;  %4319 = vmatmul.bf16.vlgmr.msra.gmra.mxu0 %v9358_v31 }
  0xa7   : > { %v7561_v37 = vld [vmem:[%s9045_s29 + $0xfc0] sm:$0xf]  ;;  %v8635_v38 = vld [vmem:[%s9045_s29 + $0xfcc] sm:$0xf0]  ;;  %v7434_v45 = vor.u32 %v8603_v34, %v7433_v33  ;;  %4368 = vmatpush.bf16.msrb.mxu0 %v7178_v41 }
  0xa8   : > { %v7161_v46 = vld [vmem:[%s9045_s29 + $0xca0] sm:$0xf]  ;;  %v8535_v48 = vld [vmem:[%s9045_s29 + $0xcac] sm:$0xf0]  ;;  %v7562_v50 = vor.u32 %v8635_v38, %v7561_v37  ;;  %4382 = vmatpush.bf16.msrb.mxu1 %v7306_v42 }
  0xa9   : > { %v7289_v49 = vld [vmem:[%s9045_s29 + $0xda0] sm:$0xf]  ;;  %v8567_v51 = vld [vmem:[%s9045_s29 + $0xdac] sm:$0xf0]  ;;  %v7162_v56 = vor.u32 %v8535_v48, %v7161_v46  ;;  %4396 = vmatpush.bf16.msrb.mxu2 %v7434_v45 }
  0xaa   : > { %v7417_v52 = vld [vmem:[%s9045_s29 + $0xea0] sm:$0xf]  ;;  %v8599_v53 = vld [vmem:[%s9045_s29 + $0xeac] sm:$0xf0]  ;;  %v7290_v57 = vor.u32 %v8567_v51, %v7289_v49  ;;  %4410 = vmatpush.bf16.msrb.mxu3 %v7562_v50 }
  0xab   : > { %v7545_v54 = vld [vmem:[%s9045_s29 + $0xfa0] sm:$0xf]  ;;  %v8631_v55 = vld [vmem:[%s9045_s29 + $0xfac] sm:$0xf0]  ;;  %v7418_v59 = vor.u32 %v8599_v53, %v7417_v52  ;;  %4369 = vmatpush.bf16.msrb.mxu0 %v7162_v56 }
  0xac   : > { %v7145_v60 = vld [vmem:[%s9045_s29 + $0xc80] sm:$0xf]  ;;  %v8531_v61 = vld [vmem:[%s9045_s29 + $0xc8c] sm:$0xf0]  ;;  %v7546_v63 = vor.u32 %v8631_v55, %v7545_v54  ;;  %4383 = vmatpush.bf16.msrb.mxu1 %v7290_v57 }
  0xad   : > { %v7273_v62 = vld [vmem:[%s9045_s29 + $0xd80] sm:$0xf]  ;;  %v8563_v0 = vld [vmem:[%s9045_s29 + $0xd8c] sm:$0xf0]  ;;  %v7146_v6 = vor.u32 %v8531_v61, %v7145_v60  ;;  %4397 = vmatpush.bf16.msrb.mxu2 %v7418_v59 }
  0xae   : > { %v7401_v2 = vld [vmem:[%s9045_s29 + $0xe80] sm:$0xf]  ;;  %v8595_v3 = vld [vmem:[%s9045_s29 + $0xe8c] sm:$0xf0]  ;;  %v7274_v7 = vor.u32 %v8563_v0, %v7273_v62  ;;  %4411 = vmatpush.bf16.msrb.mxu3 %v7546_v63 }
  0xaf   : > { %v7529_v4 = vld [vmem:[%s9045_s29 + $0xf80] sm:$0xf]  ;;  %v8627_v5 = vld [vmem:[%s9045_s29 + $0xf8c] sm:$0xf0]  ;;  %v7402_v8 = vor.u32 %v8595_v3, %v7401_v2  ;;  %4370 = vmatpush.bf16.msrb.mxu0 %v7146_v6 }
  0xb0   : > { %v7129_v9 = vld [vmem:[%s9045_s29 + $0xc60] sm:$0xf]  ;;  %v8527_v11 = vld [vmem:[%s9045_s29 + $0xc6c] sm:$0xf0]  ;;  %v7530_v13 = vor.u32 %v8627_v5, %v7529_v4  ;;  %4384 = vmatpush.bf16.msrb.mxu1 %v7274_v7 }
  0xb1   : > { %v7257_v12 = vld [vmem:[%s9045_s29 + $0xd60] sm:$0xf]  ;;  %v8559_v14 = vld [vmem:[%s9045_s29 + $0xd6c] sm:$0xf0]  ;;  %v7130_v20 = vor.u32 %v8527_v11, %v7129_v9  ;;  %4398 = vmatpush.bf16.msrb.mxu2 %v7402_v8 }
  0xb2   : > { %v7385_v15 = vld [vmem:[%s9045_s29 + $0xe60] sm:$0xf]  ;;  %v8591_v16 = vld [vmem:[%s9045_s29 + $0xe6c] sm:$0xf0]  ;;  %v7258_v21 = vor.u32 %v8559_v14, %v7257_v12  ;;  %4412 = vmatpush.bf16.msrb.mxu3 %v7530_v13 }
  0xb3   : > { %v7513_v18 = vld [vmem:[%s9045_s29 + $0xf60] sm:$0xf]  ;;  %v8623_v19 = vld [vmem:[%s9045_s29 + $0xf6c] sm:$0xf0]  ;;  %v7386_v22 = vor.u32 %v8591_v16, %v7385_v15  ;;  %4371 = vmatpush.bf16.msrb.mxu0 %v7130_v20  ;;  %v5521_v16 = vld [vmem:[%s10809_s0 + $0x38] sm:$0xf] }
  0xb4   : > { %v7113_v23 = vld [vmem:[%s9045_s29 + $0xc40] sm:$0xf]  ;;  %v8523_v24 = vld [vmem:[%s9045_s29 + $0xc4c] sm:$0xf0]  ;;  %v7514_v26 = vor.u32 %v8623_v19, %v7513_v18  ;;  %4385 = vmatpush.bf16.msrb.mxu1 %v7258_v21  ;;  %v8126_v18 = vld [vmem:[%s10809_s0 + $0x84] sm:$0xf0] }
  0xb5   : > { %v7241_v25 = vld [vmem:[%s9045_s29 + $0xd40] sm:$0xf]  ;;  %v8555_v27 = vld [vmem:[%s9045_s29 + $0xd4c] sm:$0xf0]  ;;  %v7114_v33 = vor.u32 %v8523_v24, %v7113_v23  ;;  %4399 = vmatpush.bf16.msrb.mxu2 %v7386_v22  ;;  %v8115_v19 = vld [vmem:[%s10809_s0 + $0x34] sm:$0xf] }
  0xb6   : > { %v7369_v28 = vld [vmem:[%s9045_s29 + $0xe40] sm:$0xf]  ;;  %v8587_v29 = vld [vmem:[%s9045_s29 + $0xe4c] sm:$0xf0]  ;;  %v7242_v37 = vor.u32 %v8555_v27, %v7241_v25  ;;  %4413 = vmatpush.bf16.msrb.mxu3 %v7514_v26  ;;  %v5515_v22 = vld [vmem:[%s10809_s0 + $0x80] sm:$0xf0] }
  0xb7   : > { %v7497_v30 = vld [vmem:[%s9045_s29 + $0xf40] sm:$0xf]  ;;  %v8619_v32 = vld [vmem:[%s9045_s29 + $0xf4c] sm:$0xf0]  ;;  %v7370_v38 = vor.u32 %v8587_v29, %v7369_v28  ;;  %4372 = vmatpush.bf16.msrb.mxu0 %v7114_v33  ;;  %v8116_v23 = vld [vmem:[%s10809_s0 + $0x3c] sm:$0xf] }
  0xb8   : > { %v7097_v34 = vld [vmem:[%s9045_s29 + $0xc20] sm:$0xf]  ;;  %v8519_v41 = vld [vmem:[%s9045_s29 + $0xc2c] sm:$0xf0]  ;;  %v7498_v46 = vor.u32 %v8619_v32, %v7497_v30  ;;  %4386 = vmatpush.bf16.msrb.mxu1 %v7242_v37  ;;  %v5523_v24 = vld [vmem:[%s10809_s0 + $0x88] sm:$0xf0] }
  0xb9   : > { %v7225_v42 = vld [vmem:[%s9045_s29 + $0xd20] sm:$0xf]  ;;  %v8551_v45 = vld [vmem:[%s9045_s29 + $0xd2c] sm:$0xf0]  ;;  %v7098_v54 = vor.u32 %v8519_v41, %v7097_v34  ;;  %4400 = vmatpush.bf16.msrb.mxu2 %v7370_v38  ;;  %v9463_v38 = vor.u32 %v8126_v18, %v5521_v16  ;;  %v9465_v41 = vor.u32 %v8115_v19, %v5515_v22 }
  0xba   : > { %v7353_v48 = vld [vmem:[%s9045_s29 + $0xe20] sm:$0xf]  ;;  %v8583_v49 = vld [vmem:[%s9045_s29 + $0xe2c] sm:$0xf0]  ;;  %v7226_v60 = vor.u32 %v8551_v45, %v7225_v42  ;;  %4414 = vmatpush.bf16.msrb.mxu3 %v7498_v46  ;;  %v9469_v46 = vor.u32 %v8116_v23, %v5523_v24 }
  0xbb   : > { %v7481_v50 = vld [vmem:[%s9045_s29 + $0xf20] sm:$0xf]  ;;  %v8615_v51 = vld [vmem:[%s9045_s29 + $0xf2c] sm:$0xf0]  ;;  %v7354_v61 = vor.u32 %v8583_v49, %v7353_v48  ;;  %4373 = vmatpush.bf16.msrb.mxu0 %v7098_v54 }
  0xbc   : > { %v7081_v52 = vld [vmem:[%s9045_s29 + $0xc00] sm:$0xf]  ;;  %v8515_v53 = vld [vmem:[%s9045_s29 + $0xc0c] sm:$0xf0]  ;;  %v7482_v2 = vor.u32 %v8615_v51, %v7481_v50  ;;  %4387 = vmatpush.bf16.msrb.mxu1 %v7226_v60 }
  0xbd   : > { %v7209_v55 = vld [vmem:[%s9045_s29 + $0xd00] sm:$0xf]  ;;  %v8547_v56 = vld [vmem:[%s9045_s29 + $0xd0c] sm:$0xf0]  ;;  %v7082_v9 = vor.u32 %v8515_v53, %v7081_v52  ;;  %4401 = vmatpush.bf16.msrb.mxu2 %v7354_v61 }
  0xbe   : > { %v7337_v57 = vld [vmem:[%s9045_s29 + $0xe00] sm:$0xf]  ;;  %v8579_v59 = vld [vmem:[%s9045_s29 + $0xe0c] sm:$0xf0]  ;;  %v7210_v14 = vor.u32 %v8547_v56, %v7209_v55  ;;  %4415 = vmatpush.bf16.msrb.mxu3 %v7482_v2 }
  0xbf   : > { %v7465_v62 = vld [vmem:[%s9045_s29 + $0xf00] sm:$0xf]  ;;  %v8611_v63 = vld [vmem:[%s9045_s29 + $0xf0c] sm:$0xf0]  ;;  %v7338_v15 = vor.u32 %v8579_v59, %v7337_v57  ;;  %4374 = vmatpush.bf16.msrb.mxu0 %v7082_v9 }
  0xc0   : > { %v7705_v0 = vld [vmem:[%s9045_s29 + $0x10e0] sm:$0xf]  ;;  %v8671_v3 = vld [vmem:[%s9045_s29 + $0x10ec] sm:$0xf0]  ;;  %v7466_v20 = vor.u32 %v8611_v63, %v7465_v62  ;;  %4388 = vmatpush.bf16.msrb.mxu1 %v7210_v14 }
  0xc1   : > { %v7833_v4 = vld [vmem:[%s9045_s29 + $0x11e0] sm:$0xf]  ;;  %v8703_v5 = vld [vmem:[%s9045_s29 + $0x11ec] sm:$0xf0]  ;;  %v7706_v21 = vor.u32 %v8671_v3, %v7705_v0  ;;  %4402 = vmatpush.bf16.msrb.mxu2 %v7338_v15 }
  0xc2   : > { %v7961_v6 = vld [vmem:[%s9045_s29 + $0x12e0] sm:$0xf]  ;;  %v8735_v7 = vld [vmem:[%s9045_s29 + $0x12ec] sm:$0xf0]  ;;  %v7834_v25 = vor.u32 %v8703_v5, %v7833_v4  ;;  %4416 = vmatpush.bf16.msrb.mxu3 %v7466_v20 }
  0xc3   : > { %v8089_v8 = vld [vmem:[%s9045_s29 + $0x13e0] sm:$0xf]  ;;  %v8767_v11 = vld [vmem:[%s9045_s29 + $0x13ec] sm:$0xf0]  ;;  %v7962_v26 = vor.u32 %v8735_v7, %v7961_v6  ;;  %4423 = vmatpush.bf16.msra.mxu0 %v7706_v21  ;;  %4389 = vmatmul.bf16.vlgmr.msrb.gmra.mxu1 %v9465_v41 }
  0xc4   : > { %v5513_v12 = vld [vmem:[%s10809_s0 + $0x30] sm:$0xf]  ;;  %v8125_v13 = vld [vmem:[%s10809_s0 + $0x7c] sm:$0xf0]  ;;  %v8090_v30 = vor.u32 %v8767_v11, %v8089_v8  ;;  %4437 = vmatpush.bf16.msra.mxu1 %v7834_v25  ;;  %4403 = vmatmul.bf16.vlgmr.msrb.gmra.mxu2 %v9463_v38 }
  0xc5   : > { %v7689_v27 = vld [vmem:[%s9045_s29 + $0x10c0] sm:$0xf]  ;;  %v8667_v28 = vld [vmem:[%s9045_s29 + $0x10cc] sm:$0xf0]  ;;  %v9458_v32 = vor.u32 %v8125_v13, %v5513_v12  ;;  %4451 = vmatpush.bf16.msra.mxu2 %v7962_v26  ;;  %4417 = vmatmul.bf16.vlgmr.msrb.gmra.mxu3 %v9469_v46 }
  0xc6   : > { %v7817_v29 = vld [vmem:[%s9045_s29 + $0x11c0] sm:$0xf]  ;;  %v8699_v33 = vld [vmem:[%s9045_s29 + $0x11cc] sm:$0xf0]  ;;  %v7690_v48 = vor.u32 %v8667_v28, %v7689_v27  ;;  %4465 = vmatpush.bf16.msra.mxu3 %v8090_v30 }
  0xc7   : > { %v7945_v34 = vld [vmem:[%s9045_s29 + $0x12c0] sm:$0xf]  ;;  %v8731_v37 = vld [vmem:[%s9045_s29 + $0x12cc] sm:$0xf0]  ;;  %v7818_v49 = vor.u32 %v8699_v33, %v7817_v29  ;;  %4375 = vmatmul.bf16.vlgmr.msrb.gmra.mxu0 %v9458_v32 }
  0xc8   : > { %v8073_v42 = vld [vmem:[%s9045_s29 + $0x13c0] sm:$0xf]  ;;  %v8763_v45 = vld [vmem:[%s9045_s29 + $0x13cc] sm:$0xf0]  ;;  %v7946_v50 = vor.u32 %v8731_v37, %v7945_v34  ;;  %4424 = vmatpush.bf16.msra.mxu0 %v7690_v48 }
  0xc9   : > { %v7673_v51 = vld [vmem:[%s9045_s29 + $0x10a0] sm:$0xf]  ;;  %v8663_v52 = vld [vmem:[%s9045_s29 + $0x10ac] sm:$0xf0]  ;;  %v8074_v54 = vor.u32 %v8763_v45, %v8073_v42  ;;  %4438 = vmatpush.bf16.msra.mxu1 %v7818_v49 }
  0xca   : > { %v7801_v53 = vld [vmem:[%s9045_s29 + $0x11a0] sm:$0xf]  ;;  %v8695_v55 = vld [vmem:[%s9045_s29 + $0x11ac] sm:$0xf0]  ;;  %v7674_v61 = vor.u32 %v8663_v52, %v7673_v51  ;;  %4452 = vmatpush.bf16.msra.mxu2 %v7946_v50 }
  0xcb   : > { %v7929_v56 = vld [vmem:[%s9045_s29 + $0x12a0] sm:$0xf]  ;;  %v8727_v57 = vld [vmem:[%s9045_s29 + $0x12ac] sm:$0xf0]  ;;  %v7802_v62 = vor.u32 %v8695_v55, %v7801_v53  ;;  %4466 = vmatpush.bf16.msra.mxu3 %v8074_v54 }
  0xcc   : > { %v8057_v59 = vld [vmem:[%s9045_s29 + $0x13a0] sm:$0xf]  ;;  %v8759_v60 = vld [vmem:[%s9045_s29 + $0x13ac] sm:$0xf0]  ;;  %v7930_v63 = vor.u32 %v8727_v57, %v7929_v56  ;;  %4425 = vmatpush.bf16.msra.mxu0 %v7674_v61 }
  0xcd   : > { %v7657_v0 = vld [vmem:[%s9045_s29 + $0x1080] sm:$0xf]  ;;  %v8659_v2 = vld [vmem:[%s9045_s29 + $0x108c] sm:$0xf0]  ;;  %v8058_v4 = vor.u32 %v8759_v60, %v8057_v59  ;;  %4439 = vmatpush.bf16.msra.mxu1 %v7802_v62 }
  0xce   : > { %v7785_v3 = vld [vmem:[%s9045_s29 + $0x1180] sm:$0xf]  ;;  %v8691_v5 = vld [vmem:[%s9045_s29 + $0x118c] sm:$0xf0]  ;;  %v7658_v11 = vor.u32 %v8659_v2, %v7657_v0  ;;  %4453 = vmatpush.bf16.msra.mxu2 %v7930_v63 }
  0xcf   : > { %v7913_v6 = vld [vmem:[%s9045_s29 + $0x1280] sm:$0xf]  ;;  %v8723_v7 = vld [vmem:[%s9045_s29 + $0x128c] sm:$0xf0]  ;;  %v7786_v12 = vor.u32 %v8691_v5, %v7785_v3  ;;  %4467 = vmatpush.bf16.msra.mxu3 %v8058_v4 }
  0xd0   : > { %v8041_v8 = vld [vmem:[%s9045_s29 + $0x1380] sm:$0xf]  ;;  %v8755_v9 = vld [vmem:[%s9045_s29 + $0x138c] sm:$0xf0]  ;;  %v7914_v13 = vor.u32 %v8723_v7, %v7913_v6  ;;  %4426 = vmatpush.bf16.msra.mxu0 %v7658_v11 }
  0xd1   : > { %v7641_v14 = vld [vmem:[%s9045_s29 + $0x1060] sm:$0xf]  ;;  %v8655_v15 = vld [vmem:[%s9045_s29 + $0x106c] sm:$0xf0]  ;;  %v8042_v18 = vor.u32 %v8755_v9, %v8041_v8  ;;  %4440 = vmatpush.bf16.msra.mxu1 %v7786_v12  ;;  %v8157_v9 = vld [vmem:[%s9045_s29 + $0xe4] sm:$0xf] }
  0xd2   : > { %v7769_v16 = vld [vmem:[%s9045_s29 + $0x1160] sm:$0xf]  ;;  %v8687_v19 = vld [vmem:[%s9045_s29 + $0x116c] sm:$0xf0]  ;;  %v7642_v24 = vor.u32 %v8655_v15, %v7641_v14  ;;  %4454 = vmatpush.bf16.msra.mxu2 %v7914_v13  ;;  %v5659_v12 = vld [vmem:[%s9045_s29 + $0xf0] sm:$0xf0] }
  0xd3   : > { %v7897_v20 = vld [vmem:[%s9045_s29 + $0x1260] sm:$0xf]  ;;  %v8719_v21 = vld [vmem:[%s9045_s29 + $0x126c] sm:$0xf0]  ;;  %v7770_v25 = vor.u32 %v8687_v19, %v7769_v16  ;;  %4468 = vmatpush.bf16.msra.mxu3 %v8042_v18  ;;  %v8189_v13 = vld [vmem:[%s9045_s29 + $0x1e4] sm:$0xf] }
  0xd4   : > { %v8025_v22 = vld [vmem:[%s9045_s29 + $0x1360] sm:$0xf]  ;;  %v8751_v23 = vld [vmem:[%s9045_s29 + $0x136c] sm:$0xf0]  ;;  %v7898_v26 = vor.u32 %v8719_v21, %v7897_v20  ;;  %4427 = vmatpush.bf16.msra.mxu0 %v7642_v24  ;;  %v5787_v14 = vld [vmem:[%s9045_s29 + $0x1f0] sm:$0xf0] }
  0xd5   : > { %v7625_v27 = vld [vmem:[%s9045_s29 + $0x1040] sm:$0xf]  ;;  %v8651_v28 = vld [vmem:[%s9045_s29 + $0x104c] sm:$0xf0]  ;;  %v8026_v30 = vor.u32 %v8751_v23, %v8025_v22  ;;  %4441 = vmatpush.bf16.msra.mxu1 %v7770_v25  ;;  %v8221_v15 = vld [vmem:[%s9045_s29 + $0x2e4] sm:$0xf] }
  0xd6   : > { %v7753_v29 = vld [vmem:[%s9045_s29 + $0x1140] sm:$0xf]  ;;  %v8683_v33 = vld [vmem:[%s9045_s29 + $0x114c] sm:$0xf0]  ;;  %v7626_v48 = vor.u32 %v8651_v28, %v7625_v27  ;;  %4455 = vmatpush.bf16.msra.mxu2 %v7898_v26  ;;  %v5915_v16 = vld [vmem:[%s9045_s29 + $0x2f0] sm:$0xf0] }
  0xd7   : > { %v7881_v34 = vld [vmem:[%s9045_s29 + $0x1240] sm:$0xf]  ;;  %v8715_v37 = vld [vmem:[%s9045_s29 + $0x124c] sm:$0xf0]  ;;  %v7754_v50 = vor.u32 %v8683_v33, %v7753_v29  ;;  %4469 = vmatpush.bf16.msra.mxu3 %v8026_v30  ;;  %v8253_v18 = vld [vmem:[%s9045_s29 + $0x3e4] sm:$0xf]  ;;  %v5662_v29 = vor.u32 %v8157_v9, %v5659_v12 }
  0xd8   : > { %v8009_v42 = vld [vmem:[%s9045_s29 + $0x1340] sm:$0xf]  ;;  %v8747_v45 = vld [vmem:[%s9045_s29 + $0x134c] sm:$0xf0]  ;;  %v7882_v51 = vor.u32 %v8715_v37, %v7881_v34  ;;  %4428 = vmatpush.bf16.msra.mxu0 %v7626_v48  ;;  %v6043_v20 = vld [vmem:[%s9045_s29 + $0x3f0] sm:$0xf0]  ;;  %v5790_v37 = vor.u32 %v8189_v13, %v5787_v14 }
  0xd9   : > { %v7609_v49 = vld [vmem:[%s9045_s29 + $0x1020] sm:$0xf]  ;;  %v8647_v52 = vld [vmem:[%s9045_s29 + $0x102c] sm:$0xf0]  ;;  %v8010_v55 = vor.u32 %v8747_v45, %v8009_v42  ;;  %4442 = vmatpush.bf16.msra.mxu1 %v7754_v50  ;;  %v5537_v25 = vld [vmem:[%s10809_s0 + $0x48] sm:$0xf]  ;;  %v5918_v42 = vor.u32 %v8221_v15, %v5915_v16  ;;  %v6046_v50 = vor.u32 %v8253_v18, %v6043_v20 }
  0xda   : > { %v7737_v53 = vld [vmem:[%s9045_s29 + $0x1120] sm:$0xf]  ;;  %v8679_v54 = vld [vmem:[%s9045_s29 + $0x112c] sm:$0xf0]  ;;  %v7610_v63 = vor.u32 %v8647_v52, %v7609_v49  ;;  %4456 = vmatpush.bf16.msra.mxu2 %v7882_v51  ;;  %v8128_v26 = vld [vmem:[%s10809_s0 + $0x94] sm:$0xf0] }
  0xdb   : > { %v7865_v56 = vld [vmem:[%s9045_s29 + $0x1220] sm:$0xf]  ;;  %v8711_v57 = vld [vmem:[%s9045_s29 + $0x122c] sm:$0xf0]  ;;  %v7738_v5 = vor.u32 %v8679_v54, %v7737_v53  ;;  %4470 = vmatpush.bf16.msra.mxu3 %v8010_v55  ;;  %v8117_v27 = vld [vmem:[%s10809_s0 + $0x44] sm:$0xf]  ;;  %v9563_v55 = vor.u32 %v8128_v26, %v5537_v25 }
  0xdc   : > { %v7993_v59 = vld [vmem:[%s9045_s29 + $0x1320] sm:$0xf]  ;;  %v8743_v60 = vld [vmem:[%s9045_s29 + $0x132c] sm:$0xf0]  ;;  %v7866_v6 = vor.u32 %v8711_v57, %v7865_v56  ;;  %4429 = vmatpush.bf16.msra.mxu0 %v7610_v63  ;;  %v5531_v30 = vld [vmem:[%s10809_s0 + $0x90] sm:$0xf0] }
  0xdd   : > { %v7593_v61 = vld [vmem:[%s9045_s29 + $0x1000] sm:$0xf]  ;;  %v8643_v62 = vld [vmem:[%s9045_s29 + $0x100c] sm:$0xf0]  ;;  %v7994_v11 = vor.u32 %v8743_v60, %v7993_v59  ;;  %4443 = vmatpush.bf16.msra.mxu1 %v7738_v5  ;;  %v8118_v33 = vld [vmem:[%s10809_s0 + $0x4c] sm:$0xf]  ;;  %v9565_v56 = vor.u32 %v8117_v27, %v5531_v30 }
  0xde   : > { %v7721_v0 = vld [vmem:[%s9045_s29 + $0x1100] sm:$0xf]  ;;  %v8675_v2 = vld [vmem:[%s9045_s29 + $0x110c] sm:$0xf0]  ;;  %v7594_v19 = vor.u32 %v8643_v62, %v7593_v61  ;;  %4457 = vmatpush.bf16.msra.mxu2 %v7866_v6  ;;  %v5539_v34 = vld [vmem:[%s10809_s0 + $0x98] sm:$0xf0] }
  0xdf   : > { %v7849_v3 = vld [vmem:[%s9045_s29 + $0x1200] sm:$0xf]  ;;  %v8707_v4 = vld [vmem:[%s9045_s29 + $0x120c] sm:$0xf0]  ;;  %v7722_v23 = vor.u32 %v8675_v2, %v7721_v0  ;;  %4471 = vmatpush.bf16.msra.mxu3 %v7994_v11  ;;  %v8153_v45 = vld [vmem:[%s9045_s29 + $0xc4] sm:$0xf]  ;;  %v9569_v60 = vor.u32 %v8118_v33, %v5539_v34 }
  0xe0   : > { %v7977_v7 = vld [vmem:[%s9045_s29 + $0x1300] sm:$0xf]  ;;  %v8739_v8 = vld [vmem:[%s9045_s29 + $0x130c] sm:$0xf0]  ;;  %v7850_v24 = vor.u32 %v8707_v4, %v7849_v3  ;;  %v5643_v48 = vld [vmem:[%s9045_s29 + $0xd0] sm:$0xf0]  ;;  %4430 = vmatpush.bf16.msra.mxu0 %v7594_v19 }
  0xe1   : > { %v5529_v21 = vld [vmem:[%s10809_s0 + $0x40] sm:$0xf]  ;;  %v8127_v22 = vld [vmem:[%s10809_s0 + $0x8c] sm:$0xf0]  ;;  %v7978_v28 = vor.u32 %v8739_v8, %v7977_v7  ;;  %v8185_v49 = vld [vmem:[%s9045_s29 + $0x1c4] sm:$0xf]  ;;  %4444 = vmatpush.bf16.msra.mxu1 %v7722_v23  ;;  %v5646_v61 = vor.u32 %v8153_v45, %v5643_v48 }
  0xe2   : > { %v9558_v51 = vor.u32 %v8127_v22, %v5529_v21  ;;  %v5771_v52 = vld [vmem:[%s9045_s29 + $0x1d0] sm:$0xf0]  ;;  %v8217_v53 = vld [vmem:[%s9045_s29 + $0x2c4] sm:$0xf]  ;;  %4458 = vmatpush.bf16.msra.mxu2 %v7850_v24  ;;  %10844 = vst [vmem:[#allocation18_spill] sm:$0xff] %v9563_v55 }
  0xe3   : > { %v5899_v54 = vld [vmem:[%s9045_s29 + $0x2d0] sm:$0xf0]  ;;  %10845 = vst [vmem:[#allocation19_spill] sm:$0xff] %v9565_v56  ;;  %v8249_v57 = vld [vmem:[%s9045_s29 + $0x3c4] sm:$0xf]  ;;  %4472 = vmatpush.bf16.msra.mxu3 %v7978_v28  ;;  %v5774_v63 = vor.u32 %v8185_v49, %v5771_v52 }
  0xe4   : > { %10843 = vst [vmem:[#allocation17_spill] sm:$0xff] %v9558_v51  ;;  %v6027_v59 = vld [vmem:[%s9045_s29 + $0x3d0] sm:$0xf0]  ;;  %4479 = vmatpush.bf16.msrb.mxu0 %v5662_v29  ;;  %v8149_v62 = vld [vmem:[%s9045_s29 + $0xa4] sm:$0xf]  ;;  %v5902_v0 = vor.u32 %v8217_v53, %v5899_v54  ;;  %4445 = vmatmul.bf16.vlgmr.msra.gmra.mxu1 %v9565_v56  ;;  %v4222_v53 = vpop.f32.mrf.mxu1 }
  0xe5   : > { %10846 = vst [vmem:[#allocation20_spill] sm:$0xff] %v9569_v60  ;;  %4493 = vmatpush.bf16.msrb.mxu1 %v5790_v37  ;;  %v5627_v2 = vld [vmem:[%s9045_s29 + $0xb0] sm:$0xf0]  ;;  %v8181_v3 = vld [vmem:[%s9045_s29 + $0x1a4] sm:$0xf]  ;;  %4431 = vmatmul.bf16.vlgmr.msra.gmra.mxu0 %v9558_v51  ;;  %v6030_v5 = vor.u32 %v8249_v57, %v6027_v59  ;;  %v4208_v26 = vpop.f32.mrf.mxu0 }
  0xe6   : > { %4507 = vmatpush.bf16.msrb.mxu2 %v5918_v42  ;;  %v9575_v4 = vld [vmem:[%s9053_s4] sm:$0xf]  ;;  %v5755_v6 = vld [vmem:[%s9045_s29 + $0x1b0] sm:$0xf0]  ;;  %4473 = vmatmul.bf16.vlgmr.msra.gmra.mxu3 %v9569_v60  ;;  %v5630_v12 = vor.u32 %v8149_v62, %v5627_v2 }
  0xe7   : > { %4521 = vmatpush.bf16.msrb.mxu3 %v6046_v50  ;;  %v8213_v7 = vld [vmem:[%s9045_s29 + $0x2a4] sm:$0xf]  ;;  %v5883_v8 = vld [vmem:[%s9045_s29 + $0x2b0] sm:$0xf0]  ;;  %4459 = vmatmul.bf16.vlgmr.msra.gmra.mxu2 %v9563_v55  ;;  %v10813_v13 = vperm.slane %v9575_v4, 0  ;;  %v5758_v14 = vor.u32 %v8181_v3, %v5755_v6 }
  0xe8   : > { %v8245_v9 = vld [vmem:[%s9045_s29 + $0x3a4] sm:$0xf]  ;;  %v6011_v11 = vld [vmem:[%s9045_s29 + $0x3b0] sm:$0xf0]  ;;  %4480 = vmatpush.bf16.msrb.mxu0 %v5646_v61  ;;  %v5886_v15 = vor.u32 %v8213_v7, %v5883_v8  ;;  %v4236_v7 = vpop.f32.mrf.mxu2 }
  0xe9   : > { %4494 = vmatpush.bf16.msrb.mxu1 %v5774_v63  ;;  %v8145_v16 = vld [vmem:[%s9045_s29 + $0x84] sm:$0xf]  ;;  %v5611_v18 = vld [vmem:[%s9045_s29 + $0x90] sm:$0xf0]  ;;  %v6014_v20 = vor.u32 %v8245_v9, %v6011_v11  ;;  %v4209_v28 = vadd.f32 %v4208_v26, %v10813_v13  ;;  %v8156_v13 = vld [vmem:[%s9045_s29 + $0xd4] sm:$0xf0] }
  0xea   : > { %4508 = vmatpush.bf16.msrb.mxu2 %v5902_v0  ;;  %v8177_v19 = vld [vmem:[%s9045_s29 + $0x184] sm:$0xf]  ;;  %v5739_v21 = vld [vmem:[%s9045_s29 + $0x190] sm:$0xf0]  ;;  %v5614_v27 = vor.u32 %v8145_v16, %v5611_v18 }
  0xeb   : > { %4522 = vmatpush.bf16.msrb.mxu3 %v6030_v5  ;;  %v8209_v22 = vld [vmem:[%s9045_s29 + $0x284] sm:$0xf]  ;;  %v5867_v23 = vld [vmem:[%s9045_s29 + $0x290] sm:$0xf0]  ;;  %v5742_v29 = vor.u32 %v8177_v19, %v5739_v21  ;;  %v4223_v57 = vadd.f32 %v4222_v53, %v4209_v28 }
  0xec   : > { %v8241_v24 = vld [vmem:[%s9045_s29 + $0x384] sm:$0xf]  ;;  %v5995_v25 = vld [vmem:[%s9045_s29 + $0x390] sm:$0xf0]  ;;  %4481 = vmatpush.bf16.msrb.mxu0 %v5630_v12  ;;  %v5870_v30 = vor.u32 %v8209_v22, %v5867_v23 }
  0xed   : > { %4495 = vmatpush.bf16.msrb.mxu1 %v5758_v14  ;;  %v8141_v33 = vld [vmem:[%s9045_s29 + $0x64] sm:$0xf]  ;;  %v5595_v34 = vld [vmem:[%s9045_s29 + $0x70] sm:$0xf0]  ;;  %v5998_v42 = vor.u32 %v8241_v24, %v5995_v25  ;;  %v4237_v11 = vadd.f32 %v4236_v7, %v4223_v57  ;;  %v4250_v24 = vpop.f32.mrf.mxu3 }
  0xee   : > { %4509 = vmatpush.bf16.msrb.mxu2 %v5886_v15  ;;  %v8173_v37 = vld [vmem:[%s9045_s29 + $0x164] sm:$0xf]  ;;  %v5723_v45 = vld [vmem:[%s9045_s29 + $0x170] sm:$0xf0]  ;;  %v5598_v54 = vor.u32 %v8141_v33, %v5595_v34 }
  0xef   : > { %4523 = vmatpush.bf16.msrb.mxu3 %v6014_v20  ;;  %v8205_v48 = vld [vmem:[%s9045_s29 + $0x264] sm:$0xf]  ;;  %v5851_v49 = vld [vmem:[%s9045_s29 + $0x270] sm:$0xf0]  ;;  %v5726_v59 = vor.u32 %v8173_v37, %v5723_v45 }
  0xf0   : > { %v8237_v50 = vld [vmem:[%s9045_s29 + $0x364] sm:$0xf]  ;;  %v5979_v52 = vld [vmem:[%s9045_s29 + $0x370] sm:$0xf0]  ;;  %4482 = vmatpush.bf16.msrb.mxu0 %v5614_v27  ;;  %v5854_v61 = vor.u32 %v8205_v48, %v5851_v49  ;;  %v9621_v27 = vadd.f32 %v4250_v24, %v4237_v11  ;;  %v9639_v11 = vpop.f32.mrf.mxu0 }
  0xf1   : > { %4496 = vmatpush.bf16.msrb.mxu1 %v5742_v29  ;;  %v8137_v62 = vld [vmem:[%s9045_s29 + $0x44] sm:$0xf]  ;;  %v5579_v63 = vld [vmem:[%s9045_s29 + $0x50] sm:$0xf0]  ;;  %v5982_v2 = vor.u32 %v8237_v50, %v5979_v52 }
  0xf2   : > { %4510 = vmatpush.bf16.msrb.mxu2 %v5870_v30  ;;  %v8169_v0 = vld [vmem:[%s9045_s29 + $0x144] sm:$0xf]  ;;  %v5707_v3 = vld [vmem:[%s9045_s29 + $0x150] sm:$0xf0]  ;;  %v5582_v12 = vor.u32 %v8137_v62, %v5579_v63 }
  0xf3   : > { %4524 = vmatpush.bf16.msrb.mxu3 %v5998_v42  ;;  %v8201_v5 = vld [vmem:[%s9045_s29 + $0x244] sm:$0xf]  ;;  %v5835_v6 = vld [vmem:[%s9045_s29 + $0x250] sm:$0xf0]  ;;  %v5710_v14 = vor.u32 %v8169_v0, %v5707_v3 }
  0xf4   : > { %v8233_v8 = vld [vmem:[%s9045_s29 + $0x344] sm:$0xf]  ;;  %v5963_v9 = vld [vmem:[%s9045_s29 + $0x350] sm:$0xf0]  ;;  %4483 = vmatpush.bf16.msrb.mxu0 %v5598_v54  ;;  %v5838_v15 = vor.u32 %v8201_v5, %v5835_v6 }
  0xf5   : > { %4497 = vmatpush.bf16.msrb.mxu1 %v5726_v59  ;;  %v8133_v16 = vld [vmem:[%s9045_s29 + $0x24] sm:$0xf]  ;;  %v5563_v18 = vld [vmem:[%s9045_s29 + $0x30] sm:$0xf0]  ;;  %v5966_v20 = vor.u32 %v8233_v8, %v5963_v9 }
  0xf6   : > { %4511 = vmatpush.bf16.msrb.mxu2 %v5854_v61  ;;  %v8165_v19 = vld [vmem:[%s9045_s29 + $0x124] sm:$0xf]  ;;  %v5691_v21 = vld [vmem:[%s9045_s29 + $0x130] sm:$0xf0]  ;;  %v5566_v28 = vor.u32 %v8133_v16, %v5563_v18 }
  0xf7   : > { %4525 = vmatpush.bf16.msrb.mxu3 %v5982_v2  ;;  %v8197_v22 = vld [vmem:[%s9045_s29 + $0x224] sm:$0xf]  ;;  %v5819_v23 = vld [vmem:[%s9045_s29 + $0x230] sm:$0xf0]  ;;  %v5694_v33 = vor.u32 %v8165_v19, %v5691_v21 }
  0xf8   : > { %v8229_v25 = vld [vmem:[%s9045_s29 + $0x324] sm:$0xf]  ;;  %v5947_v26 = vld [vmem:[%s9045_s29 + $0x330] sm:$0xf0]  ;;  %4484 = vmatpush.bf16.msrb.mxu0 %v5582_v12  ;;  %v5822_v34 = vor.u32 %v8197_v22, %v5819_v23  ;;  %v9649_v23 = vpop.f32.mrf.mxu1 }
  0xf9   : > { %v8129_v29 = vld [vmem:[%s9045_s29 + $0x4] sm:$0xf]  ;;  %v5547_v30 = vld [vmem:[%s9045_s29 + $0x10] sm:$0xf0]  ;;  %4498 = vmatpush.bf16.msrb.mxu1 %v5710_v14  ;;  %v5950_v48 = vor.u32 %v8229_v25, %v5947_v26 }
  0xfa   : > { %4512 = vmatpush.bf16.msrb.mxu2 %v5838_v15  ;;  %v8161_v37 = vld [vmem:[%s9045_s29 + $0x104] sm:$0xf]  ;;  %v5675_v42 = vld [vmem:[%s9045_s29 + $0x110] sm:$0xf0]  ;;  %v5550_v59 = vor.u32 %v8129_v29, %v5547_v30 }
  0xfb   : > { %v8193_v45 = vld [vmem:[%s9045_s29 + $0x204] sm:$0xf]  ;;  %4526 = vmatpush.bf16.msrb.mxu3 %v5966_v20  ;;  %v5803_v49 = vld [vmem:[%s9045_s29 + $0x210] sm:$0xf0]  ;;  %v5678_v0 = vor.u32 %v8161_v37, %v5675_v42 }
  0xfc   : > { %v8225_v50 = vld [vmem:[%s9045_s29 + $0x304] sm:$0xf]  ;;  %v5931_v52 = vld [vmem:[%s9045_s29 + $0x310] sm:$0xf0]  ;;  %4485 = vmatpush.bf16.msrb.mxu0 %v5566_v28  ;;  %v5806_v2 = vor.u32 %v8193_v45, %v5803_v49 }
  0xfd   : > { %v8285_v53 = vld [vmem:[%s9045_s29 + $0x4e4] sm:$0xf]  ;;  %v6171_v54 = vld [vmem:[%s9045_s29 + $0x4f0] sm:$0xf0]  ;;  %4499 = vmatpush.bf16.msrb.mxu1 %v5694_v33  ;;  %v5934_v6 = vor.u32 %v8225_v50, %v5931_v52  ;;  %v9662_v50 = vpop.f32.mrf.mxu2 }
  0xfe   : > { %v8317_v57 = vld [vmem:[%s9045_s29 + $0x5e4] sm:$0xf]  ;;  %v6299_v61 = vld [vmem:[%s9045_s29 + $0x5f0] sm:$0xf0]  ;;  %4513 = vmatpush.bf16.msrb.mxu2 %v5822_v34  ;;  %v6174_v7 = vor.u32 %v8285_v53, %v6171_v54 }
  0xff   : > { %v8349_v62 = vld [vmem:[%s9045_s29 + $0x6e4] sm:$0xf]  ;;  %v6427_v63 = vld [vmem:[%s9045_s29 + $0x6f0] sm:$0xf0]  ;;  %4527 = vmatpush.bf16.msrb.mxu3 %v5950_v48  ;;  %v6302_v8 = vor.u32 %v8317_v57, %v6299_v61 }
 0x100   : > { %v8381_v3 = vld [vmem:[%s9045_s29 + $0x7e4] sm:$0xf]  ;;  %v6555_v5 = vld [vmem:[%s9045_s29 + $0x7f0] sm:$0xf0]  ;;  %v6430_v9 = vor.u32 %v8349_v62, %v6427_v63  ;;  %4486 = vmatpush.bf16.msrb.mxu0 %v5550_v59  ;;  %v9668_v62 = vpop.f32.mrf.mxu3 }
 0x101   : > { %v8281_v12 = vld [vmem:[%s9045_s29 + $0x4c4] sm:$0xf]  ;;  %v6155_v14 = vld [vmem:[%s9045_s29 + $0x4d0] sm:$0xf0]  ;;  %v6558_v16 = vor.u32 %v8381_v3, %v6555_v5  ;;  %4500 = vmatpush.bf16.msrb.mxu1 %v5678_v0 }
 0x102   : > { %v8313_v15 = vld [vmem:[%s9045_s29 + $0x5c4] sm:$0xf]  ;;  %v6283_v18 = vld [vmem:[%s9045_s29 + $0x5d0] sm:$0xf0]  ;;  %4514 = vmatpush.bf16.msrb.mxu2 %v5806_v2  ;;  %v6158_v24 = vor.u32 %v8281_v12, %v6155_v14  ;;  %v4264_v3 = vpop.f32.mrf.mxu0  ;;  %v4278_v14 = vpop.f32.mrf.mxu1 }
 0x103   : > { %v8345_v19 = vld [vmem:[%s9045_s29 + $0x6c4] sm:$0xf]  ;;  %v6411_v20 = vld [vmem:[%s9045_s29 + $0x6d0] sm:$0xf0]  ;;  %4528 = vmatpush.bf16.msrb.mxu3 %v5934_v6  ;;  %v6286_v25 = vor.u32 %v8313_v15, %v6283_v18  ;;  %4487 = vmatmul.bf16.vlgmr.msrb.gmra.mxu0 %v9150_v58 }
 0x104   : > { %v8377_v21 = vld [vmem:[%s9045_s29 + $0x7c4] sm:$0xf]  ;;  %v6539_v22 = vld [vmem:[%s9045_s29 + $0x7d0] sm:$0xf0]  ;;  %4535 = vmatpush.bf16.msra.mxu0 %v6174_v7  ;;  %v6414_v26 = vor.u32 %v8345_v19, %v6411_v20  ;;  %4501 = vmatmul.bf16.vlgmr.msrb.gmra.mxu1 %v9174_v10  ;;  %v4265_v7 = vadd.f32 %v4264_v3, %v9621_v27 }
 0x105   : > { %4549 = vmatpush.bf16.msra.mxu1 %v6302_v8  ;;  %v8277_v28 = vld [vmem:[%s9045_s29 + $0x4a4] sm:$0xf]  ;;  %v6139_v29 = vld [vmem:[%s9045_s29 + $0x4b0] sm:$0xf0]  ;;  %v6542_v33 = vor.u32 %v8377_v21, %v6539_v22  ;;  %4515 = vmatmul.bf16.vlgmr.msrb.gmra.mxu2 %v9158_v1 }
 0x106   : > { %4563 = vmatpush.bf16.msra.mxu2 %v6430_v9  ;;  %v8309_v30 = vld [vmem:[%s9045_s29 + $0x5a4] sm:$0xf]  ;;  %v6267_v34 = vld [vmem:[%s9045_s29 + $0x5b0] sm:$0xf0]  ;;  %v6142_v49 = vor.u32 %v8277_v28, %v6139_v29  ;;  %4529 = vmatmul.bf16.vlgmr.msrb.gmra.mxu3 %v9182_v17  ;;  %v4279_v20 = vadd.f32 %v4278_v14, %v4265_v7 }
 0x107   : > { %4577 = vmatpush.bf16.msra.mxu3 %v6558_v16  ;;  %v8341_v37 = vld [vmem:[%s9045_s29 + $0x6a4] sm:$0xf]  ;;  %v6395_v42 = vld [vmem:[%s9045_s29 + $0x6b0] sm:$0xf0]  ;;  %v6270_v52 = vor.u32 %v8309_v30, %v6267_v34 }
 0x108   : > { %v8373_v45 = vld [vmem:[%s9045_s29 + $0x7a4] sm:$0xf]  ;;  %v6523_v48 = vld [vmem:[%s9045_s29 + $0x7b0] sm:$0xf0]  ;;  %4536 = vmatpush.bf16.msra.mxu0 %v6158_v24  ;;  %v6398_v53 = vor.u32 %v8341_v37, %v6395_v42  ;;  %v4292_v42 = vpop.f32.mrf.mxu2 }
 0x109   : > { %4550 = vmatpush.bf16.msra.mxu1 %v6286_v25  ;;  %v8273_v54 = vld [vmem:[%s9045_s29 + $0x484] sm:$0xf]  ;;  %v6123_v57 = vld [vmem:[%s9045_s29 + $0x490] sm:$0xf0]  ;;  %v6526_v61 = vor.u32 %v8373_v45, %v6523_v48 }
 0x10a   : > { %4564 = vmatpush.bf16.msra.mxu2 %v6414_v26  ;;  %v8305_v59 = vld [vmem:[%s9045_s29 + $0x584] sm:$0xf]  ;;  %v6251_v63 = vld [vmem:[%s9045_s29 + $0x590] sm:$0xf0]  ;;  %v6126_v8 = vor.u32 %v8273_v54, %v6123_v57  ;;  %v4306_v57 = vpop.f32.mrf.mxu3 }
 0x10b   : > { %4578 = vmatpush.bf16.msra.mxu3 %v6542_v33  ;;  %v8337_v0 = vld [vmem:[%s9045_s29 + $0x684] sm:$0xf]  ;;  %v6379_v2 = vld [vmem:[%s9045_s29 + $0x690] sm:$0xf0]  ;;  %v6254_v9 = vor.u32 %v8305_v59, %v6251_v63 }
 0x10c   : > { %v8369_v5 = vld [vmem:[%s9045_s29 + $0x784] sm:$0xf]  ;;  %v6507_v6 = vld [vmem:[%s9045_s29 + $0x790] sm:$0xf0]  ;;  %4537 = vmatpush.bf16.msra.mxu0 %v6142_v49  ;;  %v6382_v12 = vor.u32 %v8337_v0, %v6379_v2 }
 0x10d   : > { %4551 = vmatpush.bf16.msra.mxu1 %v6270_v52  ;;  %v8269_v15 = vld [vmem:[%s9045_s29 + $0x464] sm:$0xf]  ;;  %v6107_v16 = vld [vmem:[%s9045_s29 + $0x470] sm:$0xf0]  ;;  %v6510_v19 = vor.u32 %v8369_v5, %v6507_v6  ;;  %v4293_v52 = vadd.f32 %v4292_v42, %v4279_v20 }
 0x10e   : > { %4565 = vmatpush.bf16.msra.mxu2 %v6398_v53  ;;  %v8301_v18 = vld [vmem:[%s9045_s29 + $0x564] sm:$0xf]  ;;  %v6235_v21 = vld [vmem:[%s9045_s29 + $0x570] sm:$0xf0]  ;;  %v6110_v26 = vor.u32 %v8269_v15, %v6107_v16 }
 0x10f   : > { %4579 = vmatpush.bf16.msra.mxu3 %v6526_v61  ;;  %v8333_v22 = vld [vmem:[%s9045_s29 + $0x664] sm:$0xf]  ;;  %v6363_v27 = vld [vmem:[%s9045_s29 + $0x670] sm:$0xf0]  ;;  %v6238_v28 = vor.u32 %v8301_v18, %v6235_v21  ;;  %v9692_v61 = vadd.f32 %v4306_v57, %v4293_v52 }
 0x110   : > { %v8365_v24 = vld [vmem:[%s9045_s29 + $0x764] sm:$0xf]  ;;  %v6491_v25 = vld [vmem:[%s9045_s29 + $0x770] sm:$0xf0]  ;;  %4538 = vmatpush.bf16.msra.mxu0 %v6126_v8  ;;  %v6366_v29 = vor.u32 %v8333_v22, %v6363_v27 }
 0x111   : > { %4552 = vmatpush.bf16.msra.mxu1 %v6254_v9  ;;  %v8265_v30 = vld [vmem:[%s9045_s29 + $0x444] sm:$0xf]  ;;  %v6091_v33 = vld [vmem:[%s9045_s29 + $0x450] sm:$0xf0]  ;;  %v6494_v37 = vor.u32 %v8365_v24, %v6491_v25 }
 0x112   : > { %4566 = vmatpush.bf16.msra.mxu2 %v6382_v12  ;;  %v8297_v34 = vld [vmem:[%s9045_s29 + $0x544] sm:$0xf]  ;;  %v6219_v45 = vld [vmem:[%s9045_s29 + $0x550] sm:$0xf0]  ;;  %v6094_v59 = vor.u32 %v8265_v30, %v6091_v33 }
 0x113   : > { %4580 = vmatpush.bf16.msra.mxu3 %v6510_v19  ;;  %v8329_v48 = vld [vmem:[%s9045_s29 + $0x644] sm:$0xf]  ;;  %v6347_v49 = vld [vmem:[%s9045_s29 + $0x650] sm:$0xf0]  ;;  %v6222_v63 = vor.u32 %v8297_v34, %v6219_v45 }
 0x114   : > { %v8361_v53 = vld [vmem:[%s9045_s29 + $0x744] sm:$0xf]  ;;  %v6475_v54 = vld [vmem:[%s9045_s29 + $0x750] sm:$0xf0]  ;;  %4539 = vmatpush.bf16.msra.mxu0 %v6110_v26  ;;  %v6350_v0 = vor.u32 %v8329_v48, %v6347_v49 }
 0x115   : > { %4553 = vmatpush.bf16.msra.mxu1 %v6238_v28  ;;  %v8261_v2 = vld [vmem:[%s9045_s29 + $0x424] sm:$0xf]  ;;  %v6075_v3 = vld [vmem:[%s9045_s29 + $0x430] sm:$0xf0]  ;;  %v6478_v6 = vor.u32 %v8361_v53, %v6475_v54 }
 0x116   : > { %4567 = vmatpush.bf16.msra.mxu2 %v6366_v29  ;;  %v8293_v5 = vld [vmem:[%s9045_s29 + $0x524] sm:$0xf]  ;;  %v6203_v7 = vld [vmem:[%s9045_s29 + $0x530] sm:$0xf0]  ;;  %v6078_v15 = vor.u32 %v8261_v2, %v6075_v3 }
 0x117   : > { %4581 = vmatpush.bf16.msra.mxu3 %v6494_v37  ;;  %v8325_v8 = vld [vmem:[%s9045_s29 + $0x624] sm:$0xf]  ;;  %v6331_v9 = vld [vmem:[%s9045_s29 + $0x630] sm:$0xf0]  ;;  %v6206_v19 = vor.u32 %v8293_v5, %v6203_v7 }
 0x118   : > { %v8357_v12 = vld [vmem:[%s9045_s29 + $0x724] sm:$0xf]  ;;  %v6459_v14 = vld [vmem:[%s9045_s29 + $0x730] sm:$0xf0]  ;;  %4540 = vmatpush.bf16.msra.mxu0 %v6094_v59  ;;  %v6334_v20 = vor.u32 %v8325_v8, %v6331_v9  ;;  %v9724_v9 = vpop.f32.mrf.mxu0 }
 0x119   : > { %v8257_v16 = vld [vmem:[%s9045_s29 + $0x404] sm:$0xf]  ;;  %v6059_v18 = vld [vmem:[%s9045_s29 + $0x410] sm:$0xf0]  ;;  %4554 = vmatpush.bf16.msra.mxu1 %v6222_v63  ;;  %v6462_v24 = vor.u32 %v8357_v12, %v6459_v14 }
 0x11a   : > { %4568 = vmatpush.bf16.msra.mxu2 %v6350_v0  ;;  %v8289_v21 = vld [vmem:[%s9045_s29 + $0x504] sm:$0xf]  ;;  %v6187_v22 = vld [vmem:[%s9045_s29 + $0x510] sm:$0xf0]  ;;  %v6062_v34 = vor.u32 %v8257_v16, %v6059_v18 }
 0x11b   : > { %v8321_v27 = vld [vmem:[%s9045_s29 + $0x604] sm:$0xf]  ;;  %4582 = vmatpush.bf16.msra.mxu3 %v6478_v6  ;;  %v6315_v25 = vld [vmem:[%s9045_s29 + $0x610] sm:$0xf0]  ;;  %v6190_v48 = vor.u32 %v8289_v21, %v6187_v22 }
 0x11c   : > { %v8353_v26 = vld [vmem:[%s9045_s29 + $0x704] sm:$0xf]  ;;  %v6443_v28 = vld [vmem:[%s9045_s29 + $0x710] sm:$0xf0]  ;;  %4541 = vmatpush.bf16.msra.mxu0 %v6078_v15  ;;  %v6318_v49 = vor.u32 %v8321_v27, %v6315_v25  ;;  %v9728_v15 = vpop.f32.mrf.mxu1 }
 0x11d   : > { %v8413_v29 = vld [vmem:[%s9045_s29 + $0x8e4] sm:$0xf]  ;;  %v6683_v30 = vld [vmem:[%s9045_s29 + $0x8f0] sm:$0xf0]  ;;  %4555 = vmatpush.bf16.msra.mxu1 %v6206_v19  ;;  %v6446_v54 = vor.u32 %v8353_v26, %v6443_v28 }
 0x11e   : > { %v8445_v33 = vld [vmem:[%s9045_s29 + $0x9e4] sm:$0xf]  ;;  %v6811_v37 = vld [vmem:[%s9045_s29 + $0x9f0] sm:$0xf0]  ;;  %4569 = vmatpush.bf16.msra.mxu2 %v6334_v20  ;;  %v6686_v57 = vor.u32 %v8413_v29, %v6683_v30 }
 0x11f   : > { %v8477_v42 = vld [vmem:[%s9045_s29 + $0xae4] sm:$0xf]  ;;  %v6939_v45 = vld [vmem:[%s9045_s29 + $0xaf0] sm:$0xf0]  ;;  %4583 = vmatpush.bf16.msra.mxu3 %v6462_v24  ;;  %v6814_v59 = vor.u32 %v8445_v33, %v6811_v37 }
 0x120   : > { %v8509_v52 = vld [vmem:[%s9045_s29 + $0xbe4] sm:$0xf]  ;;  %v7067_v53 = vld [vmem:[%s9045_s29 + $0xbf0] sm:$0xf0]  ;;  %v6942_v63 = vor.u32 %v8477_v42, %v6939_v45  ;;  %4542 = vmatpush.bf16.msra.mxu0 %v6062_v34 }
 0x121   : > { %v8409_v0 = vld [vmem:[%s9045_s29 + $0x8c4] sm:$0xf]  ;;  %v6667_v2 = vld [vmem:[%s9045_s29 + $0x8d0] sm:$0xf0]  ;;  %v7070_v5 = vor.u32 %v8509_v52, %v7067_v53  ;;  %4556 = vmatpush.bf16.msra.mxu1 %v6190_v48  ;;  %v9745_v48 = vpop.f32.mrf.mxu2 }
 0x122   : > { %v8441_v3 = vld [vmem:[%s9045_s29 + $0x9c4] sm:$0xf]  ;;  %v6795_v6 = vld [vmem:[%s9045_s29 + $0x9d0] sm:$0xf0]  ;;  %4570 = vmatpush.bf16.msra.mxu2 %v6318_v49  ;;  %v6670_v16 = vor.u32 %v8409_v0, %v6667_v2 }
 0x123   : > { %v8473_v7 = vld [vmem:[%s9045_s29 + $0xac4] sm:$0xf]  ;;  %v6923_v8 = vld [vmem:[%s9045_s29 + $0xad0] sm:$0xf0]  ;;  %4584 = vmatpush.bf16.msra.mxu3 %v6446_v54  ;;  %v6798_v18 = vor.u32 %v8441_v3, %v6795_v6  ;;  %4543 = vmatmul.bf16.vlgmr.msra.gmra.mxu0 %v9258_v39 }
 0x124   : > { %v8505_v12 = vld [vmem:[%s9045_s29 + $0xbc4] sm:$0xf]  ;;  %v7051_v14 = vld [vmem:[%s9045_s29 + $0xbd0] sm:$0xf0]  ;;  %4591 = vmatpush.bf16.msrb.mxu0 %v6686_v57  ;;  %v6926_v19 = vor.u32 %v8473_v7, %v6923_v8  ;;  %4557 = vmatmul.bf16.vlgmr.msra.gmra.mxu1 %v9265_v44  ;;  %v9750_v57 = vpop.f32.mrf.mxu3 }
 0x125   : > { %4605 = vmatpush.bf16.msrb.mxu1 %v6814_v59  ;;  %v8405_v20 = vld [vmem:[%s9045_s29 + $0x8a4] sm:$0xf]  ;;  %v6651_v21 = vld [vmem:[%s9045_s29 + $0x8b0] sm:$0xf0]  ;;  %v7054_v27 = vor.u32 %v8505_v12, %v7051_v14  ;;  %4571 = vmatmul.bf16.vlgmr.msra.gmra.mxu2 %v9263_v43  ;;  %v4320_v59 = vpop.f32.mrf.mxu0 }
 0x126   : > { %4619 = vmatpush.bf16.msrb.mxu2 %v6942_v63  ;;  %v8437_v22 = vld [vmem:[%s9045_s29 + $0x9a4] sm:$0xf]  ;;  %v6779_v24 = vld [vmem:[%s9045_s29 + $0x9b0] sm:$0xf0]  ;;  %4585 = vmatmul.bf16.vlgmr.msra.gmra.mxu3 %v9269_v47  ;;  %v6654_v30 = vor.u32 %v8405_v20, %v6651_v21  ;;  %v4321_v2 = vadd.f32 %v4320_v59, %v9692_v61 }
 0x127   : > { %4633 = vmatpush.bf16.msrb.mxu3 %v7070_v5  ;;  %v8469_v25 = vld [vmem:[%s9045_s29 + $0xaa4] sm:$0xf]  ;;  %v6907_v26 = vld [vmem:[%s9045_s29 + $0xab0] sm:$0xf0]  ;;  %v6782_v33 = vor.u32 %v8437_v22, %v6779_v24  ;;  %v4334_v5 = vpop.f32.mrf.mxu1 }
 0x128   : > { %v8501_v28 = vld [vmem:[%s9045_s29 + $0xba4] sm:$0xf]  ;;  %v7035_v29 = vld [vmem:[%s9045_s29 + $0xbb0] sm:$0xf0]  ;;  %4592 = vmatpush.bf16.msrb.mxu0 %v6670_v16  ;;  %v6910_v34 = vor.u32 %v8469_v25, %v6907_v26 }
 0x129   : > { %4606 = vmatpush.bf16.msrb.mxu1 %v6798_v18  ;;  %v8401_v37 = vld [vmem:[%s9045_s29 + $0x884] sm:$0xf]  ;;  %v6635_v42 = vld [vmem:[%s9045_s29 + $0x890] sm:$0xf0]  ;;  %v7038_v49 = vor.u32 %v8501_v28, %v7035_v29  ;;  %v4335_v18 = vadd.f32 %v4334_v5, %v4321_v2 }
 0x12a   : > { %4620 = vmatpush.bf16.msrb.mxu2 %v6926_v19  ;;  %v8433_v45 = vld [vmem:[%s9045_s29 + $0x984] sm:$0xf]  ;;  %v6763_v52 = vld [vmem:[%s9045_s29 + $0x990] sm:$0xf0]  ;;  %v6638_v3 = vor.u32 %v8401_v37, %v6635_v42 }
 0x12b   : > { %4634 = vmatpush.bf16.msrb.mxu3 %v7054_v27  ;;  %v8465_v53 = vld [vmem:[%s9045_s29 + $0xa84] sm:$0xf]  ;;  %v6891_v54 = vld [vmem:[%s9045_s29 + $0xa90] sm:$0xf0]  ;;  %v6766_v6 = vor.u32 %v8433_v45, %v6763_v52 }
 0x12c   : > { %v8497_v63 = vld [vmem:[%s9045_s29 + $0xb84] sm:$0xf]  ;;  %v7019_v0 = vld [vmem:[%s9045_s29 + $0xb90] sm:$0xf0]  ;;  %4593 = vmatpush.bf16.msrb.mxu0 %v6654_v30  ;;  %v6894_v7 = vor.u32 %v8465_v53, %v6891_v54 }
 0x12d   : > { %4607 = vmatpush.bf16.msrb.mxu1 %v6782_v33  ;;  %v8397_v8 = vld [vmem:[%s9045_s29 + $0x864] sm:$0xf]  ;;  %v6619_v12 = vld [vmem:[%s9045_s29 + $0x870] sm:$0xf0]  ;;  %v7022_v16 = vor.u32 %v8497_v63, %v7019_v0  ;;  %v4348_v33 = vpop.f32.mrf.mxu2 }
 0x12e   : > { %4621 = vmatpush.bf16.msrb.mxu2 %v6910_v34  ;;  %v8429_v14 = vld [vmem:[%s9045_s29 + $0x964] sm:$0xf]  ;;  %v6747_v19 = vld [vmem:[%s9045_s29 + $0x970] sm:$0xf0]  ;;  %v6622_v27 = vor.u32 %v8397_v8, %v6619_v12  ;;  %v4349_v45 = vadd.f32 %v4348_v33, %v4335_v18 }
 0x12f   : > { %4635 = vmatpush.bf16.msrb.mxu3 %v7038_v49  ;;  %v8461_v20 = vld [vmem:[%s9045_s29 + $0xa64] sm:$0xf]  ;;  %v6875_v61 = vld [vmem:[%s9045_s29 + $0xa70] sm:$0xf0]  ;;  %v6750_v24 = vor.u32 %v8429_v14, %v6747_v19  ;;  %v4362_v49 = vpop.f32.mrf.mxu3 }
 0x130   : > { %v8493_v21 = vld [vmem:[%s9045_s29 + $0xb64] sm:$0xf]  ;;  %v7003_v22 = vld [vmem:[%s9045_s29 + $0xb70] sm:$0xf0]  ;;  %4594 = vmatpush.bf16.msrb.mxu0 %v6638_v3  ;;  %v6878_v25 = vor.u32 %v8461_v20, %v6875_v61  ;;  %v9771_v59 = vadd.f32 %v4362_v49, %v4349_v45 }
 0x131   : > { %4608 = vmatpush.bf16.msrb.mxu1 %v6766_v6  ;;  %v8393_v26 = vld [vmem:[%s9045_s29 + $0x844] sm:$0xf]  ;;  %v6603_v28 = vld [vmem:[%s9045_s29 + $0x850] sm:$0xf0]  ;;  %v7006_v30 = vor.u32 %v8493_v21, %v7003_v22 }
 0x132   : > { %4622 = vmatpush.bf16.msrb.mxu2 %v6894_v7  ;;  %v8425_v29 = vld [vmem:[%s9045_s29 + $0x944] sm:$0xf]  ;;  %v6731_v34 = vld [vmem:[%s9045_s29 + $0x950] sm:$0xf0]  ;;  %v6606_v54 = vor.u32 %v8393_v26, %v6603_v28 }
 0x133   : > { %4636 = vmatpush.bf16.msrb.mxu3 %v7022_v16  ;;  %v8457_v37 = vld [vmem:[%s9045_s29 + $0xa44] sm:$0xf]  ;;  %v6859_v42 = vld [vmem:[%s9045_s29 + $0xa50] sm:$0xf0]  ;;  %v6734_v63 = vor.u32 %v8425_v29, %v6731_v34 }
 0x134   : > { %v8489_v52 = vld [vmem:[%s9045_s29 + $0xb44] sm:$0xf]  ;;  %v6987_v53 = vld [vmem:[%s9045_s29 + $0xb50] sm:$0xf0]  ;;  %4595 = vmatpush.bf16.msrb.mxu0 %v6622_v27  ;;  %v6862_v0 = vor.u32 %v8457_v37, %v6859_v42 }
 0x135   : > { %4609 = vmatpush.bf16.msrb.mxu1 %v6750_v24  ;;  %v8389_v2 = vld [vmem:[%s9045_s29 + $0x824] sm:$0xf]  ;;  %v6587_v3 = vld [vmem:[%s9045_s29 + $0x830] sm:$0xf0]  ;;  %v6990_v6 = vor.u32 %v8489_v52, %v6987_v53 }
 0x136   : > { %4623 = vmatpush.bf16.msrb.mxu2 %v6878_v25  ;;  %v8421_v5 = vld [vmem:[%s9045_s29 + $0x924] sm:$0xf]  ;;  %v6715_v7 = vld [vmem:[%s9045_s29 + $0x930] sm:$0xf0]  ;;  %v6590_v18 = vor.u32 %v8389_v2, %v6587_v3 }
 0x137   : > { %4637 = vmatpush.bf16.msrb.mxu3 %v7006_v30  ;;  %v8453_v8 = vld [vmem:[%s9045_s29 + $0xa24] sm:$0xf]  ;;  %v6843_v12 = vld [vmem:[%s9045_s29 + $0xa30] sm:$0xf0]  ;;  %v6718_v61 = vor.u32 %v8421_v5, %v6715_v7 }
 0x138   : > { %v8485_v14 = vld [vmem:[%s9045_s29 + $0xb24] sm:$0xf]  ;;  %v6971_v16 = vld [vmem:[%s9045_s29 + $0xb30] sm:$0xf0]  ;;  %4596 = vmatpush.bf16.msrb.mxu0 %v6606_v54  ;;  %v6846_v21 = vor.u32 %v8453_v8, %v6843_v12 }
 0x139   : > { %v8385_v19 = vld [vmem:[%s9045_s29 + $0x804] sm:$0xf]  ;;  %v6571_v20 = vld [vmem:[%s9045_s29 + $0x810] sm:$0xf0]  ;;  %4610 = vmatpush.bf16.msrb.mxu1 %v6734_v63  ;;  %v6974_v25 = vor.u32 %v8485_v14, %v6971_v16 }
 0x13a   : > { %4624 = vmatpush.bf16.msrb.mxu2 %v6862_v0  ;;  %v8417_v22 = vld [vmem:[%s9045_s29 + $0x904] sm:$0xf]  ;;  %v6699_v27 = vld [vmem:[%s9045_s29 + $0x910] sm:$0xf0]  ;;  %v6574_v37 = vor.u32 %v8385_v19, %v6571_v20  ;;  %v9803_v19 = vpop.f32.mrf.mxu0 }
 0x13b   : > { %v8449_v24 = vld [vmem:[%s9045_s29 + $0xa04] sm:$0xf]  ;;  %4638 = vmatpush.bf16.msrb.mxu3 %v6990_v6  ;;  %v6827_v26 = vld [vmem:[%s9045_s29 + $0xa10] sm:$0xf0]  ;;  %v6702_v52 = vor.u32 %v8417_v22, %v6699_v27 }
 0x13c   : > { %v8481_v28 = vld [vmem:[%s9045_s29 + $0xb04] sm:$0xf]  ;;  %v6955_v29 = vld [vmem:[%s9045_s29 + $0xb10] sm:$0xf0]  ;;  %4597 = vmatpush.bf16.msrb.mxu0 %v6590_v18  ;;  %v6830_v53 = vor.u32 %v8449_v24, %v6827_v26 }
 0x13d   : > { %v8541_v30 = vld [vmem:[%s9045_s29 + $0xce4] sm:$0xf]  ;;  %v7195_v33 = vld [vmem:[%s9045_s29 + $0xcf0] sm:$0xf0]  ;;  %4611 = vmatpush.bf16.msrb.mxu1 %v6718_v61  ;;  %v6958_v0 = vor.u32 %v8481_v28, %v6955_v29 }
 0x13e   : > { %v8573_v34 = vld [vmem:[%s9045_s29 + $0xde4] sm:$0xf]  ;;  %v7323_v42 = vld [vmem:[%s9045_s29 + $0xdf0] sm:$0xf0]  ;;  %4625 = vmatpush.bf16.msrb.mxu2 %v6846_v21  ;;  %v7198_v2 = vor.u32 %v8541_v30, %v7195_v33  ;;  %v9807_v21 = vpop.f32.mrf.mxu1 }
 0x13f   : > { %v8605_v45 = vld [vmem:[%s9045_s29 + $0xee4] sm:$0xf]  ;;  %v7451_v49 = vld [vmem:[%s9045_s29 + $0xef0] sm:$0xf0]  ;;  %4639 = vmatpush.bf16.msrb.mxu3 %v6974_v25  ;;  %v7326_v3 = vor.u32 %v8573_v34, %v7323_v42 }
 0x140   : > { %v8637_v54 = vld [vmem:[%s9045_s29 + $0xfe4] sm:$0xf]  ;;  %v7579_v63 = vld [vmem:[%s9045_s29 + $0xff0] sm:$0xf0]  ;;  %v7454_v5 = vor.u32 %v8605_v45, %v7451_v49  ;;  %4598 = vmatpush.bf16.msrb.mxu0 %v6574_v37 }
 0x141   : > { %v8537_v6 = vld [vmem:[%s9045_s29 + $0xcc4] sm:$0xf]  ;;  %v7179_v7 = vld [vmem:[%s9045_s29 + $0xcd0] sm:$0xf0]  ;;  %v7582_v12 = vor.u32 %v8637_v54, %v7579_v63  ;;  %4612 = vmatpush.bf16.msrb.mxu1 %v6702_v52 }
 0x142   : > { %v8569_v8 = vld [vmem:[%s9045_s29 + $0xdc4] sm:$0xf]  ;;  %v7307_v14 = vld [vmem:[%s9045_s29 + $0xdd0] sm:$0xf0]  ;;  %4626 = vmatpush.bf16.msrb.mxu2 %v6830_v53  ;;  %v7182_v22 = vor.u32 %v8537_v6, %v7179_v7  ;;  %v9829_v7 = vpop.f32.mrf.mxu3 }
 0x143   : > { %v8601_v16 = vld [vmem:[%s9045_s29 + $0xec4] sm:$0xf]  ;;  %v7435_v18 = vld [vmem:[%s9045_s29 + $0xed0] sm:$0xf0]  ;;  %4640 = vmatpush.bf16.msrb.mxu3 %v6958_v0  ;;  %v7310_v27 = vor.u32 %v8569_v8, %v7307_v14  ;;  %4599 = vmatmul.bf16.vlgmr.msrb.gmra.mxu0 %v9358_v31  ;;  %v9824_v0 = vpop.f32.mrf.mxu2 }
 0x144   : > { %v8633_v20 = vld [vmem:[%s9045_s29 + $0xfc4] sm:$0xf]  ;;  %v7563_v61 = vld [vmem:[%s9045_s29 + $0xfd0] sm:$0xf0]  ;;  %4647 = vmatpush.bf16.msra.mxu0 %v7198_v2  ;;  %v7438_v24 = vor.u32 %v8601_v16, %v7435_v18  ;;  %4613 = vmatmul.bf16.vlgmr.msrb.gmra.mxu1 %v9365_v36  ;;  %v4376_v8 = vpop.f32.mrf.mxu0 }
 0x145   : > { %4661 = vmatpush.bf16.msra.mxu1 %v7326_v3  ;;  %v8533_v25 = vld [vmem:[%s9045_s29 + $0xca4] sm:$0xf]  ;;  %v7163_v26 = vld [vmem:[%s9045_s29 + $0xcb0] sm:$0xf0]  ;;  %v7566_v29 = vor.u32 %v8633_v20, %v7563_v61  ;;  %4627 = vmatmul.bf16.vlgmr.msrb.gmra.mxu2 %v9363_v35  ;;  %v4377_v16 = vadd.f32 %v4376_v8, %v9771_v59 }
 0x146   : > { %4675 = vmatpush.bf16.msra.mxu2 %v7454_v5  ;;  %v8565_v28 = vld [vmem:[%s9045_s29 + $0xda4] sm:$0xf]  ;;  %v7291_v30 = vld [vmem:[%s9045_s29 + $0xdb0] sm:$0xf0]  ;;  %4641 = vmatmul.bf16.vlgmr.msrb.gmra.mxu3 %v9369_v40  ;;  %v7166_v45 = vor.u32 %v8533_v25, %v7163_v26  ;;  %v4390_v20 = vpop.f32.mrf.mxu1 }
 0x147   : > { %4689 = vmatpush.bf16.msra.mxu3 %v7582_v12  ;;  %v8597_v33 = vld [vmem:[%s9045_s29 + $0xea4] sm:$0xf]  ;;  %v7419_v34 = vld [vmem:[%s9045_s29 + $0xeb0] sm:$0xf0]  ;;  %v7294_v49 = vor.u32 %v8565_v28, %v7291_v30  ;;  %v4391_v28 = vadd.f32 %v4390_v20, %v4377_v16 }
 0x148   : > { %v8629_v37 = vld [vmem:[%s9045_s29 + $0xfa4] sm:$0xf]  ;;  %v7547_v42 = vld [vmem:[%s9045_s29 + $0xfb0] sm:$0xf0]  ;;  %4648 = vmatpush.bf16.msra.mxu0 %v7182_v22  ;;  %v7422_v52 = vor.u32 %v8597_v33, %v7419_v34 }
 0x149   : > { %4662 = vmatpush.bf16.msra.mxu1 %v7310_v27  ;;  %v8529_v53 = vld [vmem:[%s9045_s29 + $0xc84] sm:$0xf]  ;;  %v7147_v54 = vld [vmem:[%s9045_s29 + $0xc90] sm:$0xf0]  ;;  %v7550_v2 = vor.u32 %v8629_v37, %v7547_v42 }
 0x14a   : > { %4676 = vmatpush.bf16.msra.mxu2 %v7438_v24  ;;  %v8561_v63 = vld [vmem:[%s9045_s29 + $0xd84] sm:$0xf]  ;;  %v7275_v3 = vld [vmem:[%s9045_s29 + $0xd90] sm:$0xf0]  ;;  %v7150_v18 = vor.u32 %v8529_v53, %v7147_v54  ;;  %v4418_v8 = vpop.f32.mrf.mxu3 }
 0x14b   : > { %4690 = vmatpush.bf16.msra.mxu3 %v7566_v29  ;;  %v8593_v5 = vld [vmem:[%s9045_s29 + $0xe84] sm:$0xf]  ;;  %v7403_v6 = vld [vmem:[%s9045_s29 + $0xe90] sm:$0xf0]  ;;  %v7278_v61 = vor.u32 %v8561_v63, %v7275_v3  ;;  %v4404_v63 = vpop.f32.mrf.mxu2 }
 0x14c   : > { %v8625_v12 = vld [vmem:[%s9045_s29 + $0xf84] sm:$0xf]  ;;  %v7531_v14 = vld [vmem:[%s9045_s29 + $0xf90] sm:$0xf0]  ;;  %4649 = vmatpush.bf16.msra.mxu0 %v7166_v45  ;;  %v7406_v22 = vor.u32 %v8593_v5, %v7403_v6  ;;  %v4405_v6 = vadd.f32 %v4404_v63, %v4391_v28 }
 0x14d   : > { %4663 = vmatpush.bf16.msra.mxu1 %v7294_v49  ;;  %v8525_v27 = vld [vmem:[%s9045_s29 + $0xc64] sm:$0xf]  ;;  %v7131_v24 = vld [vmem:[%s9045_s29 + $0xc70] sm:$0xf0]  ;;  %v7534_v26 = vor.u32 %v8625_v12, %v7531_v14 }
 0x14e   : > { %4677 = vmatpush.bf16.msra.mxu2 %v7422_v52  ;;  %v8557_v25 = vld [vmem:[%s9045_s29 + $0xd64] sm:$0xf]  ;;  %v7259_v29 = vld [vmem:[%s9045_s29 + $0xd70] sm:$0xf0]  ;;  %v7134_v37 = vor.u32 %v8525_v27, %v7131_v24 }
 0x14f   : > { %4691 = vmatpush.bf16.msra.mxu3 %v7550_v2  ;;  %v8589_v30 = vld [vmem:[%s9045_s29 + $0xe64] sm:$0xf]  ;;  %v7387_v59 = vld [vmem:[%s9045_s29 + $0xe70] sm:$0xf0]  ;;  %v7262_v42 = vor.u32 %v8557_v25, %v7259_v29 }
 0x150   : > { %v8621_v33 = vld [vmem:[%s9045_s29 + $0xf64] sm:$0xf]  ;;  %v7515_v34 = vld [vmem:[%s9045_s29 + $0xf70] sm:$0xf0]  ;;  %4650 = vmatpush.bf16.msra.mxu0 %v7150_v18  ;;  %v7390_v45 = vor.u32 %v8589_v30, %v7387_v59  ;;  %v9850_v18 = vadd.f32 %v4418_v8, %v4405_v6 }
 0x151   : > { %4664 = vmatpush.bf16.msra.mxu1 %v7278_v61  ;;  %v8521_v49 = vld [vmem:[%s9045_s29 + $0xc44] sm:$0xf]  ;;  %v7115_v52 = vld [vmem:[%s9045_s29 + $0xc50] sm:$0xf0]  ;;  %v7518_v54 = vor.u32 %v8621_v33, %v7515_v34 }
 0x152   : > { %4678 = vmatpush.bf16.msra.mxu2 %v7406_v22  ;;  %v8553_v53 = vld [vmem:[%s9045_s29 + $0xd44] sm:$0xf]  ;;  %v7243_v2 = vld [vmem:[%s9045_s29 + $0xd50] sm:$0xf0]  ;;  %v7118_v16 = vor.u32 %v8521_v49, %v7115_v52 }
 0x153   : > { %4692 = vmatpush.bf16.msra.mxu3 %v7534_v26  ;;  %v8585_v3 = vld [vmem:[%s9045_s29 + $0xe44] sm:$0xf]  ;;  %v7371_v5 = vld [vmem:[%s9045_s29 + $0xe50] sm:$0xf0]  ;;  %v7246_v20 = vor.u32 %v8553_v53, %v7243_v2 }
 0x154   : > { %v8617_v12 = vld [vmem:[%s9045_s29 + $0xf44] sm:$0xf]  ;;  %v7499_v14 = vld [vmem:[%s9045_s29 + $0xf50] sm:$0xf0]  ;;  %4651 = vmatpush.bf16.msra.mxu0 %v7134_v37  ;;  %v7374_v61 = vor.u32 %v8585_v3, %v7371_v5 }
 0x155   : > { %4665 = vmatpush.bf16.msra.mxu1 %v7262_v42  ;;  %v8517_v22 = vld [vmem:[%s9045_s29 + $0xc24] sm:$0xf]  ;;  %v7099_v27 = vld [vmem:[%s9045_s29 + $0xc30] sm:$0xf0]  ;;  %v7502_v25 = vor.u32 %v8617_v12, %v7499_v14 }
 0x156   : > { %4679 = vmatpush.bf16.msra.mxu2 %v7390_v45  ;;  %v8549_v24 = vld [vmem:[%s9045_s29 + $0xd24] sm:$0xf]  ;;  %v7227_v26 = vld [vmem:[%s9045_s29 + $0xd30] sm:$0xf0]  ;;  %v7102_v33 = vor.u32 %v8517_v22, %v7099_v27 }
 0x157   : > { %4693 = vmatpush.bf16.msra.mxu3 %v7518_v54  ;;  %v8581_v28 = vld [vmem:[%s9045_s29 + $0xe24] sm:$0xf]  ;;  %v7355_v29 = vld [vmem:[%s9045_s29 + $0xe30] sm:$0xf0]  ;;  %v7230_v42 = vor.u32 %v8549_v24, %v7227_v26 }
 0x158   : > { %v8613_v30 = vld [vmem:[%s9045_s29 + $0xf24] sm:$0xf]  ;;  %v7483_v59 = vld [vmem:[%s9045_s29 + $0xf30] sm:$0xf0]  ;;  %4652 = vmatpush.bf16.msra.mxu0 %v7118_v16  ;;  %v7358_v45 = vor.u32 %v8581_v28, %v7355_v29 }
 0x159   : > { %v8513_v34 = vld [vmem:[%s9045_s29 + $0xc04] sm:$0xf]  ;;  %v7083_v37 = vld [vmem:[%s9045_s29 + $0xc10] sm:$0xf0]  ;;  %4666 = vmatpush.bf16.msra.mxu1 %v7246_v20  ;;  %v7486_v54 = vor.u32 %v8613_v30, %v7483_v59 }
 0x15a   : > { %4680 = vmatpush.bf16.msra.mxu2 %v7374_v61  ;;  %v8545_v49 = vld [vmem:[%s9045_s29 + $0xd04] sm:$0xf]  ;;  %v7211_v52 = vld [vmem:[%s9045_s29 + $0xd10] sm:$0xf0]  ;;  %v7086_v12 = vor.u32 %v8513_v34, %v7083_v37 }
 0x15b   : > { %v8577_v53 = vld [vmem:[%s9045_s29 + $0xe04] sm:$0xf]  ;;  %4694 = vmatpush.bf16.msra.mxu3 %v7502_v25  ;;  %v7339_v63 = vld [vmem:[%s9045_s29 + $0xe10] sm:$0xf0]  ;;  %v7214_v61 = vor.u32 %v8545_v49, %v7211_v52  ;;  %v9882_v49 = vpop.f32.mrf.mxu0 }
 0x15c   : > { %v8609_v2 = vld [vmem:[%s9045_s29 + $0xf04] sm:$0xf]  ;;  %v7467_v3 = vld [vmem:[%s9045_s29 + $0xf10] sm:$0xf0]  ;;  %4653 = vmatpush.bf16.msra.mxu0 %v7102_v33  ;;  %v7342_v22 = vor.u32 %v8577_v53, %v7339_v63 }
 0x15d   : > { %v8669_v5 = vld [vmem:[%s9045_s29 + $0x10e4] sm:$0xf]  ;;  %v7707_v6 = vld [vmem:[%s9045_s29 + $0x10f0] sm:$0xf0]  ;;  %4667 = vmatpush.bf16.msra.mxu1 %v7230_v42  ;;  %v7470_v25 = vor.u32 %v8609_v2, %v7467_v3 }
 0x15e   : > { %v8701_v8 = vld [vmem:[%s9045_s29 + $0x11e4] sm:$0xf]  ;;  %v7835_v14 = vld [vmem:[%s9045_s29 + $0x11f0] sm:$0xf0]  ;;  %4681 = vmatpush.bf16.msra.mxu2 %v7358_v45  ;;  %v7710_v26 = vor.u32 %v8669_v5, %v7707_v6 }
 0x15f   : > { %v8733_v16 = vld [vmem:[%s9045_s29 + $0x12e4] sm:$0xf]  ;;  %v7963_v20 = vld [vmem:[%s9045_s29 + $0x12f0] sm:$0xf0]  ;;  %4695 = vmatpush.bf16.msra.mxu3 %v7486_v54  ;;  %v7838_v28 = vor.u32 %v8701_v8, %v7835_v14  ;;  %v9886_v54 = vpop.f32.mrf.mxu1 }
 0x160   : > { %v8765_v27 = vld [vmem:[%s9045_s29 + $0x13e4] sm:$0xf]  ;;  %v8091_v24 = vld [vmem:[%s9045_s29 + $0x13f0] sm:$0xf0]  ;;  %v7966_v29 = vor.u32 %v8733_v16, %v7963_v20  ;;  %4654 = vmatpush.bf16.msra.mxu0 %v7086_v12 }
 0x161   : > { %v8665_v30 = vld [vmem:[%s9045_s29 + $0x10c4] sm:$0xf]  ;;  %v7691_v59 = vld [vmem:[%s9045_s29 + $0x10d0] sm:$0xf0]  ;;  %v8094_v34 = vor.u32 %v8765_v27, %v8091_v24  ;;  %4668 = vmatpush.bf16.msra.mxu1 %v7214_v61 }
 0x162   : > { %v8697_v33 = vld [vmem:[%s9045_s29 + $0x11c4] sm:$0xf]  ;;  %v7819_v37 = vld [vmem:[%s9045_s29 + $0x11d0] sm:$0xf0]  ;;  %4682 = vmatpush.bf16.msra.mxu2 %v7342_v22  ;;  %v7694_v63 = vor.u32 %v8665_v30, %v7691_v59  ;;  %v9903_v30 = vpop.f32.mrf.mxu2 }
 0x163   : > { %v8729_v42 = vld [vmem:[%s9045_s29 + $0x12c4] sm:$0xf]  ;;  %v7947_v45 = vld [vmem:[%s9045_s29 + $0x12d0] sm:$0xf0]  ;;  %4696 = vmatpush.bf16.msra.mxu3 %v7470_v25  ;;  %v7822_v2 = vor.u32 %v8697_v33, %v7819_v37  ;;  %4655 = vmatmul.bf16.vlgmr.msra.gmra.mxu0 %v9458_v32 }
 0x164   : > { %v8761_v52 = vld [vmem:[%s9045_s29 + $0x13c4] sm:$0xf]  ;;  %v8075_v53 = vld [vmem:[%s9045_s29 + $0x13d0] sm:$0xf0]  ;;  %4703 = vmatpush.bf16.msrb.mxu0 %v7710_v26  ;;  %v7950_v3 = vor.u32 %v8729_v42, %v7947_v45  ;;  %4669 = vmatmul.bf16.vlgmr.msra.gmra.mxu1 %v9465_v41  ;;  %v9908_v42 = vpop.f32.mrf.mxu3  ;;  %v4432_v45 = vpop.f32.mrf.mxu0 }
 0x165   : > { %4717 = vmatpush.bf16.msrb.mxu1 %v7838_v28  ;;  %v8661_v5 = vld [vmem:[%s9045_s29 + $0x10a4] sm:$0xf]  ;;  %v7675_v6 = vld [vmem:[%s9045_s29 + $0x10b0] sm:$0xf0]  ;;  %v8078_v12 = vor.u32 %v8761_v52, %v8075_v53  ;;  %4683 = vmatmul.bf16.vlgmr.msra.gmra.mxu2 %v9463_v38 }
 0x166   : > { %4731 = vmatpush.bf16.msrb.mxu2 %v7966_v29  ;;  %v8693_v8 = vld [vmem:[%s9045_s29 + $0x11a4] sm:$0xf]  ;;  %v7803_v14 = vld [vmem:[%s9045_s29 + $0x11b0] sm:$0xf0]  ;;  %4697 = vmatmul.bf16.vlgmr.msra.gmra.mxu3 %v9469_v46  ;;  %v7678_v27 = vor.u32 %v8661_v5, %v7675_v6 }
 0x167   : > { %4745 = vmatpush.bf16.msrb.mxu3 %v8094_v34  ;;  %v8725_v16 = vld [vmem:[%s9045_s29 + $0x12a4] sm:$0xf]  ;;  %v7931_v20 = vld [vmem:[%s9045_s29 + $0x12b0] sm:$0xf0]  ;;  %v7806_v24 = vor.u32 %v8693_v8, %v7803_v14 }
 0x168   : > { %v8757_v61 = vld [vmem:[%s9045_s29 + $0x13a4] sm:$0xf]  ;;  %v8059_v22 = vld [vmem:[%s9045_s29 + $0x13b0] sm:$0xf0]  ;;  %4704 = vmatpush.bf16.msrb.mxu0 %v7694_v63  ;;  %v7934_v25 = vor.u32 %v8725_v16, %v7931_v20  ;;  %v4433_v63 = vadd.f32 %v4432_v45, %v9850_v18 }
 0x169   : > { %4718 = vmatpush.bf16.msrb.mxu1 %v7822_v2  ;;  %v8657_v26 = vld [vmem:[%s9045_s29 + $0x1084] sm:$0xf]  ;;  %v7659_v28 = vld [vmem:[%s9045_s29 + $0x1090] sm:$0xf0]  ;;  %v8062_v59 = vor.u32 %v8757_v61, %v8059_v22 }
 0x16a   : > { %4732 = vmatpush.bf16.msrb.mxu2 %v7950_v3  ;;  %v8689_v29 = vld [vmem:[%s9045_s29 + $0x1184] sm:$0xf]  ;;  %v7787_v33 = vld [vmem:[%s9045_s29 + $0x1190] sm:$0xf0]  ;;  %v7662_v2 = vor.u32 %v8657_v26, %v7659_v28  ;;  %v4446_v3 = vpop.f32.mrf.mxu1 }
 0x16b   : > { %4746 = vmatpush.bf16.msrb.mxu3 %v8078_v12  ;;  %v8721_v34 = vld [vmem:[%s9045_s29 + $0x1284] sm:$0xf]  ;;  %v7915_v37 = vld [vmem:[%s9045_s29 + $0x1290] sm:$0xf0]  ;;  %v7790_v5 = vor.u32 %v8689_v29, %v7787_v33  ;;  %v4447_v20 = vadd.f32 %v4446_v3, %v4433_v63 }
 0x16c   : > { %v8753_v52 = vld [vmem:[%s9045_s29 + $0x1384] sm:$0xf]  ;;  %v8043_v53 = vld [vmem:[%s9045_s29 + $0x1390] sm:$0xf0]  ;;  %4705 = vmatpush.bf16.msrb.mxu0 %v7678_v27  ;;  %v7918_v6 = vor.u32 %v8721_v34, %v7915_v37  ;;  %v4460_v37 = vpop.f32.mrf.mxu2 }
 0x16d   : > { %4719 = vmatpush.bf16.msrb.mxu1 %v7806_v24  ;;  %v8653_v8 = vld [vmem:[%s9045_s29 + $0x1064] sm:$0xf]  ;;  %v7643_v12 = vld [vmem:[%s9045_s29 + $0x1070] sm:$0xf0]  ;;  %v8046_v16 = vor.u32 %v8753_v52, %v8043_v53  ;;  %v4461_v63 = vadd.f32 %v4460_v37, %v4447_v20 }
 0x16e   : > { %4733 = vmatpush.bf16.msrb.mxu2 %v7934_v25  ;;  %v8685_v14 = vld [vmem:[%s9045_s29 + $0x1164] sm:$0xf]  ;;  %v7771_v61 = vld [vmem:[%s9045_s29 + $0x1170] sm:$0xf0]  ;;  %v7646_v25 = vor.u32 %v8653_v8, %v7643_v12 }
 0x16f   : > { %4747 = vmatpush.bf16.msrb.mxu3 %v8062_v59  ;;  %v8717_v22 = vld [vmem:[%s9045_s29 + $0x1264] sm:$0xf]  ;;  %v7899_v18 = vld [vmem:[%s9045_s29 + $0x1270] sm:$0xf0]  ;;  %v7774_v26 = vor.u32 %v8685_v14, %v7771_v61 }
 0x170   : > { %v8749_v27 = vld [vmem:[%s9045_s29 + $0x1364] sm:$0xf]  ;;  %v8027_v24 = vld [vmem:[%s9045_s29 + $0x1370] sm:$0xf0]  ;;  %4706 = vmatpush.bf16.msrb.mxu0 %v7662_v2  ;;  %v7902_v28 = vor.u32 %v8717_v22, %v7899_v18  ;;  %v4474_v2 = vpop.f32.mrf.mxu3 }
 0x171   : > { %4720 = vmatpush.bf16.msrb.mxu1 %v7790_v5  ;;  %v8649_v29 = vld [vmem:[%s9045_s29 + $0x1044] sm:$0xf]  ;;  %v7627_v59 = vld [vmem:[%s9045_s29 + $0x1050] sm:$0xf0]  ;;  %v8030_v34 = vor.u32 %v8749_v27, %v8027_v24  ;;  %v9929_v8 = vadd.f32 %v4474_v2, %v4461_v63 }
 0x172   : > { %4734 = vmatpush.bf16.msrb.mxu2 %v7918_v6  ;;  %v8681_v33 = vld [vmem:[%s9045_s29 + $0x1144] sm:$0xf]  ;;  %v7755_v45 = vld [vmem:[%s9045_s29 + $0x1150] sm:$0xf0]  ;;  %v7630_v6 = vor.u32 %v8649_v29, %v7627_v59 }
 0x173   : > { %4748 = vmatpush.bf16.msrb.mxu3 %v8046_v16  ;;  %v8713_v52 = vld [vmem:[%s9045_s29 + $0x1244] sm:$0xf]  ;;  %v7883_v53 = vld [vmem:[%s9045_s29 + $0x1250] sm:$0xf0]  ;;  %10847 = vst [vmem:[#allocation21_spill] sm:$0xff] %v9929_v8  ;;  %v7758_v12 = vor.u32 %v8681_v33, %v7755_v45 }
 0x174   : > { %v8745_v3 = vld [vmem:[%s9045_s29 + $0x1344] sm:$0xf]  ;;  %v8011_v5 = vld [vmem:[%s9045_s29 + $0x1350] sm:$0xf0]  ;;  %4707 = vmatpush.bf16.msrb.mxu0 %v7646_v25  ;;  %v7886_v14 = vor.u32 %v8713_v52, %v7883_v53  ;;  %v5777_v8 = vld [vmem:[%s9045_s29 + $0x1c8] sm:$0xf] }
 0x175   : > { %4721 = vmatpush.bf16.msrb.mxu1 %v7774_v26  ;;  %v8645_v16 = vld [vmem:[%s9045_s29 + $0x1024] sm:$0xf]  ;;  %v7611_v20 = vld [vmem:[%s9045_s29 + $0x1030] sm:$0xf0]  ;;  %v8014_v22 = vor.u32 %v8745_v3, %v8011_v5  ;;  %v5665_v5 = vld [vmem:[%s9045_s29 + $0xe8] sm:$0xf] }
 0x176   : > { %4735 = vmatpush.bf16.msrb.mxu2 %v7902_v28  ;;  %v8677_v61 = vld [vmem:[%s9045_s29 + $0x1124] sm:$0xf]  ;;  %v7739_v18 = vld [vmem:[%s9045_s29 + $0x1130] sm:$0xf0]  ;;  %v7614_v28 = vor.u32 %v8645_v16, %v7611_v20  ;;  %v5793_v16 = vld [vmem:[%s9045_s29 + $0x1e8] sm:$0xf] }
 0x177   : > { %4749 = vmatpush.bf16.msrb.mxu3 %v8030_v34  ;;  %v8709_v27 = vld [vmem:[%s9045_s29 + $0x1224] sm:$0xf]  ;;  %v7867_v24 = vld [vmem:[%s9045_s29 + $0x1230] sm:$0xf0]  ;;  %v7742_v33 = vor.u32 %v8677_v61, %v7739_v18  ;;  %v5921_v20 = vld [vmem:[%s9045_s29 + $0x2e8] sm:$0xf] }
 0x178   : > { %v8741_v25 = vld [vmem:[%s9045_s29 + $0x1324] sm:$0xf]  ;;  %v7995_v26 = vld [vmem:[%s9045_s29 + $0x1330] sm:$0xf0]  ;;  %4708 = vmatpush.bf16.msrb.mxu0 %v7630_v6  ;;  %v7870_v34 = vor.u32 %v8709_v27, %v7867_v24  ;;  %v8160_v6 = vld [vmem:[%s9045_s29 + $0xf4] sm:$0xf0] }
 0x179   : > { %v8641_v29 = vld [vmem:[%s9045_s29 + $0x1004] sm:$0xf]  ;;  %v7595_v59 = vld [vmem:[%s9045_s29 + $0x1010] sm:$0xf0]  ;;  %4722 = vmatpush.bf16.msrb.mxu1 %v7758_v12  ;;  %v7998_v53 = vor.u32 %v8741_v25, %v7995_v26  ;;  %v8224_v61 = vld [vmem:[%s9045_s29 + $0x2f4] sm:$0xf0]  ;;  %v5666_v26 = vor.u32 %v8160_v6, %v5665_v5 }
 0x17a   : > { %4736 = vmatpush.bf16.msrb.mxu2 %v7886_v14  ;;  %v8673_v37 = vld [vmem:[%s9045_s29 + $0x1104] sm:$0xf]  ;;  %v7723_v45 = vld [vmem:[%s9045_s29 + $0x1110] sm:$0xf0]  ;;  %v7598_v12 = vor.u32 %v8641_v29, %v7595_v59  ;;  %v8192_v14 = vld [vmem:[%s9045_s29 + $0x1f4] sm:$0xf0]  ;;  %v5922_v29 = vor.u32 %v8224_v61, %v5921_v20 }
 0x17b   : > { %v8705_v52 = vld [vmem:[%s9045_s29 + $0x1204] sm:$0xf]  ;;  %4750 = vmatpush.bf16.msrb.mxu3 %v8014_v22  ;;  %v7851_v63 = vld [vmem:[%s9045_s29 + $0x1210] sm:$0xf0]  ;;  %v7726_v22 = vor.u32 %v8673_v37, %v7723_v45  ;;  %v6049_v27 = vld [vmem:[%s9045_s29 + $0x3e8] sm:$0xf] }
 0x17c   : > { %v8737_v2 = vld [vmem:[%s9045_s29 + $0x1304] sm:$0xf]  ;;  %v7979_v3 = vld [vmem:[%s9045_s29 + $0x1310] sm:$0xf0]  ;;  %4709 = vmatpush.bf16.msrb.mxu0 %v7614_v28  ;;  %v7854_v18 = vor.u32 %v8705_v52, %v7851_v63  ;;  %v8256_v24 = vld [vmem:[%s9045_s29 + $0x3f4] sm:$0xf0]  ;;  %v5794_v28 = vor.u32 %v8192_v14, %v5793_v16 }
 0x17d   : > { %4723 = vmatpush.bf16.msrb.mxu1 %v7742_v33  ;;  %v7982_v25 = vor.u32 %v8737_v2, %v7979_v3  ;;  %v5649_v59 = vld [vmem:[%s9045_s29 + $0xc8] sm:$0xf]  ;;  %v6050_v33 = vor.u32 %v8256_v24, %v6049_v27  ;;  %v8220_v45 = vld [vmem:[%s9045_s29 + $0x2d4] sm:$0xf0] }
 0x17e   : > { %4737 = vmatpush.bf16.msrb.mxu2 %v7870_v34  ;;  %v8188_v34 = vld [vmem:[%s9045_s29 + $0x1d4] sm:$0xf0]  ;;  %v5905_v37 = vld [vmem:[%s9045_s29 + $0x2c8] sm:$0xf]  ;;  %v5650_v63 = vor.u32 %v8156_v13, %v5649_v59 }
 0x17f   : > { %4751 = vmatpush.bf16.msrb.mxu3 %v7998_v53  ;;  %v6033_v52 = vld [vmem:[%s9045_s29 + $0x3c8] sm:$0xf]  ;;  %v8252_v53 = vld [vmem:[%s9045_s29 + $0x3d4] sm:$0xf0]  ;;  %v5778_v2 = vor.u32 %v8188_v34, %v5777_v8  ;;  %v5906_v3 = vor.u32 %v8220_v45, %v5905_v37 }
 0x180   : > { %4710 = vmatpush.bf16.msrb.mxu0 %v7598_v12  ;;  %v5633_v5 = vld [vmem:[%s9045_s29 + $0xa8] sm:$0xf]  ;;  %v8152_v6 = vld [vmem:[%s9045_s29 + $0xb4] sm:$0xf0]  ;;  %v6034_v12 = vor.u32 %v8252_v53, %v6033_v52 }
 0x181   : > { %4724 = vmatpush.bf16.msrb.mxu1 %v7726_v22  ;;  %v5761_v16 = vld [vmem:[%s9045_s29 + $0x1a8] sm:$0xf]  ;;  %v8184_v14 = vld [vmem:[%s9045_s29 + $0x1b4] sm:$0xf0]  ;;  %v5634_v22 = vor.u32 %v8152_v6, %v5633_v5 }
 0x182   : > { %4738 = vmatpush.bf16.msrb.mxu2 %v7854_v18  ;;  %v5889_v20 = vld [vmem:[%s9045_s29 + $0x2a8] sm:$0xf]  ;;  %v8216_v61 = vld [vmem:[%s9045_s29 + $0x2b4] sm:$0xf0]  ;;  %v5762_v18 = vor.u32 %v8184_v14, %v5761_v16 }
 0x183   : > { %4752 = vmatpush.bf16.msrb.mxu3 %v7982_v25  ;;  %4711 = vmatmul.bf16.vlgmr.msrb.gmra.mxu0 %v9558_v51  ;;  %v6017_v13 = vld [vmem:[%s9045_s29 + $0x3a8] sm:$0xf]  ;;  %v8248_v8 = vld [vmem:[%s9045_s29 + $0x3b4] sm:$0xf0]  ;;  %v5890_v27 = vor.u32 %v8216_v61, %v5889_v20 }
 0x184   : > { %4759 = vmatpush.bf16.msra.mxu0 %v5666_v26  ;;  %4725 = vmatmul.bf16.vlgmr.msrb.gmra.mxu1 %v9565_v56  ;;  %v5617_v24 = vld [vmem:[%s9045_s29 + $0x88] sm:$0xf]  ;;  %v8148_v25 = vld [vmem:[%s9045_s29 + $0x94] sm:$0xf0] }
 0x185   : > { %4773 = vmatpush.bf16.msra.mxu1 %v5794_v28  ;;  %4739 = vmatmul.bf16.vlgmr.msrb.gmra.mxu2 %v9563_v55  ;;  %v5745_v26 = vld [vmem:[%s9045_s29 + $0x188] sm:$0xf]  ;;  %v6018_v28 = vor.u32 %v8248_v8, %v6017_v13  ;;  %v8244_v37 = vld [vmem:[%s9045_s29 + $0x394] sm:$0xf0]  ;;  %v5618_v45 = vor.u32 %v8148_v25, %v5617_v24 }
 0x186   : > { %4787 = vmatpush.bf16.msra.mxu2 %v5922_v29  ;;  %4753 = vmatmul.bf16.vlgmr.msrb.gmra.mxu3 %v9569_v60  ;;  %v8180_v29 = vld [vmem:[%s9045_s29 + $0x194] sm:$0xf0]  ;;  %v5873_v59 = vld [vmem:[%s9045_s29 + $0x288] sm:$0xf] }
 0x187   : > { %4801 = vmatpush.bf16.msra.mxu3 %v6050_v33  ;;  %v8212_v33 = vld [vmem:[%s9045_s29 + $0x294] sm:$0xf0]  ;;  %v6001_v34 = vld [vmem:[%s9045_s29 + $0x388] sm:$0xf]  ;;  %v5746_v52 = vor.u32 %v8180_v29, %v5745_v26 }
 0x188   : > { %4760 = vmatpush.bf16.msra.mxu0 %v5650_v63  ;;  %v5874_v53 = vor.u32 %v8212_v33, %v5873_v59  ;;  %v5601_v63 = vld [vmem:[%s9045_s29 + $0x68] sm:$0xf]  ;;  %v6002_v5 = vor.u32 %v8244_v37, %v6001_v34  ;;  %v8176_v6 = vld [vmem:[%s9045_s29 + $0x174] sm:$0xf0] }
 0x189   : > { %4774 = vmatpush.bf16.msra.mxu1 %v5778_v2  ;;  %v8144_v2 = vld [vmem:[%s9045_s29 + $0x74] sm:$0xf0]  ;;  %v5857_v16 = vld [vmem:[%s9045_s29 + $0x268] sm:$0xf] }
 0x18a   : > { %4788 = vmatpush.bf16.msra.mxu2 %v5906_v3  ;;  %v5729_v3 = vld [vmem:[%s9045_s29 + $0x168] sm:$0xf]  ;;  %v8240_v20 = vld [vmem:[%s9045_s29 + $0x374] sm:$0xf0]  ;;  %v5602_v61 = vor.u32 %v8144_v2, %v5601_v63 }
 0x18b   : > { %4802 = vmatpush.bf16.msra.mxu3 %v6034_v12  ;;  %v8208_v12 = vld [vmem:[%s9045_s29 + $0x274] sm:$0xf0]  ;;  %v5985_v14 = vld [vmem:[%s9045_s29 + $0x368] sm:$0xf]  ;;  %v5730_v13 = vor.u32 %v8176_v6, %v5729_v3 }
 0x18c   : > { %4761 = vmatpush.bf16.msra.mxu0 %v5634_v22  ;;  %v5858_v8 = vor.u32 %v8208_v12, %v5857_v16  ;;  %v5585_v22 = vld [vmem:[%s9045_s29 + $0x48] sm:$0xf]  ;;  %v5986_v24 = vor.u32 %v8240_v20, %v5985_v14  ;;  %v8172_v25 = vld [vmem:[%s9045_s29 + $0x154] sm:$0xf0] }
 0x18d   : > { %4775 = vmatpush.bf16.msra.mxu1 %v5762_v18  ;;  %v8140_v18 = vld [vmem:[%s9045_s29 + $0x54] sm:$0xf0]  ;;  %v5841_v26 = vld [vmem:[%s9045_s29 + $0x248] sm:$0xf] }
 0x18e   : > { %4789 = vmatpush.bf16.msra.mxu2 %v5890_v27  ;;  %v5713_v27 = vld [vmem:[%s9045_s29 + $0x148] sm:$0xf]  ;;  %v8236_v59 = vld [vmem:[%s9045_s29 + $0x354] sm:$0xf0]  ;;  %v5586_v33 = vor.u32 %v8140_v18, %v5585_v22 }
 0x18f   : > { %4803 = vmatpush.bf16.msra.mxu3 %v6018_v28  ;;  %v8204_v28 = vld [vmem:[%s9045_s29 + $0x254] sm:$0xf0]  ;;  %v5969_v29 = vld [vmem:[%s9045_s29 + $0x348] sm:$0xf]  ;;  %v5714_v34 = vor.u32 %v8172_v25, %v5713_v27 }
 0x190   : > { %4762 = vmatpush.bf16.msra.mxu0 %v5618_v45  ;;  %v5842_v37 = vor.u32 %v8204_v28, %v5841_v26  ;;  %v5569_v45 = vld [vmem:[%s9045_s29 + $0x28] sm:$0xf]  ;;  %v5970_v63 = vor.u32 %v8236_v59, %v5969_v29  ;;  %v8168_v2 = vld [vmem:[%s9045_s29 + $0x134] sm:$0xf0] }
 0x191   : > { %4776 = vmatpush.bf16.msra.mxu1 %v5746_v52  ;;  %v8136_v52 = vld [vmem:[%s9045_s29 + $0x34] sm:$0xf0]  ;;  %v5825_v3 = vld [vmem:[%s9045_s29 + $0x228] sm:$0xf] }
 0x192   : > { %4790 = vmatpush.bf16.msra.mxu2 %v5874_v53  ;;  %v5697_v53 = vld [vmem:[%s9045_s29 + $0x128] sm:$0xf]  ;;  %v8232_v16 = vld [vmem:[%s9045_s29 + $0x334] sm:$0xf0]  ;;  %v5570_v12 = vor.u32 %v8136_v52, %v5569_v45 }
 0x193   : > { %4804 = vmatpush.bf16.msra.mxu3 %v6002_v5  ;;  %v8200_v5 = vld [vmem:[%s9045_s29 + $0x234] sm:$0xf0]  ;;  %v5953_v6 = vld [vmem:[%s9045_s29 + $0x328] sm:$0xf] }
 0x194   : > { %4763 = vmatpush.bf16.msra.mxu0 %v5602_v61  ;;  %v5553_v14 = vld [vmem:[%s9045_s29 + $0x8] sm:$0xf]  ;;  %v8132_v20 = vld [vmem:[%s9045_s29 + $0x14] sm:$0xf0]  ;;  %v5698_v61 = vor.u32 %v8168_v2, %v5697_v53  ;;  %v5954_v27 = vor.u32 %v8232_v16, %v5953_v6 }
 0x195   : > { %4777 = vmatpush.bf16.msra.mxu1 %v5730_v13  ;;  %v5826_v13 = vor.u32 %v8200_v5, %v5825_v3  ;;  %v8164_v22 = vld [vmem:[%s9045_s29 + $0x114] sm:$0xf0]  ;;  %v5809_v18 = vld [vmem:[%s9045_s29 + $0x208] sm:$0xf] }
 0x196   : > { %4791 = vmatpush.bf16.msra.mxu2 %v5858_v8  ;;  %v5681_v8 = vld [vmem:[%s9045_s29 + $0x108] sm:$0xf]  ;;  %v8228_v26 = vld [vmem:[%s9045_s29 + $0x314] sm:$0xf0] }
 0x197   : > { %4805 = vmatpush.bf16.msra.mxu3 %v5986_v24  ;;  %v8196_v24 = vld [vmem:[%s9045_s29 + $0x214] sm:$0xf0]  ;;  %v5937_v25 = vld [vmem:[%s9045_s29 + $0x308] sm:$0xf]  ;;  %v5682_v52 = vor.u32 %v8164_v22, %v5681_v8 }
 0x198   : > { %4764 = vmatpush.bf16.msra.mxu0 %v5586_v33  ;;  %v6177_v28 = vld [vmem:[%s9045_s29 + $0x4e8] sm:$0xf]  ;;  %v8288_v29 = vld [vmem:[%s9045_s29 + $0x4f4] sm:$0xf0]  ;;  %v5554_v33 = vor.u32 %v8132_v20, %v5553_v14  ;;  %v5810_v53 = vor.u32 %v8196_v24, %v5809_v18  ;;  %v5938_v3 = vor.u32 %v8228_v26, %v5937_v25 }
 0x199   : > { %4778 = vmatpush.bf16.msra.mxu1 %v5714_v34  ;;  %v6305_v59 = vld [vmem:[%s9045_s29 + $0x5e8] sm:$0xf]  ;;  %v8320_v34 = vld [vmem:[%s9045_s29 + $0x5f4] sm:$0xf0]  ;;  %v6178_v5 = vor.u32 %v8288_v29, %v6177_v28 }
 0x19a   : > { %4792 = vmatpush.bf16.msra.mxu2 %v5842_v37  ;;  %v6433_v37 = vld [vmem:[%s9045_s29 + $0x6e8] sm:$0xf]  ;;  %v8352_v45 = vld [vmem:[%s9045_s29 + $0x6f4] sm:$0xf0]  ;;  %v6306_v6 = vor.u32 %v8320_v34, %v6305_v59 }
 0x19b   : > { %4806 = vmatpush.bf16.msra.mxu3 %v5970_v63  ;;  %v6561_v63 = vld [vmem:[%s9045_s29 + $0x7e8] sm:$0xf]  ;;  %v8384_v2 = vld [vmem:[%s9045_s29 + $0x7f4] sm:$0xf0]  ;;  %v6434_v16 = vor.u32 %v8352_v45, %v6433_v37 }
 0x19c   : > { %4765 = vmatpush.bf16.msra.mxu0 %v5570_v12  ;;  %v6161_v12 = vld [vmem:[%s9045_s29 + $0x4c8] sm:$0xf]  ;;  %v8284_v14 = vld [vmem:[%s9045_s29 + $0x4d4] sm:$0xf0] }
 0x19d   : > { %4779 = vmatpush.bf16.msra.mxu1 %v5698_v61  ;;  %v6289_v20 = vld [vmem:[%s9045_s29 + $0x5c8] sm:$0xf]  ;;  %v6562_v61 = vor.u32 %v8384_v2, %v6561_v63  ;;  %v8348_v22 = vld [vmem:[%s9045_s29 + $0x6d4] sm:$0xf0]  ;;  %v6162_v24 = vor.u32 %v8284_v14, %v6161_v12 }
 0x19e   : > { %4793 = vmatpush.bf16.msra.mxu2 %v5826_v13  ;;  %v8316_v13 = vld [vmem:[%s9045_s29 + $0x5d4] sm:$0xf0]  ;;  %v6417_v8 = vld [vmem:[%s9045_s29 + $0x6c8] sm:$0xf] }
 0x19f   : > { %4807 = vmatpush.bf16.msra.mxu3 %v5954_v27  ;;  %v6545_v18 = vld [vmem:[%s9045_s29 + $0x7c8] sm:$0xf]  ;;  %v8380_v27 = vld [vmem:[%s9045_s29 + $0x7d4] sm:$0xf0]  ;;  %v6290_v25 = vor.u32 %v8316_v13, %v6289_v20  ;;  %v6418_v26 = vor.u32 %v8348_v22, %v6417_v8 }
 0x1a0   : > { %4766 = vmatpush.bf16.msra.mxu0 %v5554_v33  ;;  %v6145_v28 = vld [vmem:[%s9045_s29 + $0x4a8] sm:$0xf]  ;;  %v8280_v29 = vld [vmem:[%s9045_s29 + $0x4b4] sm:$0xf0]  ;;  %v6546_v33 = vor.u32 %v8380_v27, %v6545_v18 }
 0x1a1   : > { %4780 = vmatpush.bf16.msra.mxu1 %v5682_v52  ;;  %v6273_v59 = vld [vmem:[%s9045_s29 + $0x5a8] sm:$0xf]  ;;  %v8312_v34 = vld [vmem:[%s9045_s29 + $0x5b4] sm:$0xf0]  ;;  %v6146_v63 = vor.u32 %v8280_v29, %v6145_v28 }
 0x1a2   : > { %4794 = vmatpush.bf16.msra.mxu2 %v5810_v53  ;;  %v6401_v37 = vld [vmem:[%s9045_s29 + $0x6a8] sm:$0xf]  ;;  %v8344_v45 = vld [vmem:[%s9045_s29 + $0x6b4] sm:$0xf0]  ;;  %v6274_v2 = vor.u32 %v8312_v34, %v6273_v59 }
 0x1a3   : > { %4808 = vmatpush.bf16.msra.mxu3 %v5938_v3  ;;  %4767 = vmatmul.bf16.vlgmr.msra.gmra.mxu0 %v9150_v58  ;;  %v6529_v52 = vld [vmem:[%s9045_s29 + $0x7a8] sm:$0xf]  ;;  %v8376_v53 = vld [vmem:[%s9045_s29 + $0x7b4] sm:$0xf0]  ;;  %v6402_v3 = vor.u32 %v8344_v45, %v6401_v37 }
 0x1a4   : > { %4815 = vmatpush.bf16.msrb.mxu0 %v6178_v5  ;;  %4781 = vmatmul.bf16.vlgmr.msra.gmra.mxu1 %v9174_v10  ;;  %v6129_v5 = vld [vmem:[%s9045_s29 + $0x488] sm:$0xf]  ;;  %v6530_v12 = vor.u32 %v8376_v53, %v6529_v52  ;;  %v8308_v14 = vld [vmem:[%s9045_s29 + $0x594] sm:$0xf0] }
 0x1a5   : > { %4829 = vmatpush.bf16.msrb.mxu1 %v6306_v6  ;;  %4795 = vmatmul.bf16.vlgmr.msra.gmra.mxu2 %v9158_v1  ;;  %v8276_v6 = vld [vmem:[%s9045_s29 + $0x494] sm:$0xf0]  ;;  %v6385_v20 = vld [vmem:[%s9045_s29 + $0x688] sm:$0xf] }
 0x1a6   : > { %4843 = vmatpush.bf16.msrb.mxu2 %v6434_v16  ;;  %4809 = vmatmul.bf16.vlgmr.msra.gmra.mxu3 %v9182_v17  ;;  %v6257_v16 = vld [vmem:[%s9045_s29 + $0x588] sm:$0xf]  ;;  %v8372_v8 = vld [vmem:[%s9045_s29 + $0x794] sm:$0xf0]  ;;  %v6130_v22 = vor.u32 %v8276_v6, %v6129_v5 }
 0x1a7   : > { %4857 = vmatpush.bf16.msrb.mxu3 %v6562_v61  ;;  %v8340_v61 = vld [vmem:[%s9045_s29 + $0x694] sm:$0xf0]  ;;  %v6513_v13 = vld [vmem:[%s9045_s29 + $0x788] sm:$0xf]  ;;  %v6258_v18 = vor.u32 %v8308_v14, %v6257_v16  ;;  %v10065_v14 = vpop.f32.mrf.mxu0 }
 0x1a8   : > { %4816 = vmatpush.bf16.msrb.mxu0 %v6162_v24  ;;  %v6386_v27 = vor.u32 %v8340_v61, %v6385_v20  ;;  %v6113_v24 = vld [vmem:[%s9045_s29 + $0x468] sm:$0xf]  ;;  %v6514_v28 = vor.u32 %v8372_v8, %v6513_v13  ;;  %v8304_v29 = vld [vmem:[%s9045_s29 + $0x574] sm:$0xf0]  ;;  %v10069_v13 = vpop.f32.mrf.mxu1 }
 0x1a9   : > { %4830 = vmatpush.bf16.msrb.mxu1 %v6290_v25  ;;  %v8272_v25 = vld [vmem:[%s9045_s29 + $0x474] sm:$0xf0]  ;;  %v6369_v59 = vld [vmem:[%s9045_s29 + $0x668] sm:$0xf] }
 0x1aa   : > { %4844 = vmatpush.bf16.msrb.mxu2 %v6418_v26  ;;  %v6241_v26 = vld [vmem:[%s9045_s29 + $0x568] sm:$0xf]  ;;  %v8368_v37 = vld [vmem:[%s9045_s29 + $0x774] sm:$0xf0]  ;;  %v6114_v45 = vor.u32 %v8272_v25, %v6113_v24 }
 0x1ab   : > { %4858 = vmatpush.bf16.msrb.mxu3 %v6546_v33  ;;  %v8336_v33 = vld [vmem:[%s9045_s29 + $0x674] sm:$0xf0]  ;;  %v6497_v34 = vld [vmem:[%s9045_s29 + $0x768] sm:$0xf]  ;;  %v6242_v52 = vor.u32 %v8304_v29, %v6241_v26 }
 0x1ac   : > { %4817 = vmatpush.bf16.msrb.mxu0 %v6146_v63  ;;  %v6370_v53 = vor.u32 %v8336_v33, %v6369_v59  ;;  %v6097_v63 = vld [vmem:[%s9045_s29 + $0x448] sm:$0xf]  ;;  %v6498_v5 = vor.u32 %v8368_v37, %v6497_v34  ;;  %v8300_v6 = vld [vmem:[%s9045_s29 + $0x554] sm:$0xf0] }
 0x1ad   : > { %4831 = vmatpush.bf16.msrb.mxu1 %v6274_v2  ;;  %v8268_v2 = vld [vmem:[%s9045_s29 + $0x454] sm:$0xf0]  ;;  %v6353_v16 = vld [vmem:[%s9045_s29 + $0x648] sm:$0xf] }
 0x1ae   : > { %4845 = vmatpush.bf16.msrb.mxu2 %v6402_v3  ;;  %v6225_v3 = vld [vmem:[%s9045_s29 + $0x548] sm:$0xf]  ;;  %v8364_v61 = vld [vmem:[%s9045_s29 + $0x754] sm:$0xf0]  ;;  %v6098_v8 = vor.u32 %v8268_v2, %v6097_v63 }
 0x1af   : > { %4859 = vmatpush.bf16.msrb.mxu3 %v6530_v12  ;;  %v8332_v12 = vld [vmem:[%s9045_s29 + $0x654] sm:$0xf0]  ;;  %v6481_v20 = vld [vmem:[%s9045_s29 + $0x748] sm:$0xf] }
 0x1b0   : > { %4818 = vmatpush.bf16.msrb.mxu0 %v6130_v22  ;;  %v6226_v22 = vor.u32 %v8300_v6, %v6225_v3  ;;  %v8264_v24 = vld [vmem:[%s9045_s29 + $0x434] sm:$0xf0]  ;;  %v6209_v25 = vld [vmem:[%s9045_s29 + $0x528] sm:$0xf]  ;;  %v6482_v26 = vor.u32 %v8364_v61, %v6481_v20  ;;  %v10084_v6 = vpop.f32.mrf.mxu2 }
 0x1b1   : > { %4832 = vmatpush.bf16.msrb.mxu1 %v6258_v18  ;;  %v6354_v18 = vor.u32 %v8332_v12, %v6353_v16  ;;  %v6337_v29 = vld [vmem:[%s9045_s29 + $0x628] sm:$0xf]  ;;  %v8328_v59 = vld [vmem:[%s9045_s29 + $0x634] sm:$0xf0]  ;;  %10848 = vst [vmem:[#allocation22_spill] sm:$0xff] %v10084_v6 }
 0x1b2   : > { %4846 = vmatpush.bf16.msrb.mxu2 %v6386_v27  ;;  %v6081_v27 = vld [vmem:[%s9045_s29 + $0x428] sm:$0xf]  ;;  %v8360_v34 = vld [vmem:[%s9045_s29 + $0x734] sm:$0xf0]  ;;  %v6338_v63 = vor.u32 %v8328_v59, %v6337_v29 }
 0x1b3   : > { %4860 = vmatpush.bf16.msrb.mxu3 %v6514_v28  ;;  %v8296_v28 = vld [vmem:[%s9045_s29 + $0x534] sm:$0xf0]  ;;  %v6465_v33 = vld [vmem:[%s9045_s29 + $0x728] sm:$0xf]  ;;  %v6082_v37 = vor.u32 %v8264_v24, %v6081_v27 }
 0x1b4   : > { %4819 = vmatpush.bf16.msrb.mxu0 %v6114_v45  ;;  %v6065_v45 = vld [vmem:[%s9045_s29 + $0x408] sm:$0xf]  ;;  %v8292_v3 = vld [vmem:[%s9045_s29 + $0x514] sm:$0xf0]  ;;  %v6466_v16 = vor.u32 %v8360_v34, %v6465_v33 }
 0x1b5   : > { %4833 = vmatpush.bf16.msrb.mxu1 %v6242_v52  ;;  %v8260_v52 = vld [vmem:[%s9045_s29 + $0x414] sm:$0xf0]  ;;  %v6193_v2 = vld [vmem:[%s9045_s29 + $0x508] sm:$0xf] }
 0x1b6   : > { %4847 = vmatpush.bf16.msrb.mxu2 %v6370_v53  ;;  %v6210_v53 = vor.u32 %v8296_v28, %v6209_v25  ;;  %v8324_v12 = vld [vmem:[%s9045_s29 + $0x614] sm:$0xf0]  ;;  %v6449_v20 = vld [vmem:[%s9045_s29 + $0x708] sm:$0xf]  ;;  %v10096_v25 = vpop.f32.mrf.mxu1  ;;  %v6066_v28 = vor.u32 %v8260_v52, %v6065_v45  ;;  %v6194_v33 = vor.u32 %v8292_v3, %v6193_v2 }
 0x1b7   : > { %4861 = vmatpush.bf16.msrb.mxu3 %v6498_v5  ;;  %v6321_v5 = vld [vmem:[%s9045_s29 + $0x608] sm:$0xf]  ;;  %v8356_v61 = vld [vmem:[%s9045_s29 + $0x714] sm:$0xf0] }
 0x1b8   : > { %4820 = vmatpush.bf16.msrb.mxu0 %v6098_v8  ;;  %v10089_v8 = vpop.f32.mrf.mxu3  ;;  %v8416_v27 = vld [vmem:[%s9045_s29 + $0x8f4] sm:$0xf0]  ;;  %v6817_v24 = vld [vmem:[%s9045_s29 + $0x9e8] sm:$0xf]  ;;  %v6322_v34 = vor.u32 %v8324_v12, %v6321_v5 }
 0x1b9   : > { %4834 = vmatpush.bf16.msrb.mxu1 %v6226_v22  ;;  %10849 = vst [vmem:[#allocation23_spill] sm:$0xff] %v10089_v8  ;;  %v10091_v22 = vpop.f32.mrf.mxu0  ;;  %v6945_v29 = vld [vmem:[%s9045_s29 + $0xae8] sm:$0xf]  ;;  %v8480_v59 = vld [vmem:[%s9045_s29 + $0xaf4] sm:$0xf0] }
 0x1ba   : > { %4848 = vmatpush.bf16.msrb.mxu2 %v6354_v18  ;;  %v6689_v18 = vld [vmem:[%s9045_s29 + $0x8e8] sm:$0xf]  ;;  %v8512_v10 = vld [vmem:[%s9045_s29 + $0xbf4] sm:$0xf0]  ;;  %v6946_v52 = vor.u32 %v8480_v59, %v6945_v29 }
 0x1bb   : > { %4862 = vmatpush.bf16.msrb.mxu3 %v6482_v26  ;;  %v8448_v26 = vld [vmem:[%s9045_s29 + $0x9f4] sm:$0xf0]  ;;  %v7073_v17 = vld [vmem:[%s9045_s29 + $0xbe8] sm:$0xf]  ;;  %v6690_v1 = vor.u32 %v8416_v27, %v6689_v18 }
 0x1bc   : > { %4821 = vmatpush.bf16.msrb.mxu0 %v6082_v37  ;;  %v6450_v37 = vor.u32 %v8356_v61, %v6449_v20  ;;  %v6818_v45 = vor.u32 %v8448_v26, %v6817_v24  ;;  %v6673_v58 = vld [vmem:[%s9045_s29 + $0x8c8] sm:$0xf]  ;;  %v8412_v60 = vld [vmem:[%s9045_s29 + $0x8d4] sm:$0xf0] }
 0x1bd   : > { %4835 = vmatpush.bf16.msrb.mxu1 %v6210_v53  ;;  %v6801_v56 = vld [vmem:[%s9045_s29 + $0x9c8] sm:$0xf]  ;;  %v7074_v53 = vor.u32 %v8512_v10, %v7073_v17  ;;  %v8444_v55 = vld [vmem:[%s9045_s29 + $0x9d4] sm:$0xf0]  ;;  %v6674_v12 = vor.u32 %v8412_v60, %v6673_v58 }
 0x1be   : > { %4849 = vmatpush.bf16.msrb.mxu2 %v6338_v63  ;;  %v6929_v63 = vld [vmem:[%s9045_s29 + $0xac8] sm:$0xf]  ;;  %v8476_v2 = vld [vmem:[%s9045_s29 + $0xad4] sm:$0xf0]  ;;  %v6802_v10 = vor.u32 %v8444_v55, %v6801_v56  ;;  %v10128_v60 = vpop.f32.mrf.mxu1 }
 0x1bf   : > { %4863 = vmatpush.bf16.msrb.mxu3 %v6466_v16  ;;  %v7057_v3 = vld [vmem:[%s9045_s29 + $0xbc8] sm:$0xf]  ;;  %v8508_v5 = vld [vmem:[%s9045_s29 + $0xbd4] sm:$0xf0]  ;;  %v10111_v16 = vpop.f32.mrf.mxu2  ;;  %v6930_v17 = vor.u32 %v8476_v2, %v6929_v63 }
 0x1c0   : > { %4822 = vmatpush.bf16.msrb.mxu0 %v6066_v28  ;;  %v10113_v20 = vpop.f32.mrf.mxu3  ;;  %v6657_v61 = vld [vmem:[%s9045_s29 + $0x8a8] sm:$0xf]  ;;  %v8408_v18 = vld [vmem:[%s9045_s29 + $0x8b4] sm:$0xf0]  ;;  %v7058_v24 = vor.u32 %v8508_v5, %v7057_v3 }
 0x1c1   : > { %4836 = vmatpush.bf16.msrb.mxu1 %v6194_v33  ;;  %v6785_v27 = vld [vmem:[%s9045_s29 + $0x9a8] sm:$0xf]  ;;  %v8440_v28 = vld [vmem:[%s9045_s29 + $0x9b4] sm:$0xf0]  ;;  %v6658_v29 = vor.u32 %v8408_v18, %v6657_v61 }
 0x1c2   : > { %4850 = vmatpush.bf16.msrb.mxu2 %v6322_v34  ;;  %v6913_v26 = vld [vmem:[%s9045_s29 + $0xaa8] sm:$0xf]  ;;  %v8472_v58 = vld [vmem:[%s9045_s29 + $0xab4] sm:$0xf0]  ;;  %v6786_v59 = vor.u32 %v8440_v28, %v6785_v27 }
 0x1c3   : > { %4864 = vmatpush.bf16.msrb.mxu3 %v6450_v37  ;;  %4823 = vmatmul.bf16.vlgmr.msrb.gmra.mxu0 %v9258_v39  ;;  %v7041_v55 = vld [vmem:[%s9045_s29 + $0xba8] sm:$0xf]  ;;  %v8504_v56 = vld [vmem:[%s9045_s29 + $0xbb4] sm:$0xf0]  ;;  %v6914_v33 = vor.u32 %v8472_v58, %v6913_v26 }
 0x1c4   : > { %4871 = vmatpush.bf16.msra.mxu0 %v6690_v1  ;;  %v10122_v1 = vpop.f32.mrf.mxu0  ;;  %4837 = vmatmul.bf16.vlgmr.msrb.gmra.mxu1 %v9265_v44  ;;  %v6641_v34 = vld [vmem:[%s9045_s29 + $0x888] sm:$0xf]  ;;  %v8404_v37 = vld [vmem:[%s9045_s29 + $0x894] sm:$0xf0] }
 0x1c5   : > { %4885 = vmatpush.bf16.msra.mxu1 %v6818_v45  ;;  %4851 = vmatmul.bf16.vlgmr.msrb.gmra.mxu2 %v9263_v43  ;;  %v6769_v45 = vld [vmem:[%s9045_s29 + $0x988] sm:$0xf]  ;;  %v8468_v2 = vld [vmem:[%s9045_s29 + $0xa94] sm:$0xf0] }
 0x1c6   : > { %4899 = vmatpush.bf16.msra.mxu2 %v6946_v52  ;;  %4865 = vmatmul.bf16.vlgmr.msrb.gmra.mxu3 %v9269_v47  ;;  %v7042_v52 = vor.u32 %v8504_v56, %v7041_v55  ;;  %v6897_v63 = vld [vmem:[%s9045_s29 + $0xa88] sm:$0xf]  ;;  %v8500_v5 = vld [vmem:[%s9045_s29 + $0xb94] sm:$0xf0]  ;;  %v10148_v56 = vld [vmem:[%s9053_s4] sm:$0xf] }
 0x1c7   : > { %4913 = vmatpush.bf16.msra.mxu3 %v7074_v53  ;;  %v8436_v53 = vld [vmem:[%s9045_s29 + $0x994] sm:$0xf0]  ;;  %v7025_v3 = vld [vmem:[%s9045_s29 + $0xb88] sm:$0xf]  ;;  %10850 = vst [vmem:[#allocation24_spill] sm:$0xff] %v10148_v56  ;;  %v10851_v47 = vperm.slane %v10148_v56, 1 }
 0x1c8   : > { %4872 = vmatpush.bf16.msra.mxu0 %v6674_v12  ;;  %v6642_v12 = vor.u32 %v8404_v37, %v6641_v34  ;;  %v6625_v61 = vld [vmem:[%s9045_s29 + $0x868] sm:$0xf]  ;;  %v8400_v18 = vld [vmem:[%s9045_s29 + $0x874] sm:$0xf0]  ;;  %v7026_v28 = vor.u32 %v8500_v5, %v7025_v3  ;;  %v10160_v5 = vpop.f32.mrf.mxu1 }
 0x1c9   : > { %4886 = vmatpush.bf16.msra.mxu1 %v6802_v10  ;;  %v6770_v10 = vor.u32 %v8436_v53, %v6769_v45  ;;  %v6753_v27 = vld [vmem:[%s9045_s29 + $0x968] sm:$0xf]  ;;  %v8432_v26 = vld [vmem:[%s9045_s29 + $0x974] sm:$0xf0]  ;;  %v6626_v37 = vor.u32 %v8400_v18, %v6625_v61 }
 0x1ca   : > { %4900 = vmatpush.bf16.msra.mxu2 %v6930_v17  ;;  %v6898_v17 = vor.u32 %v8468_v2, %v6897_v63  ;;  %v6881_v58 = vld [vmem:[%s9045_s29 + $0xa68] sm:$0xf]  ;;  %v8464_v55 = vld [vmem:[%s9045_s29 + $0xa74] sm:$0xf0] }
 0x1cb   : > { %4914 = vmatpush.bf16.msra.mxu3 %v7058_v24  ;;  %v10142_v24 = vpop.f32.mrf.mxu2  ;;  %v8496_v34 = vld [vmem:[%s9045_s29 + $0xb74] sm:$0xf0]  ;;  %v6882_v53 = vor.u32 %v8464_v55, %v6881_v58  ;;  %v6609_v63 = vld [vmem:[%s9045_s29 + $0x848] sm:$0xf] }
 0x1cc   : > { %4873 = vmatpush.bf16.msra.mxu0 %v6658_v29  ;;  %v10155_v45 = vpop.f32.mrf.mxu0  ;;  %v8396_v2 = vld [vmem:[%s9045_s29 + $0x854] sm:$0xf0]  ;;  %v6737_v3 = vld [vmem:[%s9045_s29 + $0x948] sm:$0xf] }
 0x1cd   : > { %4887 = vmatpush.bf16.msra.mxu1 %v6786_v59  ;;  %v10151_v59 = vpop.f32.mrf.mxu3  ;;  %v6865_v61 = vld [vmem:[%s9045_s29 + $0xa48] sm:$0xf]  ;;  %v8460_v18 = vld [vmem:[%s9045_s29 + $0xa54] sm:$0xf0] }
 0x1ce   : > { %4901 = vmatpush.bf16.msra.mxu2 %v6914_v33  ;;  %v7009_v33 = vld [vmem:[%s9045_s29 + $0xb68] sm:$0xf]  ;;  %v6866_v58 = vor.u32 %v8460_v18, %v6865_v61  ;;  %v8424_v43 = vld [vmem:[%s9045_s29 + $0x934] sm:$0xf0] }
 0x1cf   : > { %4915 = vmatpush.bf16.msra.mxu3 %v7042_v52  ;;  %v6754_v52 = vor.u32 %v8432_v26, %v6753_v27  ;;  %v7010_v29 = vor.u32 %v8496_v34, %v7009_v33  ;;  %v8492_v27 = vld [vmem:[%s9045_s29 + $0xb54] sm:$0xf0]  ;;  %v6610_v26 = vor.u32 %v8396_v2, %v6609_v63  ;;  %v6593_v55 = vld [vmem:[%s9045_s29 + $0x828] sm:$0xf] }
 0x1d0   : > { %4874 = vmatpush.bf16.msra.mxu0 %v6642_v12  ;;  %v8428_v12 = vld [vmem:[%s9045_s29 + $0x954] sm:$0xf0]  ;;  %v6721_v34 = vld [vmem:[%s9045_s29 + $0x928] sm:$0xf] }
 0x1d1   : > { %4888 = vmatpush.bf16.msra.mxu1 %v6770_v10  ;;  %v4489_v10 = vadd.f32 %v10091_v22, %v10851_v47  ;;  %v8392_v33 = vld [vmem:[%s9045_s29 + $0x834] sm:$0xf0]  ;;  %v6849_v47 = vld [vmem:[%s9045_s29 + $0xa28] sm:$0xf] }
 0x1d2   : > { %4902 = vmatpush.bf16.msra.mxu2 %v6898_v17  ;;  %v6993_v17 = vld [vmem:[%s9045_s29 + $0xb48] sm:$0xf]  ;;  %v8456_v22 = vld [vmem:[%s9045_s29 + $0xa34] sm:$0xf0] }
 0x1d3   : > { %4916 = vmatpush.bf16.msra.mxu3 %v7026_v28  ;;  %v6738_v28 = vor.u32 %v8428_v12, %v6737_v3  ;;  %v6994_v44 = vor.u32 %v8492_v27, %v6993_v17  ;;  %v6977_v63 = vld [vmem:[%s9045_s29 + $0xb28] sm:$0xf]  ;;  %v10182_v3 = vpop.f32.mrf.mxu2  ;;  %v8388_v61 = vld [vmem:[%s9045_s29 + $0x814] sm:$0xf0] }
 0x1d4   : > { %4875 = vmatpush.bf16.msra.mxu0 %v6626_v37  ;;  %v4503_v37 = vadd.f32 %v10096_v25, %v4489_v10  ;;  %v6577_v12 = vld [vmem:[%s9045_s29 + $0x808] sm:$0xf]  ;;  %v6722_v25 = vor.u32 %v8424_v43, %v6721_v34  ;;  %v10195_v39 = vpop.f32.mrf.mxu0  ;;  %v8544_v43 = vld [vmem:[%s9045_s29 + $0xcf4] sm:$0xf0] }
 0x1d5   : > { %4889 = vmatpush.bf16.msra.mxu1 %v6754_v52  ;;  %v8488_v52 = vld [vmem:[%s9045_s29 + $0xb34] sm:$0xf0]  ;;  %v10186_v18 = vpop.f32.mrf.mxu3  ;;  %v6705_v10 = vld [vmem:[%s9045_s29 + $0x908] sm:$0xf] }
 0x1d6   : > { %4903 = vmatpush.bf16.msra.mxu2 %v6882_v53  ;;  %v10852_v53 = vperm.slane %v9575_v4, 0  ;;  %v6850_v4 = vor.u32 %v8456_v22, %v6849_v47  ;;  %v6833_v17 = vld [vmem:[%s9045_s29 + $0xa08] sm:$0xf]  ;;  %v6978_v27 = vor.u32 %v8488_v52, %v6977_v63  ;;  %v10853_v47 = vperm.slane %v10148_v56, 1  ;;  %v10204_v22 = vpop.f32.mrf.mxu1  ;;  %v8576_v52 = vld [vmem:[%s9045_s29 + $0xdf4] sm:$0xf0] }
 0x1d7   : > { %4917 = vmatpush.bf16.msra.mxu3 %v7010_v29  ;;  %v6594_v29 = vor.u32 %v8392_v33, %v6593_v55  ;;  %v6961_v55 = vld [vmem:[%s9045_s29 + $0xb08] sm:$0xf]  ;;  %v8484_v33 = vld [vmem:[%s9045_s29 + $0xb14] sm:$0xf0]  ;;  %v6578_v63 = vor.u32 %v8388_v61, %v6577_v12 }
 0x1d8   : > { %v4211_v2 = vadd.f32 %v9639_v11, %v10852_v53  ;;  %4876 = vmatpush.bf16.msra.mxu0 %v6610_v26  ;;  %v8420_v11 = vld [vmem:[%s9045_s29 + $0x914] sm:$0xf0]  ;;  %v4517_v53 = vadd.f32 %v10111_v16, %v4503_v37  ;;  %v7457_v16 = vld [vmem:[%s9045_s29 + $0xee8] sm:$0xf] }
 0x1d9   : > { %4890 = vmatpush.bf16.msra.mxu1 %v6738_v28  ;;  %v8452_v26 = vld [vmem:[%s9045_s29 + $0xa14] sm:$0xf0]  ;;  %v7201_v28 = vld [vmem:[%s9045_s29 + $0xce8] sm:$0xf]  ;;  %v6706_v51 = vor.u32 %v8420_v11, %v6705_v10 }
 0x1da   : > { %4904 = vmatpush.bf16.msra.mxu2 %v6866_v58  ;;  %v7329_v58 = vld [vmem:[%s9045_s29 + $0xde8] sm:$0xf]  ;;  %v4225_v34 = vadd.f32 %v9649_v23, %v4211_v2  ;;  %v8608_v37 = vld [vmem:[%s9045_s29 + $0xef4] sm:$0xf0]  ;;  %v6834_v8 = vor.u32 %v8452_v26, %v6833_v17 }
 0x1db   : > { %4918 = vmatpush.bf16.msra.mxu3 %v6994_v44  ;;  %v4491_v44 = vadd.f32 %v10122_v1, %v10853_v47  ;;  %v7585_v23 = vld [vmem:[%s9045_s29 + $0xfe8] sm:$0xf]  ;;  %v8640_v2 = vld [vmem:[%s9045_s29 + $0xff4] sm:$0xf0]  ;;  %v6962_v1 = vor.u32 %v8484_v33, %v6961_v55  ;;  %v7202_v47 = vor.u32 %v8544_v43, %v7201_v28  ;;  %v7330_v12 = vor.u32 %v8576_v52, %v7329_v58  ;;  %v10222_v33 = vpop.f32.mrf.mxu2 }
 0x1dc   : > { %4877 = vmatpush.bf16.msra.mxu0 %v6594_v29  ;;  %v4531_v29 = vadd.f32 %v10113_v20, %v4517_v53  ;;  %v7458_v61 = vor.u32 %v8608_v37, %v7457_v16  ;;  %v7185_v56 = vld [vmem:[%s9045_s29 + $0xcc8] sm:$0xf]  ;;  %v8540_v6 = vld [vmem:[%s9045_s29 + $0xcd4] sm:$0xf0]  ;;  %v7586_v11 = vor.u32 %v8640_v2, %v7585_v23  ;;  %v10227_v28 = vpop.f32.mrf.mxu0 }
 0x1dd   : > { %4891 = vmatpush.bf16.msra.mxu1 %v6722_v25  ;;  %v7313_v25 = vld [vmem:[%s9045_s29 + $0xdc8] sm:$0xf]  ;;  %v4505_v10 = vadd.f32 %v10128_v60, %v4491_v44  ;;  %v8572_v17 = vld [vmem:[%s9045_s29 + $0xdd4] sm:$0xf0]  ;;  %v7186_v53 = vor.u32 %v8540_v6, %v7185_v56  ;;  %v10225_v60 = vpop.f32.mrf.mxu3 }
 0x1de   : > { %4905 = vmatpush.bf16.msra.mxu2 %v6850_v4  ;;  %v4239_v4 = vadd.f32 %v9662_v50, %v4225_v34  ;;  %v7441_v26 = vld [vmem:[%s9045_s29 + $0xec8] sm:$0xf]  ;;  %v8636_v55 = vld [vmem:[%s9045_s29 + $0xfd4] sm:$0xf0]  ;;  %v4545_v50 = vadd.f32 %v10155_v45, %v4531_v29  ;;  %v10234_v45 = vpop.f32.mrf.mxu1 }
 0x1df   : > { %4919 = vmatpush.bf16.msra.mxu3 %v6978_v27  ;;  %v8604_v27 = vld [vmem:[%s9045_s29 + $0xed4] sm:$0xf0]  ;;  %v7569_v20 = vld [vmem:[%s9045_s29 + $0xfc8] sm:$0xf]  ;;  %v4519_v56 = vadd.f32 %v10142_v24, %v4505_v10 }
 0x1e0   : > { %4878 = vmatpush.bf16.msra.mxu0 %v6578_v63  ;;  %v7169_v43 = vld [vmem:[%s9045_s29 + $0xca8] sm:$0xf]  ;;  %v8536_v58 = vld [vmem:[%s9045_s29 + $0xcb4] sm:$0xf0]  ;;  %v4253_v6 = vadd.f32 %v9668_v62, %v4239_v4  ;;  %v7570_v44 = vor.u32 %v8636_v55, %v7569_v20  ;;  %v4559_v23 = vadd.f32 %v10160_v5, %v4545_v50 }
 0x1e1   : > { %4892 = vmatpush.bf16.msra.mxu1 %v6706_v51  ;;  %v7314_v51 = vor.u32 %v8572_v17, %v7313_v25  ;;  %v7297_v34 = vld [vmem:[%s9045_s29 + $0xda8] sm:$0xf]  ;;  %v8568_v63 = vld [vmem:[%s9045_s29 + $0xdb4] sm:$0xf0]  ;;  %v7170_v24 = vor.u32 %v8536_v58, %v7169_v43  ;;  %v4533_v25 = vadd.f32 %v10151_v59, %v4519_v56 }
 0x1e2   : > { %4906 = vmatpush.bf16.msra.mxu2 %v6834_v8  ;;  %v7442_v8 = vor.u32 %v8604_v27, %v7441_v26  ;;  %v7425_v52 = vld [vmem:[%s9045_s29 + $0xea8] sm:$0xf]  ;;  %v8600_v16 = vld [vmem:[%s9045_s29 + $0xeb4] sm:$0xf0]  ;;  %v7298_v2 = vor.u32 %v8568_v63, %v7297_v34 }
 0x1e3   : > { %4920 = vmatpush.bf16.msra.mxu3 %v6962_v1  ;;  %4879 = vmatmul.bf16.vlgmr.msra.gmra.mxu0 %v9358_v31  ;;  %v7553_v37 = vld [vmem:[%s9045_s29 + $0xfa8] sm:$0xf]  ;;  %v8632_v62 = vld [vmem:[%s9045_s29 + $0xfb4] sm:$0xf0]  ;;  %v7426_v1 = vor.u32 %v8600_v16, %v7425_v52  ;;  %v10256_v27 = vpop.f32.mrf.mxu2  ;;  %v4547_v58 = vadd.f32 %v10195_v39, %v4533_v25 }
 0x1e4   : > { %4927 = vmatpush.bf16.msrb.mxu0 %v7202_v47  ;;  %4893 = vmatmul.bf16.vlgmr.msra.gmra.mxu1 %v9365_v36  ;;  %v7153_v47 = vld [vmem:[%s9045_s29 + $0xc88] sm:$0xf]  ;;  %v8532_v29 = vld [vmem:[%s9045_s29 + $0xc94] sm:$0xf0]  ;;  %v7554_v4 = vor.u32 %v8632_v62, %v7553_v37 }
 0x1e5   : > { %4941 = vmatpush.bf16.msrb.mxu1 %v7330_v12  ;;  %4907 = vmatmul.bf16.vlgmr.msra.gmra.mxu2 %v9363_v35  ;;  %v7281_v12 = vld [vmem:[%s9045_s29 + $0xd88] sm:$0xf]  ;;  %v8564_v10 = vld [vmem:[%s9045_s29 + $0xd94] sm:$0xf0]  ;;  %v7154_v20 = vor.u32 %v8532_v29, %v7153_v47  ;;  %v10259_v59 = vpop.f32.mrf.mxu3  ;;  %v4561_v47 = vadd.f32 %v10204_v22, %v4547_v58 }
 0x1e6   : > { %4955 = vmatpush.bf16.msrb.mxu2 %v7458_v61  ;;  %4921 = vmatmul.bf16.vlgmr.msra.gmra.mxu3 %v9369_v40  ;;  %v4267_v61 = vadd.f32 %v9724_v9, %v4253_v6  ;;  %v8596_v5 = vld [vmem:[%s9045_s29 + $0xe94] sm:$0xf0]  ;;  %v7537_v17 = vld [vmem:[%s9045_s29 + $0xf88] sm:$0xf]  ;;  %v4573_v9 = vadd.f32 %v10182_v3, %v4559_v23  ;;  %v7282_v55 = vor.u32 %v8564_v10, %v7281_v12  ;;  %v10274_v37 = vpop.f32.mrf.mxu1 }
 0x1e7   : > { %4969 = vmatpush.bf16.msrb.mxu3 %v7586_v11  ;;  %v7409_v11 = vld [vmem:[%s9045_s29 + $0xe88] sm:$0xf]  ;;  %v8628_v26 = vld [vmem:[%s9045_s29 + $0xf94] sm:$0xf0] }
 0x1e8   : > { %4928 = vmatpush.bf16.msrb.mxu0 %v7186_v53  ;;  %v7410_v53 = vor.u32 %v8596_v5, %v7409_v11  ;;  %v7137_v50 = vld [vmem:[%s9045_s29 + $0xc68] sm:$0xf]  ;;  %v4281_v43 = vadd.f32 %v9728_v15, %v4267_v61  ;;  %v7538_v34 = vor.u32 %v8628_v26, %v7537_v17  ;;  %v8560_v6 = vld [vmem:[%s9045_s29 + $0xd74] sm:$0xf0]  ;;  %v4587_v15 = vadd.f32 %v10186_v18, %v4573_v9 }
 0x1e9   : > { %4942 = vmatpush.bf16.msrb.mxu1 %v7314_v51  ;;  %v8528_v51 = vld [vmem:[%s9045_s29 + $0xc74] sm:$0xf0]  ;;  %v7393_v3 = vld [vmem:[%s9045_s29 + $0xe68] sm:$0xf]  ;;  %v4575_v11 = vadd.f32 %v10222_v33, %v4561_v47 }
 0x1ea   : > { %4956 = vmatpush.bf16.msrb.mxu2 %v7442_v8  ;;  %v7265_v8 = vld [vmem:[%s9045_s29 + $0xd68] sm:$0xf]  ;;  %v8592_v56 = vld [vmem:[%s9045_s29 + $0xe74] sm:$0xf0]  ;;  %v4295_v16 = vadd.f32 %v9745_v48, %v4281_v43  ;;  %v7138_v39 = vor.u32 %v8528_v51, %v7137_v50  ;;  %v4601_v18 = vadd.f32 %v10227_v28, %v4587_v15 }
 0x1eb   : > { %4970 = vmatpush.bf16.msrb.mxu3 %v7570_v44  ;;  %v10269_v44 = vpop.f32.mrf.mxu0  ;;  %v7521_v63 = vld [vmem:[%s9045_s29 + $0xf68] sm:$0xf]  ;;  %v8624_v52 = vld [vmem:[%s9045_s29 + $0xf74] sm:$0xf0]  ;;  %v7266_v62 = vor.u32 %v8560_v6, %v7265_v8 }
 0x1ec   : > { %4929 = vmatpush.bf16.msrb.mxu0 %v7170_v24  ;;  %v7394_v24 = vor.u32 %v8592_v56, %v7393_v3  ;;  %v7121_v23 = vld [vmem:[%s9045_s29 + $0xc48] sm:$0xf]  ;;  %v7522_v48 = vor.u32 %v8624_v52, %v7521_v63  ;;  %v8556_v29 = vld [vmem:[%s9045_s29 + $0xd54] sm:$0xf0]  ;;  %v4309_v10 = vadd.f32 %v9750_v57, %v4295_v16  ;;  %v4615_v51 = vadd.f32 %v10234_v45, %v4601_v18 }
 0x1ed   : > { %4943 = vmatpush.bf16.msrb.mxu1 %v7298_v2  ;;  %v8524_v2 = vld [vmem:[%s9045_s29 + $0xc54] sm:$0xf0]  ;;  %v7377_v12 = vld [vmem:[%s9045_s29 + $0xe48] sm:$0xf]  ;;  %v10299_v8 = vpop.f32.mrf.mxu3 }
 0x1ee   : > { %4957 = vmatpush.bf16.msrb.mxu2 %v7426_v1  ;;  %v7249_v1 = vld [vmem:[%s9045_s29 + $0xd48] sm:$0xf]  ;;  %v8588_v61 = vld [vmem:[%s9045_s29 + $0xe54] sm:$0xf0]  ;;  %v7122_v22 = vor.u32 %v8524_v2, %v7121_v23  ;;  %v4323_v9 = vadd.f32 %v9803_v19, %v4309_v10  ;;  %v4589_v19 = vadd.f32 %v10225_v60, %v4575_v11  ;;  %v10304_v6 = vpop.f32.mrf.mxu1  ;;  %v4629_v45 = vadd.f32 %v10256_v27, %v4615_v51 }
 0x1ef   : > { %4971 = vmatpush.bf16.msrb.mxu3 %v7554_v4  ;;  %v7505_v25 = vld [vmem:[%s9045_s29 + $0xf48] sm:$0xf]  ;;  %v8620_v4 = vld [vmem:[%s9045_s29 + $0xf54] sm:$0xf0]  ;;  %v7250_v5 = vor.u32 %v8556_v29, %v7249_v1  ;;  %v7378_v17 = vor.u32 %v8588_v61, %v7377_v12 }
 0x1f0   : > { %4930 = vmatpush.bf16.msrb.mxu0 %v7154_v20  ;;  %v7105_v26 = vld [vmem:[%s9045_s29 + $0xc28] sm:$0xf]  ;;  %v8520_v20 = vld [vmem:[%s9045_s29 + $0xc34] sm:$0xf0]  ;;  %v7506_v57 = vor.u32 %v8620_v4, %v7505_v25  ;;  %v4603_v27 = vadd.f32 %v10269_v44, %v4589_v19 }
 0x1f1   : > { %4944 = vmatpush.bf16.msrb.mxu1 %v7282_v55  ;;  %v7233_v28 = vld [vmem:[%s9045_s29 + $0xd28] sm:$0xf]  ;;  %v10293_v55 = vpop.f32.mrf.mxu2  ;;  %v8552_v33 = vld [vmem:[%s9045_s29 + $0xd34] sm:$0xf0]  ;;  %v7106_v3 = vor.u32 %v8520_v20, %v7105_v26 }
 0x1f2   : > { %4958 = vmatpush.bf16.msrb.mxu2 %v7410_v53  ;;  %v7361_v53 = vld [vmem:[%s9045_s29 + $0xe28] sm:$0xf]  ;;  %v8584_v50 = vld [vmem:[%s9045_s29 + $0xe34] sm:$0xf0]  ;;  %v7234_v52 = vor.u32 %v8552_v33, %v7233_v28  ;;  %v4617_v26 = vadd.f32 %v10274_v37, %v4603_v27 }
 0x1f3   : > { %4972 = vmatpush.bf16.msrb.mxu3 %v7538_v34  ;;  %v4656_v43 = vpop.f32.mrf.mxu0  ;;  %v7489_v58 = vld [vmem:[%s9045_s29 + $0xf28] sm:$0xf]  ;;  %v8616_v34 = vld [vmem:[%s9045_s29 + $0xf34] sm:$0xf0]  ;;  %v7362_v16 = vor.u32 %v8584_v50, %v7361_v53 }
 0x1f4   : > { %4931 = vmatpush.bf16.msrb.mxu0 %v7138_v39  ;;  %v7089_v56 = vld [vmem:[%s9045_s29 + $0xc08] sm:$0xf]  ;;  %v8516_v63 = vld [vmem:[%s9045_s29 + $0xc14] sm:$0xf0] }
 0x1f5   : > { %4945 = vmatpush.bf16.msrb.mxu1 %v7266_v62  ;;  %v7217_v39 = vld [vmem:[%s9045_s29 + $0xd08] sm:$0xf]  ;;  %v8548_v60 = vld [vmem:[%s9045_s29 + $0xd14] sm:$0xf0]  ;;  %v4337_v62 = vadd.f32 %v9807_v21, %v4323_v9  ;;  %v7090_v61 = vor.u32 %v8516_v63, %v7089_v56  ;;  %v4643_v21 = vadd.f32 %v10259_v59, %v4629_v45  ;;  %v4698_v59 = vpop.f32.mrf.mxu3 }
 0x1f6   : > { %4959 = vmatpush.bf16.msrb.mxu2 %v7394_v24  ;;  %v7345_v15 = vld [vmem:[%s9045_s29 + $0xe08] sm:$0xf]  ;;  %v7490_v24 = vor.u32 %v8616_v34, %v7489_v58  ;;  %v8580_v23 = vld [vmem:[%s9045_s29 + $0xe14] sm:$0xf0]  ;;  %v7218_v10 = vor.u32 %v8548_v60, %v7217_v39  ;;  %v4672_v45 = vpop.f32.mrf.mxu1 }
 0x1f7   : > { %4973 = vmatpush.bf16.msrb.mxu3 %v7522_v48  ;;  %v7473_v2 = vld [vmem:[%s9045_s29 + $0xf08] sm:$0xf]  ;;  %v8612_v1 = vld [vmem:[%s9045_s29 + $0xf14] sm:$0xf0]  ;;  %v4351_v12 = vadd.f32 %v9824_v0, %v4337_v62  ;;  %v7346_v44 = vor.u32 %v8580_v23, %v7345_v15  ;;  %v4657_v20 = vadd.f32 %v4656_v43, %v4643_v21 }
 0x1f8   : > { %4932 = vmatpush.bf16.msrb.mxu0 %v7122_v22  ;;  %v7713_v47 = vld [vmem:[%s9045_s29 + $0x10e8] sm:$0xf]  ;;  %v8672_v48 = vld [vmem:[%s9045_s29 + $0x10f4] sm:$0xf0]  ;;  %v7474_v0 = vor.u32 %v8612_v1, %v7473_v2 }
 0x1f9   : > { %4946 = vmatpush.bf16.msrb.mxu1 %v7250_v5  ;;  %v7841_v29 = vld [vmem:[%s9045_s29 + $0x11e8] sm:$0xf]  ;;  %v8704_v18 = vld [vmem:[%s9045_s29 + $0x11f4] sm:$0xf0]  ;;  %v4684_v5 = vpop.f32.mrf.mxu2  ;;  %v4365_v50 = vadd.f32 %v9829_v7, %v4351_v12 }
 0x1fa   : > { %4960 = vmatpush.bf16.msrb.mxu2 %v7378_v17  ;;  %v7969_v25 = vld [vmem:[%s9045_s29 + $0x12e8] sm:$0xf]  ;;  %v8736_v4 = vld [vmem:[%s9045_s29 + $0x12f4] sm:$0xf0]  ;;  %v7714_v17 = vor.u32 %v8672_v48, %v7713_v47  ;;  %v7842_v28 = vor.u32 %v8704_v18, %v7841_v29 }
 0x1fb   : > { %4974 = vmatpush.bf16.msrb.mxu3 %v7506_v57  ;;  %v8097_v11 = vld [vmem:[%s9045_s29 + $0x13e8] sm:$0xf]  ;;  %v8768_v22 = vld [vmem:[%s9045_s29 + $0x13f4] sm:$0xf0]  ;;  %v7970_v9 = vor.u32 %v8736_v4, %v7969_v25  ;;  %v4658_v37 = vpop.f32.mrf.mxu0  ;;  %v4379_v63 = vadd.f32 %v9882_v49, %v4365_v50 }
 0x1fc   : > { %4933 = vmatpush.bf16.msrb.mxu0 %v7106_v3  ;;  %v7697_v57 = vld [vmem:[%s9045_s29 + $0x10c8] sm:$0xf]  ;;  %v8668_v33 = vld [vmem:[%s9045_s29 + $0x10d4] sm:$0xf0]  ;;  %v8098_v51 = vor.u32 %v8768_v22, %v8097_v11  ;;  %v4631_v3 = vadd.f32 %v10293_v55, %v4617_v26 }
 0x1fd   : > { %4947 = vmatpush.bf16.msrb.mxu1 %v7234_v52  ;;  %v7825_v53 = vld [vmem:[%s9045_s29 + $0x11c8] sm:$0xf]  ;;  %v8700_v58 = vld [vmem:[%s9045_s29 + $0x11d4] sm:$0xf0]  ;;  %v7698_v7 = vor.u32 %v8668_v33, %v7697_v57  ;;  %v4671_v52 = vadd.f32 %v10304_v6, %v4657_v20  ;;  %v4393_v47 = vadd.f32 %v9886_v54, %v4379_v63 }
 0x1fe   : > { %4961 = vmatpush.bf16.msrb.mxu2 %v7362_v16  ;;  %v7953_v34 = vld [vmem:[%s9045_s29 + $0x12c8] sm:$0xf]  ;;  %v8732_v19 = vld [vmem:[%s9045_s29 + $0x12d4] sm:$0xf0]  ;;  %v7826_v55 = vor.u32 %v8700_v58, %v7825_v53  ;;  %v4645_v2 = vadd.f32 %v10299_v8, %v4631_v3 }
 0x1ff   : > { %4975 = vmatpush.bf16.msrb.mxu3 %v7490_v24  ;;  %v8081_v43 = vld [vmem:[%s9045_s29 + $0x13c8] sm:$0xf]  ;;  %v8764_v56 = vld [vmem:[%s9045_s29 + $0x13d4] sm:$0xf0]  ;;  %v7954_v16 = vor.u32 %v8732_v19, %v7953_v34  ;;  %v4685_v6 = vadd.f32 %v4684_v5, %v4671_v52  ;;  %v4407_v21 = vadd.f32 %v9903_v30, %v4393_v47  ;;  %v4700_v5 = vpop.f32.mrf.mxu3 }
 0x200   : > { %4934 = vmatpush.bf16.msrb.mxu0 %v7090_v61  ;;  %v7681_v39 = vld [vmem:[%s9045_s29 + $0x10a8] sm:$0xf]  ;;  %v8664_v60 = vld [vmem:[%s9045_s29 + $0x10b4] sm:$0xf0]  ;;  %v8082_v49 = vor.u32 %v8764_v56, %v8081_v43  ;;  %v4659_v8 = vadd.f32 %v4658_v37, %v4645_v2 }
 0x201   : > { %4948 = vmatpush.bf16.msrb.mxu1 %v7218_v10  ;;  %v7809_v15 = vld [vmem:[%s9045_s29 + $0x11a8] sm:$0xf]  ;;  %v8696_v62 = vld [vmem:[%s9045_s29 + $0x11b4] sm:$0xf0]  ;;  %v7682_v48 = vor.u32 %v8664_v60, %v7681_v39  ;;  %v4686_v54 = vpop.f32.mrf.mxu2  ;;  %v4699_v22 = vadd.f32 %v4698_v59, %v4685_v6  ;;  %v4726_v30 = vpop.f32.mrf.mxu1 }
 0x202   : > { %4962 = vmatpush.bf16.msrb.mxu2 %v7346_v44  ;;  %v7937_v24 = vld [vmem:[%s9045_s29 + $0x12a8] sm:$0xf]  ;;  %v8728_v23 = vld [vmem:[%s9045_s29 + $0x12b4] sm:$0xf0]  ;;  %v7810_v12 = vor.u32 %v8696_v62, %v7809_v15 }
 0x203   : > { %4976 = vmatpush.bf16.msrb.mxu3 %v7474_v0  ;;  %4935 = vmatmul.bf16.vlgmr.msrb.gmra.mxu0 %v9458_v32  ;;  %v8065_v1 = vld [vmem:[%s9045_s29 + $0x13a8] sm:$0xf]  ;;  %v8760_v27 = vld [vmem:[%s9045_s29 + $0x13b4] sm:$0xf0]  ;;  %v7938_v61 = vor.u32 %v8728_v23, %v7937_v24  ;;  %v4712_v0 = vpop.f32.mrf.mxu0 }
 0x204   : > { %4983 = vmatpush.bf16.msra.mxu0 %v7714_v17  ;;  %4949 = vmatmul.bf16.vlgmr.msrb.gmra.mxu1 %v9465_v41  ;;  %v7665_v29 = vld [vmem:[%s9045_s29 + $0x1088] sm:$0xf]  ;;  %v8660_v18 = vld [vmem:[%s9045_s29 + $0x1094] sm:$0xf0]  ;;  %v8066_v10 = vor.u32 %v8760_v27, %v8065_v1  ;;  %v4713_v57 = vadd.f32 %v4712_v0, %v4699_v22 }
 0x205   : > { %4997 = vmatpush.bf16.msra.mxu1 %v7842_v28  ;;  %4963 = vmatmul.bf16.vlgmr.msrb.gmra.mxu2 %v9463_v38  ;;  %v7793_v25 = vld [vmem:[%s9045_s29 + $0x1188] sm:$0xf]  ;;  %v8692_v4 = vld [vmem:[%s9045_s29 + $0x1194] sm:$0xf0]  ;;  %v7666_v20 = vor.u32 %v8660_v18, %v7665_v29 }
 0x206   : > { %5011 = vmatpush.bf16.msra.mxu2 %v7970_v9  ;;  %4977 = vmatmul.bf16.vlgmr.msrb.gmra.mxu3 %v9469_v46  ;;  %v7921_v44 = vld [vmem:[%s9045_s29 + $0x1288] sm:$0xf]  ;;  %v8724_v11 = vld [vmem:[%s9045_s29 + $0x1294] sm:$0xf0]  ;;  %v7794_v28 = vor.u32 %v8692_v4, %v7793_v25  ;;  %v4673_v9 = vadd.f32 %v4672_v45, %v4659_v8 }
 0x207   : > { %5025 = vmatpush.bf16.msra.mxu3 %v8098_v51  ;;  %v8049_v17 = vld [vmem:[%s9045_s29 + $0x1388] sm:$0xf]  ;;  %v8756_v26 = vld [vmem:[%s9045_s29 + $0x1394] sm:$0xf0]  ;;  %v7922_v33 = vor.u32 %v8724_v11, %v7921_v44  ;;  %v4421_v51 = vadd.f32 %v9908_v42, %v4407_v21  ;;  %v4727_v42 = vadd.f32 %v4726_v30, %v4713_v57 }
 0x208   : > { %4984 = vmatpush.bf16.msra.mxu0 %v7698_v7  ;;  %v7649_v59 = vld [vmem:[%s9045_s29 + $0x1068] sm:$0xf]  ;;  %v8656_v53 = vld [vmem:[%s9045_s29 + $0x1074] sm:$0xf0]  ;;  %v8050_v58 = vor.u32 %v8756_v26, %v8049_v17  ;;  %v4687_v37 = vadd.f32 %v4686_v54, %v4673_v9 }
 0x209   : > { %4998 = vmatpush.bf16.msra.mxu1 %v7826_v55  ;;  %v7777_v50 = vld [vmem:[%s9045_s29 + $0x1168] sm:$0xf]  ;;  %v8688_v34 = vld [vmem:[%s9045_s29 + $0x1174] sm:$0xf0]  ;;  %v4435_v63 = vadd.f32 %v10065_v14, %v4421_v51  ;;  %v7650_v45 = vor.u32 %v8656_v53, %v7649_v59  ;;  %v4754_v6 = vpop.f32.mrf.mxu3  ;;  %v4728_v54 = vpop.f32.mrf.mxu1 }
 0x20a   : > { %5012 = vmatpush.bf16.msra.mxu2 %v7954_v16  ;;  %v7905_v19 = vld [vmem:[%s9045_s29 + $0x1268] sm:$0xf]  ;;  %v8720_v3 = vld [vmem:[%s9045_s29 + $0x1274] sm:$0xf0]  ;;  %v7778_v52 = vor.u32 %v8688_v34, %v7777_v50  ;;  %v4701_v24 = vadd.f32 %v4700_v5, %v4687_v37  ;;  %v10855_v5 = vld [vmem:[#allocation22_spill] sm:$0xff] }
 0x20b   : > { %5026 = vmatpush.bf16.msra.mxu3 %v8082_v49  ;;  %v8033_v43 = vld [vmem:[%s9045_s29 + $0x1368] sm:$0xf]  ;;  %v8752_v56 = vld [vmem:[%s9045_s29 + $0x1374] sm:$0xf0]  ;;  %v7906_v55 = vor.u32 %v8720_v3, %v7905_v19  ;;  %v4740_v49 = vpop.f32.mrf.mxu2  ;;  %v4714_v2 = vpop.f32.mrf.mxu0  ;;  %v4449_v47 = vadd.f32 %v10069_v13, %v4435_v63 }
 0x20c   : > { %4985 = vmatpush.bf16.msra.mxu0 %v7682_v48  ;;  %v7633_v7 = vld [vmem:[%s9045_s29 + $0x1048] sm:$0xf]  ;;  %v8652_v16 = vld [vmem:[%s9045_s29 + $0x1054] sm:$0xf0]  ;;  %v8034_v15 = vor.u32 %v8752_v56, %v8033_v43  ;;  %v4741_v23 = vadd.f32 %v4740_v49, %v4727_v42  ;;  %v8158_v42 = vld [vmem:[%s9045_s29 + $0xec] sm:$0xf] }
 0x20d   : > { %4999 = vmatpush.bf16.msra.mxu1 %v7810_v12  ;;  %v7761_v39 = vld [vmem:[%s9045_s29 + $0x1148] sm:$0xf]  ;;  %v8684_v60 = vld [vmem:[%s9045_s29 + $0x1154] sm:$0xf0]  ;;  %v7634_v48 = vor.u32 %v8652_v16, %v7633_v7  ;;  %v4715_v12 = vadd.f32 %v4714_v2, %v4701_v24  ;;  %v4463_v0 = vadd.f32 %v10855_v5, %v4449_v47  ;;  %v8254_v24 = vld [vmem:[%s9045_s29 + $0x3ec] sm:$0xf] }
 0x20e   : > { %5013 = vmatpush.bf16.msra.mxu2 %v7938_v61  ;;  %v7889_v14 = vld [vmem:[%s9045_s29 + $0x1248] sm:$0xf]  ;;  %v8716_v62 = vld [vmem:[%s9045_s29 + $0x1254] sm:$0xf0]  ;;  %v7762_v29 = vor.u32 %v8684_v60, %v7761_v39  ;;  %v4755_v61 = vadd.f32 %v4754_v6, %v4741_v23  ;;  %v5795_v39 = vld [vmem:[%s9045_s29 + $0x1f8] sm:$0xf0] }
 0x20f   : > { %5027 = vmatpush.bf16.msra.mxu3 %v8066_v10  ;;  %v8017_v1 = vld [vmem:[%s9045_s29 + $0x1348] sm:$0xf]  ;;  %v8748_v27 = vld [vmem:[%s9045_s29 + $0x1354] sm:$0xf0]  ;;  %v7890_v18 = vor.u32 %v8716_v62, %v7889_v14  ;;  %v4729_v59 = vadd.f32 %v4728_v54, %v4715_v12  ;;  %v8222_v60 = vld [vmem:[%s9045_s29 + $0x2ec] sm:$0xf] }
 0x210   : > { %4986 = vmatpush.bf16.msra.mxu0 %v7666_v20  ;;  %v7617_v8 = vld [vmem:[%s9045_s29 + $0x1028] sm:$0xf]  ;;  %v8648_v25 = vld [vmem:[%s9045_s29 + $0x1034] sm:$0xf0]  ;;  %v8018_v13 = vor.u32 %v8748_v27, %v8017_v1  ;;  %v5320_v17 = vmax.f32 %v4755_v61, 0.0 }
 0x211   : > { %5000 = vmatpush.bf16.msra.mxu1 %v7794_v28  ;;  %v7745_v4 = vld [vmem:[%s9045_s29 + $0x1128] sm:$0xf]  ;;  %v8680_v21 = vld [vmem:[%s9045_s29 + $0x1134] sm:$0xf0]  ;;  %v7618_v28 = vor.u32 %v8648_v25, %v7617_v8  ;;  %v4756_v7 = vpop.f32.mrf.mxu3  ;;  %v6051_v23 = vld [vmem:[%s9045_s29 + $0x3f8] sm:$0xf0] }
 0x212   : > { %5014 = vmatpush.bf16.msra.mxu2 %v7922_v33  ;;  %v7873_v10 = vld [vmem:[%s9045_s29 + $0x1228] sm:$0xf]  ;;  %v8712_v44 = vld [vmem:[%s9045_s29 + $0x1234] sm:$0xf0]  ;;  %v7746_v30 = vor.u32 %v8680_v21, %v7745_v4  ;;  %v8154_v1 = vld [vmem:[%s9045_s29 + $0xcc] sm:$0xf]  ;;  %v6054_v61 = vor.u32 %v8254_v24, %v6051_v23 }
 0x213   : > { %5028 = vmatpush.bf16.msra.mxu3 %v8050_v58  ;;  %v10854_v11 = vld [vmem:[#allocation21_spill] sm:$0xff]  ;;  %v8744_v20 = vld [vmem:[%s9045_s29 + $0x1334] sm:$0xf0]  ;;  %v7874_v53 = vor.u32 %v8712_v44, %v7873_v10  ;;  %v4742_v19 = vpop.f32.mrf.mxu2  ;;  %v5651_v8 = vld [vmem:[%s9045_s29 + $0xd8] sm:$0xf0] }
 0x214   : > { %4987 = vmatpush.bf16.msra.mxu0 %v7650_v45  ;;  %v5319_v22 = vmax.f32 %v10854_v11, 0.0  ;;  %v8001_v26 = vld [vmem:[%s9045_s29 + $0x1328] sm:$0xf]  ;;  %v8644_v57 = vld [vmem:[%s9045_s29 + $0x1014] sm:$0xf0]  ;;  %v4743_v45 = vadd.f32 %v4742_v19, %v4729_v59  ;;  %v5654_v10 = vor.u32 %v8154_v1, %v5651_v8 }
 0x215   : > { %5001 = vmatpush.bf16.msra.mxu1 %v7778_v52  ;;  %v7601_v9 = vld [vmem:[%s9045_s29 + $0x1008] sm:$0xf]  ;;  %v8676_v51 = vld [vmem:[%s9045_s29 + $0x1114] sm:$0xf0]  ;;  %v8002_v34 = vor.u32 %v8744_v20, %v8001_v26  ;;  %v5667_v52 = vld [vmem:[%s9045_s29 + $0xf8] sm:$0xf0] }
 0x216   : > { %5015 = vmatpush.bf16.msra.mxu2 %v7906_v55  ;;  %v5327_v33 = vpack.c.bf16 %v5320_v17, %v5319_v22  ;;  %v7729_v50 = vld [vmem:[%s9045_s29 + $0x1108] sm:$0xf]  ;;  %v8708_v3 = vld [vmem:[%s9045_s29 + $0x1214] sm:$0xf0]  ;;  %v8190_v55 = vld [vmem:[%s9045_s29 + $0x1ec] sm:$0xf]  ;;  %v7602_v16 = vor.u32 %v8644_v57, %v7601_v9  ;;  %v4757_v49 = vadd.f32 %v4756_v7, %v4743_v45  ;;  %v5670_v6 = vor.u32 %v8158_v42, %v5667_v52 }
 0x217   : > { %5029 = vmatpush.bf16.msra.mxu3 %v8034_v15  ;;  %v7857_v58 = vld [vmem:[%s9045_s29 + $0x1208] sm:$0xf]  ;;  %v8740_v43 = vld [vmem:[%s9045_s29 + $0x1314] sm:$0xf0]  ;;  %v5923_v15 = vld [vmem:[%s9045_s29 + $0x2f8] sm:$0xf0]  ;;  %v7730_v14 = vor.u32 %v8676_v51, %v7729_v50 }
 0x218   : > { %4988 = vmatpush.bf16.msra.mxu0 %v7634_v48  ;;  %v7985_v37 = vld [vmem:[%s9045_s29 + $0x1308] sm:$0xf]  ;;  %v10856_v56 = vld [vmem:[#allocation23_spill] sm:$0xff]  ;;  %5331 = vst [vmem:[%s10404_s6] sm:$0xff] %v5327_v33  ;;  %v7858_v62 = vor.u32 %v8708_v3, %v7857_v58  ;;  %v5324_v47 = vmax.f32 %v4757_v49, 0.0  ;;  %v5798_v48 = vor.u32 %v8190_v55, %v5795_v39  ;;  %v8186_v12 = vld [vmem:[%s9045_s29 + $0x1cc] sm:$0xf] }
 0x219   : > { %5002 = vmatpush.bf16.msra.mxu1 %v7762_v29  ;;  %v4477_v63 = vadd.f32 %v10856_v56, %v4463_v0  ;;  %v7986_v2 = vor.u32 %v8740_v43, %v7985_v37  ;;  %v5926_v29 = vor.u32 %v8222_v60, %v5923_v15  ;;  %v8218_v25 = vld [vmem:[%s9045_s29 + $0x2cc] sm:$0xf]  ;;  %v5907_v4 = vld [vmem:[%s9045_s29 + $0x2d8] sm:$0xf0]  ;;  %v10858_v9 = vld [vmem:[#allocation18_spill] sm:$0xff] }
 0x21a   : > { %5016 = vmatpush.bf16.msra.mxu2 %v7890_v18  ;;  %v5779_v18 = vld [vmem:[%s9045_s29 + $0x1d8] sm:$0xf0]  ;;  %v8150_v44 = vld [vmem:[%s9045_s29 + $0xac] sm:$0xf]  ;;  %v5910_v22 = vor.u32 %v8218_v25, %v5907_v4  ;;  %v10861_v51 = vld [vmem:[#allocation24_spill] sm:$0xff] }
 0x21b   : > { %5030 = vmatpush.bf16.msra.mxu3 %v8018_v13  ;;  %v5323_v27 = vmax.f32 %v4477_v63, 0.0  ;;  %v8250_v13 = vld [vmem:[%s9045_s29 + $0x3cc] sm:$0xf]  ;;  %v6035_v54 = vld [vmem:[%s9045_s29 + $0x3d8] sm:$0xf0]  ;;  %v5782_v11 = vor.u32 %v8186_v12, %v5779_v18  ;;  %v893_v58 = vperm.slane %v10861_v51, 2 }
 0x21c   : > { %4989 = vmatpush.bf16.msra.mxu0 %v7618_v28  ;;  %v5635_v5 = vld [vmem:[%s9045_s29 + $0xb8] sm:$0xf0]  ;;  %v8182_v0 = vld [vmem:[%s9045_s29 + $0x1ac] sm:$0xf]  ;;  %v6038_v26 = vor.u32 %v8250_v13, %v6035_v54 }
 0x21d   : > { %5003 = vmatpush.bf16.msra.mxu1 %v7746_v30  ;;  %v5329_v21 = vpack.c.bf16 %v5324_v47, %v5323_v27  ;;  %v10857_v17 = vld [vmem:[#allocation17_spill] sm:$0xff]  ;;  %v5763_v20 = vld [vmem:[%s9045_s29 + $0x1b8] sm:$0xf0]  ;;  %v5638_v50 = vor.u32 %v8150_v44, %v5635_v5 }
 0x21e   : > { %5017 = vmatpush.bf16.msra.mxu2 %v7874_v53  ;;  %v8214_v28 = vld [vmem:[%s9045_s29 + $0x2ac] sm:$0xf]  ;;  %v5891_v30 = vld [vmem:[%s9045_s29 + $0x2b8] sm:$0xf0]  ;;  %v10860_v53 = vld [vmem:[#allocation20_spill] sm:$0xff] }
 0x21f   : > { %5031 = vmatpush.bf16.msra.mxu3 %v8002_v34  ;;  %5333 = vst [vmem:[%s10404_s6 + $0x10] sm:$0xff] %v5329_v21  ;;  %v10859_v57 = vld [vmem:[#allocation19_spill] sm:$0xff]  ;;  %v8246_v33 = vld [vmem:[%s9045_s29 + $0x3ac] sm:$0xf]  ;;  %v5766_v34 = vor.u32 %v8182_v0, %v5763_v20  ;;  %v5894_v19 = vor.u32 %v8214_v28, %v5891_v30 }
 0x220   : > { %4990 = vmatpush.bf16.msra.mxu0 %v7602_v16  ;;  %v6019_v59 = vld [vmem:[%s9045_s29 + $0x3b8] sm:$0xf0]  ;;  %v8146_v3 = vld [vmem:[%s9045_s29 + $0x8c] sm:$0xf]  ;;  %v4768_v55 = vpop.f32.mrf.mxu0 }
 0x221   : > { %5004 = vmatpush.bf16.msra.mxu1 %v7730_v14  ;;  %v5619_v37 = vld [vmem:[%s9045_s29 + $0x98] sm:$0xf0]  ;;  %v8178_v43 = vld [vmem:[%s9045_s29 + $0x18c] sm:$0xf]  ;;  %v6022_v56 = vor.u32 %v8246_v33, %v6019_v59  ;;  %v4769_v39 = vadd.f32 %v4768_v55, %v893_v58  ;;  %v4782_v60 = vpop.f32.mrf.mxu1 }
 0x222   : > { %5018 = vmatpush.bf16.msra.mxu2 %v7858_v62  ;;  %v5747_v63 = vld [vmem:[%s9045_s29 + $0x198] sm:$0xf0]  ;;  %v8210_v45 = vld [vmem:[%s9045_s29 + $0x28c] sm:$0xf]  ;;  %v5622_v16 = vor.u32 %v8146_v3, %v5619_v37 }
 0x223   : > { %5032 = vmatpush.bf16.msra.mxu3 %v7986_v2  ;;  %4991 = vmatmul.bf16.vlgmr.msra.gmra.mxu0 %v10857_v17  ;;  %v5875_v7 = vld [vmem:[%s9045_s29 + $0x298] sm:$0xf0]  ;;  %v8242_v42 = vld [vmem:[%s9045_s29 + $0x38c] sm:$0xf]  ;;  %v5750_v15 = vor.u32 %v8178_v43, %v5747_v63  ;;  %v4783_v27 = vadd.f32 %v4782_v60, %v4769_v39 }
 0x224   : > { %5039 = vmatpush.bf16.msrb.mxu0 %v5670_v6  ;;  %5005 = vmatmul.bf16.vlgmr.msra.gmra.mxu1 %v10859_v57  ;;  %v6003_v52 = vld [vmem:[%s9045_s29 + $0x398] sm:$0xf0]  ;;  %v5878_v49 = vor.u32 %v8210_v45, %v5875_v7  ;;  %v8142_v14 = vld [vmem:[%s9045_s29 + $0x6c] sm:$0xf] }
 0x225   : > { %5053 = vmatpush.bf16.msrb.mxu1 %v5798_v48  ;;  %5019 = vmatmul.bf16.vlgmr.msra.gmra.mxu2 %v10858_v9  ;;  %v5603_v62 = vld [vmem:[%s9045_s29 + $0x78] sm:$0xf0]  ;;  %v8174_v24 = vld [vmem:[%s9045_s29 + $0x16c] sm:$0xf]  ;;  %v6006_v23 = vor.u32 %v8242_v42, %v6003_v52 }
 0x226   : > { %5067 = vmatpush.bf16.msrb.mxu2 %v5926_v29  ;;  %5033 = vmatmul.bf16.vlgmr.msra.gmra.mxu3 %v10860_v53  ;;  %v5731_v2 = vld [vmem:[%s9045_s29 + $0x178] sm:$0xf0]  ;;  %v8206_v6 = vld [vmem:[%s9045_s29 + $0x26c] sm:$0xf]  ;;  %v5606_v29 = vor.u32 %v8142_v14, %v5603_v62 }
 0x227   : > { %5081 = vmatpush.bf16.msrb.mxu3 %v6054_v61  ;;  %v5859_v1 = vld [vmem:[%s9045_s29 + $0x278] sm:$0xf0]  ;;  %v8238_v47 = vld [vmem:[%s9045_s29 + $0x36c] sm:$0xf]  ;;  %v5734_v8 = vor.u32 %v8174_v24, %v5731_v2 }
 0x228   : > { %5040 = vmatpush.bf16.msrb.mxu0 %v5654_v10  ;;  %v5987_v48 = vld [vmem:[%s9045_s29 + $0x378] sm:$0xf0]  ;;  %v5862_v12 = vor.u32 %v8206_v6, %v5859_v1  ;;  %v8138_v61 = vld [vmem:[%s9045_s29 + $0x4c] sm:$0xf]  ;;  %v4796_v10 = vpop.f32.mrf.mxu2  ;;  %v4770_v5 = vpop.f32.mrf.mxu0 }
 0x229   : > { %5054 = vmatpush.bf16.msrb.mxu1 %v5782_v11  ;;  %v5587_v18 = vld [vmem:[%s9045_s29 + $0x58] sm:$0xf0]  ;;  %v8170_v25 = vld [vmem:[%s9045_s29 + $0x14c] sm:$0xf]  ;;  %v5990_v4 = vor.u32 %v8238_v47, %v5987_v48  ;;  %v4810_v0 = vpop.f32.mrf.mxu3  ;;  %v4771_v20 = vadd.f32 %v4770_v5, %v893_v58 }
 0x22a   : > { %5068 = vmatpush.bf16.msrb.mxu2 %v5910_v22  ;;  %v5715_v21 = vld [vmem:[%s9045_s29 + $0x158] sm:$0xf0]  ;;  %v8202_v13 = vld [vmem:[%s9045_s29 + $0x24c] sm:$0xf]  ;;  %v4797_v22 = vadd.f32 %v4796_v10, %v4783_v27 }
 0x22b   : > { %5082 = vmatpush.bf16.msrb.mxu3 %v6038_v26  ;;  %v5843_v54 = vld [vmem:[%s9045_s29 + $0x258] sm:$0xf0]  ;;  %v8234_v44 = vld [vmem:[%s9045_s29 + $0x34c] sm:$0xf]  ;;  %v5590_v26 = vor.u32 %v8138_v61, %v5587_v18  ;;  %v5718_v28 = vor.u32 %v8170_v25, %v5715_v21 }
 0x22c   : > { %5041 = vmatpush.bf16.msrb.mxu0 %v5638_v50  ;;  %v5971_v11 = vld [vmem:[%s9045_s29 + $0x358] sm:$0xf0]  ;;  %v5846_v30 = vor.u32 %v8202_v13, %v5843_v54  ;;  %v8134_v33 = vld [vmem:[%s9045_s29 + $0x2c] sm:$0xf]  ;;  %v10464_v51 = vadd.f32 %v4810_v0, %v4797_v22 }
 0x22d   : > { %5055 = vmatpush.bf16.msrb.mxu1 %v5766_v34  ;;  %v5571_v59 = vld [vmem:[%s9045_s29 + $0x38] sm:$0xf0]  ;;  %v8166_v50 = vld [vmem:[%s9045_s29 + $0x12c] sm:$0xf]  ;;  %v4784_v34 = vpop.f32.mrf.mxu1 }
 0x22e   : > { %5069 = vmatpush.bf16.msrb.mxu2 %v5894_v19  ;;  %v5974_v19 = vor.u32 %v8234_v44, %v5971_v11  ;;  %v5699_v3 = vld [vmem:[%s9045_s29 + $0x138] sm:$0xf0]  ;;  %v8198_v58 = vld [vmem:[%s9045_s29 + $0x22c] sm:$0xf]  ;;  %v4785_v43 = vadd.f32 %v4784_v34, %v4771_v20  ;;  %v5574_v45 = vor.u32 %v8134_v33, %v5571_v59 }
 0x22f   : > { %5083 = vmatpush.bf16.msrb.mxu3 %v6022_v56  ;;  %v5827_v37 = vld [vmem:[%s9045_s29 + $0x238] sm:$0xf0]  ;;  %v8230_v56 = vld [vmem:[%s9045_s29 + $0x32c] sm:$0xf]  ;;  %v5702_v52 = vor.u32 %v8166_v50, %v5699_v3 }
 0x230   : > { %5042 = vmatpush.bf16.msrb.mxu0 %v5622_v16  ;;  %v5955_v63 = vld [vmem:[%s9045_s29 + $0x338] sm:$0xf0]  ;;  %v8130_v7 = vld [vmem:[%s9045_s29 + $0xc] sm:$0xf]  ;;  %v5830_v55 = vor.u32 %v8198_v58, %v5827_v37  ;;  %v4798_v24 = vpop.f32.mrf.mxu2 }
 0x231   : > { %5056 = vmatpush.bf16.msrb.mxu1 %v5750_v15  ;;  %v5555_v42 = vld [vmem:[%s9045_s29 + $0x18] sm:$0xf0]  ;;  %v8162_v16 = vld [vmem:[%s9045_s29 + $0x10c] sm:$0xf]  ;;  %v5958_v15 = vor.u32 %v8230_v56, %v5955_v63  ;;  %v4799_v1 = vadd.f32 %v4798_v24, %v4785_v43 }
 0x232   : > { %5070 = vmatpush.bf16.msrb.mxu2 %v5878_v49  ;;  %v5683_v39 = vld [vmem:[%s9045_s29 + $0x118] sm:$0xf0]  ;;  %v8194_v60 = vld [vmem:[%s9045_s29 + $0x20c] sm:$0xf]  ;;  %v5558_v27 = vor.u32 %v8130_v7, %v5555_v42  ;;  %v10863_v42 = vld [vmem:[#allocation10_spill] sm:$0xff] }
 0x233   : > { %5084 = vmatpush.bf16.msrb.mxu3 %v6006_v23  ;;  %v5811_v49 = vld [vmem:[%s9045_s29 + $0x218] sm:$0xf0]  ;;  %v8226_v14 = vld [vmem:[%s9045_s29 + $0x30c] sm:$0xf] }
 0x234   : > { %5043 = vmatpush.bf16.msrb.mxu0 %v5606_v29  ;;  %v5939_v62 = vld [vmem:[%s9045_s29 + $0x318] sm:$0xf0]  ;;  %v8286_v23 = vld [vmem:[%s9045_s29 + $0x4ec] sm:$0xf]  ;;  %v5814_v61 = vor.u32 %v8194_v60, %v5811_v49 }
 0x235   : > { %5057 = vmatpush.bf16.msrb.mxu1 %v5734_v8  ;;  %v6179_v2 = vld [vmem:[%s9045_s29 + $0x4f8] sm:$0xf0]  ;;  %v8318_v6 = vld [vmem:[%s9045_s29 + $0x5ec] sm:$0xf]  ;;  %v4812_v8 = vpop.f32.mrf.mxu3  ;;  %v5942_v21 = vor.u32 %v8226_v14, %v5939_v62 }
 0x236   : > { %5071 = vmatpush.bf16.msrb.mxu2 %v5862_v12  ;;  %v6307_v47 = vld [vmem:[%s9045_s29 + $0x5f8] sm:$0xf0]  ;;  %v8350_v48 = vld [vmem:[%s9045_s29 + $0x6ec] sm:$0xf]  ;;  %v5686_v12 = vor.u32 %v8162_v16, %v5683_v39  ;;  %v6182_v13 = vor.u32 %v8286_v23, %v6179_v2  ;;  %v10865_v16 = vld [vmem:[#allocation12_spill] sm:$0xff] }
 0x237   : > { %5085 = vmatpush.bf16.msrb.mxu3 %v5990_v4  ;;  %v6435_v29 = vld [vmem:[%s9045_s29 + $0x6f8] sm:$0xf0]  ;;  %v8382_v18 = vld [vmem:[%s9045_s29 + $0x7ec] sm:$0xf]  ;;  %v10487_v4 = vadd.f32 %v4812_v8, %v4799_v1  ;;  %v6310_v54 = vor.u32 %v8318_v6, %v6307_v47 }
 0x238   : > { %5044 = vmatpush.bf16.msrb.mxu0 %v5590_v26  ;;  %v6563_v25 = vld [vmem:[%s9045_s29 + $0x7f8] sm:$0xf0]  ;;  %v6438_v10 = vor.u32 %v8350_v48, %v6435_v29  ;;  %v8282_v44 = vld [vmem:[%s9045_s29 + $0x4cc] sm:$0xf] }
 0x239   : > { %5058 = vmatpush.bf16.msrb.mxu1 %v5718_v28  ;;  %v6163_v11 = vld [vmem:[%s9045_s29 + $0x4d8] sm:$0xf0]  ;;  %v8314_v22 = vld [vmem:[%s9045_s29 + $0x5cc] sm:$0xf]  ;;  %v6566_v5 = vor.u32 %v8382_v18, %v6563_v25 }
 0x23a   : > { %5072 = vmatpush.bf16.msrb.mxu2 %v5846_v30  ;;  %v6291_v0 = vld [vmem:[%s9045_s29 + $0x5d8] sm:$0xf0]  ;;  %v8346_v26 = vld [vmem:[%s9045_s29 + $0x6cc] sm:$0xf]  ;;  %v6166_v33 = vor.u32 %v8282_v44, %v6163_v11 }
 0x23b   : > { %5086 = vmatpush.bf16.msrb.mxu3 %v5974_v19  ;;  %v6419_v20 = vld [vmem:[%s9045_s29 + $0x6d8] sm:$0xf0]  ;;  %v8378_v28 = vld [vmem:[%s9045_s29 + $0x7cc] sm:$0xf]  ;;  %v6294_v59 = vor.u32 %v8314_v22, %v6291_v0 }
 0x23c   : > { %5045 = vmatpush.bf16.msrb.mxu0 %v5574_v45  ;;  %v6547_v30 = vld [vmem:[%s9045_s29 + $0x7d8] sm:$0xf0]  ;;  %v6422_v50 = vor.u32 %v8346_v26, %v6419_v20  ;;  %v8278_v34 = vld [vmem:[%s9045_s29 + $0x4ac] sm:$0xf] }
 0x23d   : > { %5059 = vmatpush.bf16.msrb.mxu1 %v5702_v52  ;;  %v6147_v19 = vld [vmem:[%s9045_s29 + $0x4b8] sm:$0xf0]  ;;  %v8310_v3 = vld [vmem:[%s9045_s29 + $0x5ac] sm:$0xf]  ;;  %v6550_v58 = vor.u32 %v8378_v28, %v6547_v30 }
 0x23e   : > { %5073 = vmatpush.bf16.msrb.mxu2 %v5830_v55  ;;  %v6275_v37 = vld [vmem:[%s9045_s29 + $0x5b8] sm:$0xf0]  ;;  %v8342_v43 = vld [vmem:[%s9045_s29 + $0x6ac] sm:$0xf]  ;;  %v6150_v55 = vor.u32 %v8278_v34, %v6147_v19 }
 0x23f   : > { %5087 = vmatpush.bf16.msrb.mxu3 %v5958_v15  ;;  %v6403_v56 = vld [vmem:[%s9045_s29 + $0x6b8] sm:$0xf0]  ;;  %v10862_v63 = vld [vmem:[#allocation9_spill] sm:$0xff]  ;;  %v6278_v39 = vor.u32 %v8310_v3, %v6275_v37 }
 0x240   : > { %5046 = vmatpush.bf16.msrb.mxu0 %v5558_v27  ;;  %v8374_v45 = vld [vmem:[%s9045_s29 + $0x7ac] sm:$0xf]  ;;  %v6531_v7 = vld [vmem:[%s9045_s29 + $0x7b8] sm:$0xf0]  ;;  %v6406_v60 = vor.u32 %v8342_v43, %v6403_v56  ;;  %v4824_v6 = vpop.f32.mrf.mxu0 }
 0x241   : > { %5060 = vmatpush.bf16.msrb.mxu1 %v5686_v12  ;;  %v10864_v52 = vld [vmem:[#allocation11_spill] sm:$0xff]  ;;  %v8274_v15 = vld [vmem:[%s9045_s29 + $0x48c] sm:$0xf]  ;;  %v6534_v62 = vor.u32 %v8374_v45, %v6531_v7  ;;  %v4825_v47 = vadd.f32 %v4824_v6, %v10464_v51  ;;  %v4838_v29 = vpop.f32.mrf.mxu1 }
 0x242   : > { %5074 = vmatpush.bf16.msrb.mxu2 %v5814_v61  ;;  %v6131_v49 = vld [vmem:[%s9045_s29 + $0x498] sm:$0xf0]  ;;  %v8306_v14 = vld [vmem:[%s9045_s29 + $0x58c] sm:$0xf] }
 0x243   : > { %5088 = vmatpush.bf16.msrb.mxu3 %v5942_v21  ;;  %5047 = vmatmul.bf16.vlgmr.msrb.gmra.mxu0 %v10862_v63  ;;  %v6259_v24 = vld [vmem:[%s9045_s29 + $0x598] sm:$0xf0]  ;;  %v8338_v23 = vld [vmem:[%s9045_s29 + $0x68c] sm:$0xf]  ;;  %v6134_v48 = vor.u32 %v8274_v15, %v6131_v49 }
 0x244   : > { %5095 = vmatpush.bf16.msra.mxu0 %v6182_v13  ;;  %5061 = vmatmul.bf16.vlgmr.msrb.gmra.mxu1 %v10864_v52  ;;  %v6387_v2 = vld [vmem:[%s9045_s29 + $0x698] sm:$0xf0]  ;;  %v8370_v1 = vld [vmem:[%s9045_s29 + $0x78c] sm:$0xf]  ;;  %v6262_v8 = vor.u32 %v8306_v14, %v6259_v24  ;;  %v4839_v13 = vadd.f32 %v4838_v29, %v4825_v47 }
 0x245   : > { %5109 = vmatpush.bf16.msra.mxu1 %v6310_v54  ;;  %5075 = vmatmul.bf16.vlgmr.msrb.gmra.mxu2 %v10863_v42  ;;  %v6515_v27 = vld [vmem:[%s9045_s29 + $0x798] sm:$0xf0]  ;;  %v6390_v12 = vor.u32 %v8338_v23, %v6387_v2  ;;  %v8270_v61 = vld [vmem:[%s9045_s29 + $0x46c] sm:$0xf] }
 0x246   : > { %5123 = vmatpush.bf16.msra.mxu2 %v6438_v10  ;;  %5089 = vmatmul.bf16.vlgmr.msrb.gmra.mxu3 %v10865_v16  ;;  %v6115_v18 = vld [vmem:[%s9045_s29 + $0x478] sm:$0xf0]  ;;  %v8302_v25 = vld [vmem:[%s9045_s29 + $0x56c] sm:$0xf]  ;;  %v6518_v21 = vor.u32 %v8370_v1, %v6515_v27 }
 0x247   : > { %5137 = vmatpush.bf16.msra.mxu3 %v6566_v5  ;;  %v6243_v54 = vld [vmem:[%s9045_s29 + $0x578] sm:$0xf0]  ;;  %v8334_v10 = vld [vmem:[%s9045_s29 + $0x66c] sm:$0xf]  ;;  %v6118_v22 = vor.u32 %v8270_v61, %v6115_v18 }
 0x248   : > { %5096 = vmatpush.bf16.msra.mxu0 %v6166_v33  ;;  %v6371_v51 = vld [vmem:[%s9045_s29 + $0x678] sm:$0xf0]  ;;  %v8366_v44 = vld [vmem:[%s9045_s29 + $0x76c] sm:$0xf]  ;;  %v6246_v5 = vor.u32 %v8302_v25, %v6243_v54  ;;  %v4852_v33 = vpop.f32.mrf.mxu2  ;;  %v4826_v3 = vpop.f32.mrf.mxu0 }
 0x249   : > { %5110 = vmatpush.bf16.msra.mxu1 %v6294_v59  ;;  %v6499_v11 = vld [vmem:[%s9045_s29 + $0x778] sm:$0xf0]  ;;  %v6374_v0 = vor.u32 %v8334_v10, %v6371_v51  ;;  %v8266_v26 = vld [vmem:[%s9045_s29 + $0x44c] sm:$0xf]  ;;  %v4853_v19 = vadd.f32 %v4852_v33, %v4839_v13  ;;  %v4827_v56 = vadd.f32 %v4826_v3, %v10487_v4  ;;  %v4840_v45 = vpop.f32.mrf.mxu1 }
 0x24a   : > { %5124 = vmatpush.bf16.msra.mxu2 %v6422_v50  ;;  %v6099_v20 = vld [vmem:[%s9045_s29 + $0x458] sm:$0xf0]  ;;  %v8298_v28 = vld [vmem:[%s9045_s29 + $0x54c] sm:$0xf]  ;;  %v6502_v30 = vor.u32 %v8366_v44, %v6499_v11 }
 0x24b   : > { %5138 = vmatpush.bf16.msra.mxu3 %v6550_v58  ;;  %v6227_v59 = vld [vmem:[%s9045_s29 + $0x558] sm:$0xf0]  ;;  %v8330_v50 = vld [vmem:[%s9045_s29 + $0x64c] sm:$0xf]  ;;  %v4866_v58 = vpop.f32.mrf.mxu3  ;;  %v6102_v63 = vor.u32 %v8266_v26, %v6099_v20  ;;  %v4841_v4 = vadd.f32 %v4840_v45, %v4827_v56 }
 0x24c   : > { %5097 = vmatpush.bf16.msra.mxu0 %v6150_v55  ;;  %v6355_v34 = vld [vmem:[%s9045_s29 + $0x658] sm:$0xf0]  ;;  %v8362_v37 = vld [vmem:[%s9045_s29 + $0x74c] sm:$0xf]  ;;  %v10535_v7 = vadd.f32 %v4866_v58, %v4853_v19  ;;  %v6230_v42 = vor.u32 %v8298_v28, %v6227_v59 }
 0x24d   : > { %5111 = vmatpush.bf16.msra.mxu1 %v6278_v39  ;;  %v6483_v43 = vld [vmem:[%s9045_s29 + $0x758] sm:$0xf0]  ;;  %v6358_v52 = vor.u32 %v8330_v50, %v6355_v34  ;;  %v8262_v55 = vld [vmem:[%s9045_s29 + $0x42c] sm:$0xf] }
 0x24e   : > { %5125 = vmatpush.bf16.msra.mxu2 %v6406_v60  ;;  %v6083_v16 = vld [vmem:[%s9045_s29 + $0x438] sm:$0xf0]  ;;  %v8294_v39 = vld [vmem:[%s9045_s29 + $0x52c] sm:$0xf]  ;;  %v6486_v60 = vor.u32 %v8362_v37, %v6483_v43 }
 0x24f   : > { %5139 = vmatpush.bf16.msra.mxu3 %v6534_v62  ;;  %v6211_v15 = vld [vmem:[%s9045_s29 + $0x538] sm:$0xf0]  ;;  %v8326_v49 = vld [vmem:[%s9045_s29 + $0x62c] sm:$0xf]  ;;  %v6086_v23 = vor.u32 %v8262_v55, %v6083_v16 }
 0x250   : > { %5098 = vmatpush.bf16.msra.mxu0 %v6134_v48  ;;  %v6339_v14 = vld [vmem:[%s9045_s29 + $0x638] sm:$0xf0]  ;;  %v8358_v62 = vld [vmem:[%s9045_s29 + $0x72c] sm:$0xf]  ;;  %v6214_v1 = vor.u32 %v8294_v39, %v6211_v15 }
 0x251   : > { %5112 = vmatpush.bf16.msra.mxu1 %v6262_v8  ;;  %v6467_v24 = vld [vmem:[%s9045_s29 + $0x738] sm:$0xf0]  ;;  %v8258_v2 = vld [vmem:[%s9045_s29 + $0x40c] sm:$0xf]  ;;  %v6342_v27 = vor.u32 %v8326_v49, %v6339_v14 }
 0x252   : > { %5126 = vmatpush.bf16.msra.mxu2 %v6390_v12  ;;  %v6067_v6 = vld [vmem:[%s9045_s29 + $0x418] sm:$0xf0]  ;;  %v8290_v47 = vld [vmem:[%s9045_s29 + $0x50c] sm:$0xf]  ;;  %v6470_v8 = vor.u32 %v8358_v62, %v6467_v24  ;;  %v4854_v12 = vpop.f32.mrf.mxu2 }
 0x253   : > { %5140 = vmatpush.bf16.msra.mxu3 %v6518_v21  ;;  %v6195_v48 = vld [vmem:[%s9045_s29 + $0x518] sm:$0xf0]  ;;  %v8322_v29 = vld [vmem:[%s9045_s29 + $0x60c] sm:$0xf]  ;;  %v4855_v21 = vadd.f32 %v4854_v12, %v4841_v4  ;;  %v4868_v13 = vpop.f32.mrf.mxu3  ;;  %v6070_v44 = vor.u32 %v8258_v2, %v6067_v6 }
 0x254   : > { %5099 = vmatpush.bf16.msra.mxu0 %v6118_v22  ;;  %v6323_v61 = vld [vmem:[%s9045_s29 + $0x618] sm:$0xf0]  ;;  %v8354_v18 = vld [vmem:[%s9045_s29 + $0x70c] sm:$0xf]  ;;  %v6198_v26 = vor.u32 %v8290_v47, %v6195_v48 }
 0x255   : > { %5113 = vmatpush.bf16.msra.mxu1 %v6246_v5  ;;  %v6451_v25 = vld [vmem:[%s9045_s29 + $0x718] sm:$0xf0]  ;;  %v8414_v54 = vld [vmem:[%s9045_s29 + $0x8ec] sm:$0xf]  ;;  %v6326_v20 = vor.u32 %v8322_v29, %v6323_v61 }
 0x256   : > { %5127 = vmatpush.bf16.msra.mxu2 %v6374_v0  ;;  %v6691_v10 = vld [vmem:[%s9045_s29 + $0x8f8] sm:$0xf0]  ;;  %v8446_v51 = vld [vmem:[%s9045_s29 + $0x9ec] sm:$0xf]  ;;  %v10559_v0 = vadd.f32 %v4868_v13, %v4855_v21  ;;  %v6454_v33 = vor.u32 %v8354_v18, %v6451_v25 }
 0x257   : > { %5141 = vmatpush.bf16.msra.mxu3 %v6502_v30  ;;  %v6819_v11 = vld [vmem:[%s9045_s29 + $0x9f8] sm:$0xf0]  ;;  %v8478_v22 = vld [vmem:[%s9045_s29 + $0xaec] sm:$0xf]  ;;  %v6694_v59 = vor.u32 %v8414_v54, %v6691_v10 }
 0x258   : > { %5100 = vmatpush.bf16.msra.mxu0 %v6102_v63  ;;  %v6947_v5 = vld [vmem:[%s9045_s29 + $0xaf8] sm:$0xf0]  ;;  %v8510_v28 = vld [vmem:[%s9045_s29 + $0xbec] sm:$0xf]  ;;  %v6822_v50 = vor.u32 %v8446_v51, %v6819_v11 }
 0x259   : > { %5114 = vmatpush.bf16.msra.mxu1 %v6230_v42  ;;  %v7075_v30 = vld [vmem:[%s9045_s29 + $0xbf8] sm:$0xf0]  ;;  %v6950_v34 = vor.u32 %v8478_v22, %v6947_v5  ;;  %v8410_v19 = vld [vmem:[%s9045_s29 + $0x8cc] sm:$0xf] }
 0x25a   : > { %5128 = vmatpush.bf16.msra.mxu2 %v6358_v52  ;;  %v6675_v3 = vld [vmem:[%s9045_s29 + $0x8d8] sm:$0xf0]  ;;  %v8442_v58 = vld [vmem:[%s9045_s29 + $0x9cc] sm:$0xf]  ;;  %v7078_v37 = vor.u32 %v8510_v28, %v7075_v30 }
 0x25b   : > { %5142 = vmatpush.bf16.msra.mxu3 %v6486_v60  ;;  %v6803_v43 = vld [vmem:[%s9045_s29 + $0x9d8] sm:$0xf0]  ;;  %v8474_v56 = vld [vmem:[%s9045_s29 + $0xacc] sm:$0xf]  ;;  %v6678_v52 = vor.u32 %v8410_v19, %v6675_v3 }
 0x25c   : > { %5101 = vmatpush.bf16.msra.mxu0 %v6086_v23  ;;  %v6931_v63 = vld [vmem:[%s9045_s29 + $0xad8] sm:$0xf0]  ;;  %v8506_v45 = vld [vmem:[%s9045_s29 + $0xbcc] sm:$0xf]  ;;  %v6806_v55 = vor.u32 %v8442_v58, %v6803_v43  ;;  %v10867_v23 = vld [vmem:[#allocation14_spill] sm:$0xff] }
 0x25d   : > { %5115 = vmatpush.bf16.msra.mxu1 %v6214_v1  ;;  %v7059_v42 = vld [vmem:[%s9045_s29 + $0xbd8] sm:$0xf0]  ;;  %v6934_v16 = vor.u32 %v8474_v56, %v6931_v63  ;;  %v8406_v39 = vld [vmem:[%s9045_s29 + $0x8ac] sm:$0xf] }
 0x25e   : > { %5129 = vmatpush.bf16.msra.mxu2 %v6342_v27  ;;  %v6659_v60 = vld [vmem:[%s9045_s29 + $0x8b8] sm:$0xf0]  ;;  %v8438_v4 = vld [vmem:[%s9045_s29 + $0x9ac] sm:$0xf]  ;;  %v7062_v49 = vor.u32 %v8506_v45, %v7059_v42  ;;  %v10869_v27 = vld [vmem:[#allocation16_spill] sm:$0xff] }
 0x25f   : > { %5143 = vmatpush.bf16.msra.mxu3 %v6470_v8  ;;  %v10866_v15 = vld [vmem:[#allocation13_spill] sm:$0xff]  ;;  %v6787_v14 = vld [vmem:[%s9045_s29 + $0x9b8] sm:$0xf0]  ;;  %v6662_v47 = vor.u32 %v8406_v39, %v6659_v60 }
 0x260   : > { %5102 = vmatpush.bf16.msra.mxu0 %v6070_v44  ;;  %v8470_v62 = vld [vmem:[%s9045_s29 + $0xaac] sm:$0xf]  ;;  %v6915_v24 = vld [vmem:[%s9045_s29 + $0xab8] sm:$0xf0]  ;;  %v6790_v48 = vor.u32 %v8438_v4, %v6787_v14  ;;  %v4880_v54 = vpop.f32.mrf.mxu0 }
 0x261   : > { %5116 = vmatpush.bf16.msra.mxu1 %v6198_v26  ;;  %v10868_v2 = vld [vmem:[#allocation15_spill] sm:$0xff]  ;;  %v8502_v6 = vld [vmem:[%s9045_s29 + $0xbac] sm:$0xf]  ;;  %v6918_v29 = vor.u32 %v8470_v62, %v6915_v24  ;;  %v4881_v44 = vadd.f32 %v4880_v54, %v10535_v7  ;;  %v4894_v22 = vpop.f32.mrf.mxu1 }
 0x262   : > { %5130 = vmatpush.bf16.msra.mxu2 %v6326_v20  ;;  %v7043_v1 = vld [vmem:[%s9045_s29 + $0xbb8] sm:$0xf0]  ;;  %v8402_v8 = vld [vmem:[%s9045_s29 + $0x88c] sm:$0xf] }
 0x263   : > { %5144 = vmatpush.bf16.msra.mxu3 %v6454_v33  ;;  %5103 = vmatmul.bf16.vlgmr.msra.gmra.mxu0 %v10866_v15  ;;  %v6643_v12 = vld [vmem:[%s9045_s29 + $0x898] sm:$0xf0]  ;;  %v8434_v61 = vld [vmem:[%s9045_s29 + $0x98c] sm:$0xf]  ;;  %v7046_v18 = vor.u32 %v8502_v6, %v7043_v1 }
 0x264   : > { %5151 = vmatpush.bf16.msrb.mxu0 %v6694_v59  ;;  %5117 = vmatmul.bf16.vlgmr.msra.gmra.mxu1 %v10868_v2  ;;  %v6771_v25 = vld [vmem:[%s9045_s29 + $0x998] sm:$0xf0]  ;;  %v8466_v21 = vld [vmem:[%s9045_s29 + $0xa8c] sm:$0xf]  ;;  %v6646_v11 = vor.u32 %v8402_v8, %v6643_v12  ;;  %v4895_v59 = vadd.f32 %v4894_v22, %v4881_v44 }
 0x265   : > { %5165 = vmatpush.bf16.msrb.mxu1 %v6822_v50  ;;  %5131 = vmatmul.bf16.vlgmr.msra.gmra.mxu2 %v10867_v23  ;;  %v6899_v13 = vld [vmem:[%s9045_s29 + $0xa98] sm:$0xf0]  ;;  %v8498_v10 = vld [vmem:[%s9045_s29 + $0xb8c] sm:$0xf]  ;;  %v6774_v5 = vor.u32 %v8434_v61, %v6771_v25 }
 0x266   : > { %5179 = vmatpush.bf16.msrb.mxu2 %v6950_v34  ;;  %5145 = vmatmul.bf16.vlgmr.msra.gmra.mxu3 %v10869_v27  ;;  %v7027_v51 = vld [vmem:[%s9045_s29 + $0xb98] sm:$0xf0]  ;;  %v6902_v26 = vor.u32 %v8466_v21, %v6899_v13  ;;  %v8398_v20 = vld [vmem:[%s9045_s29 + $0x86c] sm:$0xf] }
 0x267   : > { %5193 = vmatpush.bf16.msrb.mxu3 %v7078_v37  ;;  %v6627_v28 = vld [vmem:[%s9045_s29 + $0x878] sm:$0xf0]  ;;  %v8430_v30 = vld [vmem:[%s9045_s29 + $0x96c] sm:$0xf]  ;;  %v7030_v33 = vor.u32 %v8498_v10, %v7027_v51 }
 0x268   : > { %5152 = vmatpush.bf16.msrb.mxu0 %v6678_v52  ;;  %v6755_v50 = vld [vmem:[%s9045_s29 + $0x978] sm:$0xf0]  ;;  %v8462_v34 = vld [vmem:[%s9045_s29 + $0xa6c] sm:$0xf]  ;;  %v6630_v58 = vor.u32 %v8398_v20, %v6627_v28  ;;  %v4908_v52 = vpop.f32.mrf.mxu2  ;;  %v4882_v4 = vpop.f32.mrf.mxu0 }
 0x269   : > { %5166 = vmatpush.bf16.msrb.mxu1 %v6806_v55  ;;  %v6883_v7 = vld [vmem:[%s9045_s29 + $0xa78] sm:$0xf0]  ;;  %v8494_v19 = vld [vmem:[%s9045_s29 + $0xb6c] sm:$0xf]  ;;  %v6758_v37 = vor.u32 %v8430_v30, %v6755_v50  ;;  %v4909_v60 = vadd.f32 %v4908_v52, %v4895_v59  ;;  %v4922_v15 = vpop.f32.mrf.mxu3  ;;  %v4883_v62 = vadd.f32 %v4882_v4, %v10559_v0  ;;  %v4896_v23 = vpop.f32.mrf.mxu1 }
 0x26a   : > { %5180 = vmatpush.bf16.msrb.mxu2 %v6934_v16  ;;  %v7011_v3 = vld [vmem:[%s9045_s29 + $0xb78] sm:$0xf0]  ;;  %v6886_v43 = vor.u32 %v8462_v34, %v6883_v7  ;;  %v8394_v56 = vld [vmem:[%s9045_s29 + $0x84c] sm:$0xf] }
 0x26b   : > { %5194 = vmatpush.bf16.msrb.mxu3 %v7062_v49  ;;  %v6611_v63 = vld [vmem:[%s9045_s29 + $0x858] sm:$0xf0]  ;;  %v8426_v45 = vld [vmem:[%s9045_s29 + $0x94c] sm:$0xf]  ;;  %v7014_v42 = vor.u32 %v8494_v19, %v7011_v3  ;;  %v10609_v2 = vadd.f32 %v4922_v15, %v4909_v60  ;;  %v4897_v0 = vadd.f32 %v4896_v23, %v4883_v62 }
 0x26c   : > { %5153 = vmatpush.bf16.msrb.mxu0 %v6662_v47  ;;  %v6739_v55 = vld [vmem:[%s9045_s29 + $0x958] sm:$0xf0]  ;;  %v8458_v16 = vld [vmem:[%s9045_s29 + $0xa4c] sm:$0xf]  ;;  %v6614_v24 = vor.u32 %v8394_v56, %v6611_v63 }
 0x26d   : > { %5167 = vmatpush.bf16.msrb.mxu1 %v6790_v48  ;;  %v6867_v39 = vld [vmem:[%s9045_s29 + $0xa58] sm:$0xf0]  ;;  %v8490_v49 = vld [vmem:[%s9045_s29 + $0xb4c] sm:$0xf]  ;;  %v6742_v6 = vor.u32 %v8426_v45, %v6739_v55 }
 0x26e   : > { %5181 = vmatpush.bf16.msrb.mxu2 %v6918_v29  ;;  %v6995_v14 = vld [vmem:[%s9045_s29 + $0xb58] sm:$0xf0]  ;;  %v6870_v1 = vor.u32 %v8458_v16, %v6867_v39  ;;  %v8390_v27 = vld [vmem:[%s9045_s29 + $0x82c] sm:$0xf] }
 0x26f   : > { %5195 = vmatpush.bf16.msrb.mxu3 %v7046_v18  ;;  %v6595_v47 = vld [vmem:[%s9045_s29 + $0x838] sm:$0xf0]  ;;  %v8422_v48 = vld [vmem:[%s9045_s29 + $0x92c] sm:$0xf]  ;;  %v6998_v29 = vor.u32 %v8490_v49, %v6995_v14 }
 0x270   : > { %5154 = vmatpush.bf16.msrb.mxu0 %v6646_v11  ;;  %v6723_v8 = vld [vmem:[%s9045_s29 + $0x938] sm:$0xf0]  ;;  %v8454_v12 = vld [vmem:[%s9045_s29 + $0xa2c] sm:$0xf]  ;;  %v6598_v21 = vor.u32 %v8390_v27, %v6595_v47 }
 0x271   : > { %5168 = vmatpush.bf16.msrb.mxu1 %v6774_v5  ;;  %v6851_v61 = vld [vmem:[%s9045_s29 + $0xa38] sm:$0xf0]  ;;  %v8486_v18 = vld [vmem:[%s9045_s29 + $0xb2c] sm:$0xf]  ;;  %v6726_v10 = vor.u32 %v8422_v48, %v6723_v8  ;;  %v4924_v59 = vpop.f32.mrf.mxu3 }
 0x272   : > { %5182 = vmatpush.bf16.msrb.mxu2 %v6902_v26  ;;  %v6979_v25 = vld [vmem:[%s9045_s29 + $0xb38] sm:$0xf0]  ;;  %v8386_v13 = vld [vmem:[%s9045_s29 + $0x80c] sm:$0xf]  ;;  %v6854_v51 = vor.u32 %v8454_v12, %v6851_v61  ;;  %v4910_v26 = vpop.f32.mrf.mxu2 }
 0x273   : > { %5196 = vmatpush.bf16.msrb.mxu3 %v7030_v33  ;;  %v6579_v54 = vld [vmem:[%s9045_s29 + $0x818] sm:$0xf0]  ;;  %v8418_v44 = vld [vmem:[%s9045_s29 + $0x90c] sm:$0xf]  ;;  %v6982_v5 = vor.u32 %v8486_v18, %v6979_v25  ;;  %v4911_v33 = vadd.f32 %v4910_v26, %v4897_v0 }
 0x274   : > { %5155 = vmatpush.bf16.msrb.mxu0 %v6630_v58  ;;  %v6707_v11 = vld [vmem:[%s9045_s29 + $0x918] sm:$0xf0]  ;;  %v8450_v22 = vld [vmem:[%s9045_s29 + $0xa0c] sm:$0xf]  ;;  %v6582_v19 = vor.u32 %v8386_v13, %v6579_v54 }
 0x275   : > { %5169 = vmatpush.bf16.msrb.mxu1 %v6758_v37  ;;  %v6835_v20 = vld [vmem:[%s9045_s29 + $0xa18] sm:$0xf0]  ;;  %v8482_v28 = vld [vmem:[%s9045_s29 + $0xb0c] sm:$0xf]  ;;  %v6710_v56 = vor.u32 %v8418_v44, %v6707_v11 }
 0x276   : > { %5183 = vmatpush.bf16.msrb.mxu2 %v6886_v43  ;;  %v6963_v30 = vld [vmem:[%s9045_s29 + $0xb18] sm:$0xf0]  ;;  %v8542_v50 = vld [vmem:[%s9045_s29 + $0xcec] sm:$0xf]  ;;  %v10633_v43 = vadd.f32 %v4924_v59, %v4911_v33  ;;  %v6838_v63 = vor.u32 %v8450_v22, %v6835_v20 }
 0x277   : > { %5197 = vmatpush.bf16.msrb.mxu3 %v7014_v42  ;;  %v7203_v34 = vld [vmem:[%s9045_s29 + $0xcf8] sm:$0xf0]  ;;  %v8574_v7 = vld [vmem:[%s9045_s29 + $0xdec] sm:$0xf]  ;;  %v6966_v52 = vor.u32 %v8482_v28, %v6963_v30 }
 0x278   : > { %5156 = vmatpush.bf16.msrb.mxu0 %v6614_v24  ;;  %v7331_v3 = vld [vmem:[%s9045_s29 + $0xdf8] sm:$0xf0]  ;;  %v8606_v58 = vld [vmem:[%s9045_s29 + $0xeec] sm:$0xf]  ;;  %v7206_v55 = vor.u32 %v8542_v50, %v7203_v34 }
 0x279   : > { %5170 = vmatpush.bf16.msrb.mxu1 %v6742_v6  ;;  %v7459_v37 = vld [vmem:[%s9045_s29 + $0xef8] sm:$0xf0]  ;;  %v8638_v45 = vld [vmem:[%s9045_s29 + $0xfec] sm:$0xf]  ;;  %v7334_v16 = vor.u32 %v8574_v7, %v7331_v3 }
 0x27a   : > { %5184 = vmatpush.bf16.msrb.mxu2 %v6870_v1  ;;  %v7587_v42 = vld [vmem:[%s9045_s29 + $0xff8] sm:$0xf0]  ;;  %v7462_v39 = vor.u32 %v8606_v58, %v7459_v37  ;;  %v8538_v60 = vld [vmem:[%s9045_s29 + $0xccc] sm:$0xf] }
 0x27b   : > { %5198 = vmatpush.bf16.msrb.mxu3 %v6998_v29  ;;  %v7187_v4 = vld [vmem:[%s9045_s29 + $0xcd8] sm:$0xf0]  ;;  %v8570_v15 = vld [vmem:[%s9045_s29 + $0xdcc] sm:$0xf]  ;;  %v7590_v49 = vor.u32 %v8638_v45, %v7587_v42 }
 0x27c   : > { %5157 = vmatpush.bf16.msrb.mxu0 %v6598_v21  ;;  %v7315_v14 = vld [vmem:[%s9045_s29 + $0xdd8] sm:$0xf0]  ;;  %v8602_v62 = vld [vmem:[%s9045_s29 + $0xecc] sm:$0xf]  ;;  %v7190_v1 = vor.u32 %v8538_v60, %v7187_v4 }
 0x27d   : > { %5171 = vmatpush.bf16.msrb.mxu1 %v6726_v10  ;;  %v7443_v24 = vld [vmem:[%s9045_s29 + $0xed8] sm:$0xf0]  ;;  %v8634_v23 = vld [vmem:[%s9045_s29 + $0xfcc] sm:$0xf]  ;;  %v7318_v27 = vor.u32 %v8570_v15, %v7315_v14 }
 0x27e   : > { %5185 = vmatpush.bf16.msrb.mxu2 %v6854_v51  ;;  %v7571_v6 = vld [vmem:[%s9045_s29 + $0xfd8] sm:$0xf0]  ;;  %v7446_v47 = vor.u32 %v8602_v62, %v7443_v24  ;;  %v8534_v48 = vld [vmem:[%s9045_s29 + $0xcac] sm:$0xf] }
 0x27f   : > { %5199 = vmatpush.bf16.msrb.mxu3 %v6982_v5  ;;  %v7171_v29 = vld [vmem:[%s9045_s29 + $0xcb8] sm:$0xf0]  ;;  %v8566_v0 = vld [vmem:[%s9045_s29 + $0xdac] sm:$0xf]  ;;  %v7574_v8 = vor.u32 %v8634_v23, %v7571_v6 }
 0x280   : > { %5158 = vmatpush.bf16.msrb.mxu0 %v6582_v19  ;;  %v7299_v12 = vld [vmem:[%s9045_s29 + $0xdb8] sm:$0xf0]  ;;  %v8598_v61 = vld [vmem:[%s9045_s29 + $0xeac] sm:$0xf] }
 0x281   : > { %5172 = vmatpush.bf16.msrb.mxu1 %v6710_v56  ;;  %v7427_v18 = vld [vmem:[%s9045_s29 + $0xeb8] sm:$0xf0]  ;;  %v8630_v25 = vld [vmem:[%s9045_s29 + $0xfac] sm:$0xf]  ;;  %v7302_v13 = vor.u32 %v8566_v0, %v7299_v12  ;;  %v4950_v30 = vpop.f32.mrf.mxu1 }
 0x282   : > { %5186 = vmatpush.bf16.msrb.mxu2 %v6838_v63  ;;  %v7555_v21 = vld [vmem:[%s9045_s29 + $0xfb8] sm:$0xf0]  ;;  %v7430_v54 = vor.u32 %v8598_v61, %v7427_v18  ;;  %v8530_v10 = vld [vmem:[%s9045_s29 + $0xc8c] sm:$0xf] }
 0x283   : > { %5200 = vmatpush.bf16.msrb.mxu3 %v6966_v52  ;;  %5159 = vmatmul.bf16.vlgmr.msrb.gmra.mxu0 %v9358_v31  ;;  %v7174_v31 = vor.u32 %v8534_v48, %v7171_v29  ;;  %v7155_v51 = vld [vmem:[%s9045_s29 + $0xc98] sm:$0xf0]  ;;  %v8594_v11 = vld [vmem:[%s9045_s29 + $0xe8c] sm:$0xf] }
 0x284   : > { %5207 = vmatpush.bf16.msra.mxu0 %v7206_v55  ;;  %5173 = vmatmul.bf16.vlgmr.msrb.gmra.mxu1 %v9365_v36  ;;  %v7558_v36 = vor.u32 %v8630_v25, %v7555_v21  ;;  %v7283_v44 = vld [vmem:[%s9045_s29 + $0xd98] sm:$0xf0]  ;;  %v8626_v5 = vld [vmem:[%s9045_s29 + $0xf8c] sm:$0xf]  ;;  %v7158_v28 = vor.u32 %v8530_v10, %v7155_v51 }
 0x285   : > { %5221 = vmatpush.bf16.msra.mxu1 %v7334_v16  ;;  %5187 = vmatmul.bf16.vlgmr.msrb.gmra.mxu2 %v9363_v35  ;;  %v8562_v35 = vld [vmem:[%s9045_s29 + $0xd8c] sm:$0xf]  ;;  %v7411_v22 = vld [vmem:[%s9045_s29 + $0xe98] sm:$0xf0] }
 0x286   : > { %5235 = vmatpush.bf16.msra.mxu2 %v7462_v39  ;;  %5201 = vmatmul.bf16.vlgmr.msrb.gmra.mxu3 %v9369_v40  ;;  %v4936_v40 = vpop.f32.mrf.mxu0  ;;  %v7539_v26 = vld [vmem:[%s9045_s29 + $0xf98] sm:$0xf0]  ;;  %v7286_v33 = vor.u32 %v8562_v35, %v7283_v44  ;;  %v7414_v59 = vor.u32 %v8594_v11, %v7411_v22  ;;  %v8526_v50 = vld [vmem:[%s9045_s29 + $0xc6c] sm:$0xf] }
 0x287   : > { %5249 = vmatpush.bf16.msra.mxu3 %v7590_v49  ;;  %v4937_v20 = vadd.f32 %v4936_v40, %v10609_v2  ;;  %v7139_v34 = vld [vmem:[%s9045_s29 + $0xc78] sm:$0xf0]  ;;  %v8558_v7 = vld [vmem:[%s9045_s29 + $0xd6c] sm:$0xf]  ;;  %v7542_v19 = vor.u32 %v8626_v5, %v7539_v26 }
 0x288   : > { %5208 = vmatpush.bf16.msra.mxu0 %v7190_v1  ;;  %v7267_v58 = vld [vmem:[%s9045_s29 + $0xd78] sm:$0xf0]  ;;  %v8590_v37 = vld [vmem:[%s9045_s29 + $0xe6c] sm:$0xf]  ;;  %v7142_v45 = vor.u32 %v8526_v50, %v7139_v34  ;;  %v4964_v4 = vpop.f32.mrf.mxu2 }
 0x289   : > { %5222 = vmatpush.bf16.msra.mxu1 %v7318_v27  ;;  %v4951_v3 = vadd.f32 %v4950_v30, %v4937_v20  ;;  %v7395_v2 = vld [vmem:[%s9045_s29 + $0xe78] sm:$0xf0]  ;;  %v8622_v56 = vld [vmem:[%s9045_s29 + $0xf6c] sm:$0xf]  ;;  %v7270_v42 = vor.u32 %v8558_v7, %v7267_v58  ;;  %v4978_v23 = vpop.f32.mrf.mxu3  ;;  %v4952_v48 = vpop.f32.mrf.mxu1 }
 0x28a   : > { %5236 = vmatpush.bf16.msra.mxu2 %v7446_v47  ;;  %v7523_v63 = vld [vmem:[%s9045_s29 + $0xf78] sm:$0xf0]  ;;  %v7398_v52 = vor.u32 %v8590_v37, %v7395_v2  ;;  %v8522_v55 = vld [vmem:[%s9045_s29 + $0xc4c] sm:$0xf] }
 0x28b   : > { %5250 = vmatpush.bf16.msra.mxu3 %v7574_v8  ;;  %v7123_v16 = vld [vmem:[%s9045_s29 + $0xc58] sm:$0xf0]  ;;  %v8554_v39 = vld [vmem:[%s9045_s29 + $0xd4c] sm:$0xf]  ;;  %v7526_v60 = vor.u32 %v8622_v56, %v7523_v63  ;;  %v4965_v62 = vadd.f32 %v4964_v4, %v4951_v3 }
 0x28c   : > { %5209 = vmatpush.bf16.msra.mxu0 %v7174_v31  ;;  %v7251_v15 = vld [vmem:[%s9045_s29 + $0xd58] sm:$0xf0]  ;;  %v8586_v49 = vld [vmem:[%s9045_s29 + $0xe4c] sm:$0xf]  ;;  %v7126_v47 = vor.u32 %v8522_v55, %v7123_v16 }
 0x28d   : > { %5223 = vmatpush.bf16.msra.mxu1 %v7302_v13  ;;  %v7379_v14 = vld [vmem:[%s9045_s29 + $0xe58] sm:$0xf0]  ;;  %v8618_v6 = vld [vmem:[%s9045_s29 + $0xf4c] sm:$0xf]  ;;  %v10683_v29 = vadd.f32 %v4978_v23, %v4965_v62  ;;  %v7254_v0 = vor.u32 %v8554_v39, %v7251_v15 }
 0x28e   : > { %5237 = vmatpush.bf16.msra.mxu2 %v7430_v54  ;;  %v4938_v24 = vpop.f32.mrf.mxu0  ;;  %v7507_v1 = vld [vmem:[%s9045_s29 + $0xf58] sm:$0xf0]  ;;  %v7382_v8 = vor.u32 %v8586_v49, %v7379_v14  ;;  %v8518_v12 = vld [vmem:[%s9045_s29 + $0xc2c] sm:$0xf] }
 0x28f   : > { %5251 = vmatpush.bf16.msra.mxu3 %v7558_v36  ;;  %v4939_v27 = vadd.f32 %v4938_v24, %v10633_v43  ;;  %v7107_v61 = vld [vmem:[%s9045_s29 + $0xc38] sm:$0xf0]  ;;  %v8550_v18 = vld [vmem:[%s9045_s29 + $0xd2c] sm:$0xf]  ;;  %v7510_v25 = vor.u32 %v8618_v6, %v7507_v1 }
 0x290   : > { %5210 = vmatpush.bf16.msra.mxu0 %v7158_v28  ;;  %v7235_v21 = vld [vmem:[%s9045_s29 + $0xd38] sm:$0xf0]  ;;  %v8582_v31 = vld [vmem:[%s9045_s29 + $0xe2c] sm:$0xf]  ;;  %v7110_v51 = vor.u32 %v8518_v12, %v7107_v61  ;;  %v4966_v20 = vpop.f32.mrf.mxu2 }
 0x291   : > { %5224 = vmatpush.bf16.msra.mxu1 %v7286_v33  ;;  %v4953_v43 = vadd.f32 %v4952_v48, %v4939_v27  ;;  %v7363_v13 = vld [vmem:[%s9045_s29 + $0xe38] sm:$0xf0]  ;;  %v8614_v54 = vld [vmem:[%s9045_s29 + $0xf2c] sm:$0xf]  ;;  %v7238_v44 = vor.u32 %v8550_v18, %v7235_v21  ;;  %v4980_v50 = vpop.f32.mrf.mxu3 }
 0x292   : > { %5238 = vmatpush.bf16.msra.mxu2 %v7414_v59  ;;  %v7491_v10 = vld [vmem:[%s9045_s29 + $0xf38] sm:$0xf0]  ;;  %v8514_v35 = vld [vmem:[%s9045_s29 + $0xc0c] sm:$0xf]  ;;  %v7366_v11 = vor.u32 %v8582_v31, %v7363_v13 }
 0x293   : > { %5252 = vmatpush.bf16.msra.mxu3 %v7542_v19  ;;  %v7091_v36 = vld [vmem:[%s9045_s29 + $0xc18] sm:$0xf0]  ;;  %v8546_v22 = vld [vmem:[%s9045_s29 + $0xd0c] sm:$0xf]  ;;  %v7494_v26 = vor.u32 %v8614_v54, %v7491_v10  ;;  %v4967_v59 = vadd.f32 %v4966_v20, %v4953_v43 }
 0x294   : > { %5211 = vmatpush.bf16.msra.mxu0 %v7142_v45  ;;  %v7219_v40 = vld [vmem:[%s9045_s29 + $0xd18] sm:$0xf0]  ;;  %v8578_v5 = vld [vmem:[%s9045_s29 + $0xe0c] sm:$0xf]  ;;  %v7094_v3 = vor.u32 %v8514_v35, %v7091_v36 }
 0x295   : > { %5225 = vmatpush.bf16.msra.mxu1 %v7270_v42  ;;  %v7347_v28 = vld [vmem:[%s9045_s29 + $0xe18] sm:$0xf0]  ;;  %v8610_v30 = vld [vmem:[%s9045_s29 + $0xf0c] sm:$0xf]  ;;  %v10707_v56 = vadd.f32 %v4980_v50, %v4967_v59  ;;  %v7222_v63 = vor.u32 %v8546_v22, %v7219_v40 }
 0x296   : > { %5239 = vmatpush.bf16.msra.mxu2 %v7398_v52  ;;  %v7475_v33 = vld [vmem:[%s9045_s29 + $0xf18] sm:$0xf0]  ;;  %v8670_v34 = vld [vmem:[%s9045_s29 + $0x10ec] sm:$0xf]  ;;  %v7350_v45 = vor.u32 %v8578_v5, %v7347_v28 }
 0x297   : > { %5253 = vmatpush.bf16.msra.mxu3 %v7526_v60  ;;  %v7715_v7 = vld [vmem:[%s9045_s29 + $0x10f8] sm:$0xf0]  ;;  %v8702_v19 = vld [vmem:[%s9045_s29 + $0x11ec] sm:$0xf]  ;;  %v7478_v55 = vor.u32 %v8610_v30, %v7475_v33 }
 0x298   : > { %5212 = vmatpush.bf16.msra.mxu0 %v7126_v47  ;;  %v7843_v58 = vld [vmem:[%s9045_s29 + $0x11f8] sm:$0xf0]  ;;  %v8734_v37 = vld [vmem:[%s9045_s29 + $0x12ec] sm:$0xf]  ;;  %v7718_v16 = vor.u32 %v8670_v34, %v7715_v7 }
 0x299   : > { %5226 = vmatpush.bf16.msra.mxu1 %v7254_v0  ;;  %v7971_v2 = vld [vmem:[%s9045_s29 + $0x12f8] sm:$0xf0]  ;;  %v8766_v42 = vld [vmem:[%s9045_s29 + $0x13ec] sm:$0xf]  ;;  %v7846_v39 = vor.u32 %v8702_v19, %v7843_v58 }
 0x29a   : > { %5240 = vmatpush.bf16.msra.mxu2 %v7382_v8  ;;  %v8099_v52 = vld [vmem:[%s9045_s29 + $0x13f8] sm:$0xf0]  ;;  %v7974_v60 = vor.u32 %v8734_v37, %v7971_v2  ;;  %v8666_v4 = vld [vmem:[%s9045_s29 + $0x10cc] sm:$0xf] }
 0x29b   : > { %5254 = vmatpush.bf16.msra.mxu3 %v7510_v25  ;;  %v7699_v15 = vld [vmem:[%s9045_s29 + $0x10d8] sm:$0xf0]  ;;  %v8698_v49 = vld [vmem:[%s9045_s29 + $0x11cc] sm:$0xf]  ;;  %v8102_v14 = vor.u32 %v8766_v42, %v8099_v52 }
 0x29c   : > { %5213 = vmatpush.bf16.msra.mxu0 %v7110_v51  ;;  %v7827_v62 = vld [vmem:[%s9045_s29 + $0x11d8] sm:$0xf0]  ;;  %v8730_v24 = vld [vmem:[%s9045_s29 + $0x12cc] sm:$0xf]  ;;  %v7702_v27 = vor.u32 %v8666_v4, %v7699_v15 }
 0x29d   : > { %5227 = vmatpush.bf16.msra.mxu1 %v7238_v44  ;;  %v7955_v23 = vld [vmem:[%s9045_s29 + $0x12d8] sm:$0xf0]  ;;  %v8762_v6 = vld [vmem:[%s9045_s29 + $0x13cc] sm:$0xf]  ;;  %v7830_v47 = vor.u32 %v8698_v49, %v7827_v62 }
 0x29e   : > { %5241 = vmatpush.bf16.msra.mxu2 %v7366_v11  ;;  %v8083_v1 = vld [vmem:[%s9045_s29 + $0x13d8] sm:$0xf0]  ;;  %v7958_v48 = vor.u32 %v8730_v24, %v7955_v23  ;;  %v8662_v0 = vld [vmem:[%s9045_s29 + $0x10ac] sm:$0xf] }
 0x29f   : > { %5255 = vmatpush.bf16.msra.mxu3 %v7494_v26  ;;  %v7683_v8 = vld [vmem:[%s9045_s29 + $0x10b8] sm:$0xf0]  ;;  %v8694_v12 = vld [vmem:[%s9045_s29 + $0x11ac] sm:$0xf]  ;;  %v8086_v61 = vor.u32 %v8762_v6, %v8083_v1 }
 0x2a0   : > { %5214 = vmatpush.bf16.msra.mxu0 %v7094_v3  ;;  %v7811_v18 = vld [vmem:[%s9045_s29 + $0x11b8] sm:$0xf0]  ;;  %v8726_v25 = vld [vmem:[%s9045_s29 + $0x12ac] sm:$0xf] }
 0x2a1   : > { %5228 = vmatpush.bf16.msra.mxu1 %v7222_v63  ;;  %v7939_v43 = vld [vmem:[%s9045_s29 + $0x12b8] sm:$0xf0]  ;;  %v8758_v21 = vld [vmem:[%s9045_s29 + $0x13ac] sm:$0xf]  ;;  %v7814_v13 = vor.u32 %v8694_v12, %v7811_v18  ;;  %v5006_v26 = vpop.f32.mrf.mxu1 }
 0x2a2   : > { %5242 = vmatpush.bf16.msra.mxu2 %v7350_v45  ;;  %v8067_v31 = vld [vmem:[%s9045_s29 + $0x13b8] sm:$0xf0]  ;;  %v7942_v54 = vor.u32 %v8726_v25, %v7939_v43  ;;  %v8658_v10 = vld [vmem:[%s9045_s29 + $0x108c] sm:$0xf] }
 0x2a3   : > { %5256 = vmatpush.bf16.msra.mxu3 %v7478_v55  ;;  %5215 = vmatmul.bf16.vlgmr.msra.gmra.mxu0 %v9458_v32  ;;  %v7686_v32 = vor.u32 %v8662_v0, %v7683_v8  ;;  %v7667_v51 = vld [vmem:[%s9045_s29 + $0x1098] sm:$0xf0]  ;;  %v8722_v36 = vld [vmem:[%s9045_s29 + $0x128c] sm:$0xf] }
 0x2a4   : > { %5263 = vmatpush.bf16.msrb.mxu0 %v7718_v16  ;;  %5229 = vmatmul.bf16.vlgmr.msra.gmra.mxu1 %v9465_v41  ;;  %v8070_v41 = vor.u32 %v8758_v21, %v8067_v31  ;;  %v7795_v35 = vld [vmem:[%s9045_s29 + $0x1198] sm:$0xf0]  ;;  %v8754_v11 = vld [vmem:[%s9045_s29 + $0x138c] sm:$0xf]  ;;  %v7670_v5 = vor.u32 %v8658_v10, %v7667_v51 }
 0x2a5   : > { %5277 = vmatpush.bf16.msrb.mxu1 %v7846_v39  ;;  %5243 = vmatmul.bf16.vlgmr.msra.gmra.mxu2 %v9463_v38  ;;  %v8690_v38 = vld [vmem:[%s9045_s29 + $0x118c] sm:$0xf]  ;;  %v7923_v44 = vld [vmem:[%s9045_s29 + $0x1298] sm:$0xf0] }
 0x2a6   : > { %5291 = vmatpush.bf16.msrb.mxu2 %v7974_v60  ;;  %5257 = vmatmul.bf16.vlgmr.msra.gmra.mxu3 %v9469_v46  ;;  %v4992_v46 = vpop.f32.mrf.mxu0  ;;  %v8051_v22 = vld [vmem:[%s9045_s29 + $0x1398] sm:$0xf0]  ;;  %v7798_v20 = vor.u32 %v8690_v38, %v7795_v35  ;;  %v7926_v28 = vor.u32 %v8722_v36, %v7923_v44  ;;  %v8654_v30 = vld [vmem:[%s9045_s29 + $0x106c] sm:$0xf] }
 0x2a7   : > { %5305 = vmatpush.bf16.msrb.mxu3 %v8102_v14  ;;  %v4993_v40 = vadd.f32 %v4992_v46, %v10683_v29  ;;  %v7651_v33 = vld [vmem:[%s9045_s29 + $0x1078] sm:$0xf0]  ;;  %v8686_v59 = vld [vmem:[%s9045_s29 + $0x116c] sm:$0xf]  ;;  %v8054_v50 = vor.u32 %v8754_v11, %v8051_v22 }
 0x2a8   : > { %5264 = vmatpush.bf16.msrb.mxu0 %v7702_v27  ;;  %v7779_v7 = vld [vmem:[%s9045_s29 + $0x1178] sm:$0xf0]  ;;  %v8718_v19 = vld [vmem:[%s9045_s29 + $0x126c] sm:$0xf]  ;;  %v7654_v37 = vor.u32 %v8654_v30, %v7651_v33  ;;  %v5020_v16 = vpop.f32.mrf.mxu2 }
 0x2a9   : > { %5278 = vmatpush.bf16.msrb.mxu1 %v7830_v47  ;;  %v5007_v34 = vadd.f32 %v5006_v26, %v4993_v40  ;;  %v7907_v29 = vld [vmem:[%s9045_s29 + $0x1278] sm:$0xf0]  ;;  %v8750_v3 = vld [vmem:[%s9045_s29 + $0x136c] sm:$0xf]  ;;  %v7782_v2 = vor.u32 %v8686_v59, %v7779_v7  ;;  %v5034_v14 = vpop.f32.mrf.mxu3  ;;  %v5008_v1 = vpop.f32.mrf.mxu1 }
 0x2aa   : > { %5292 = vmatpush.bf16.msrb.mxu2 %v7958_v48  ;;  %v8035_v58 = vld [vmem:[%s9045_s29 + $0x1378] sm:$0xf0]  ;;  %v7910_v63 = vor.u32 %v8718_v19, %v7907_v29  ;;  %v8650_v45 = vld [vmem:[%s9045_s29 + $0x104c] sm:$0xf] }
 0x2ab   : > { %5306 = vmatpush.bf16.msrb.mxu3 %v8086_v61  ;;  %v7635_v42 = vld [vmem:[%s9045_s29 + $0x1058] sm:$0xf0]  ;;  %v8682_v52 = vld [vmem:[%s9045_s29 + $0x114c] sm:$0xf]  ;;  %v8038_v55 = vor.u32 %v8750_v3, %v8035_v58  ;;  %v5021_v15 = vadd.f32 %v5020_v16, %v5007_v34  ;;  %v8820_v58 = vld [vmem:[%s9053_s4] sm:$0xf] }
 0x2ac   : > { %5265 = vmatpush.bf16.msrb.mxu0 %v7686_v32  ;;  %v7763_v39 = vld [vmem:[%s9045_s29 + $0x1158] sm:$0xf0]  ;;  %v8714_v60 = vld [vmem:[%s9045_s29 + $0x124c] sm:$0xf]  ;;  %v7638_v6 = vor.u32 %v8650_v45, %v7635_v42 }
 0x2ad   : > { %5279 = vmatpush.bf16.msrb.mxu1 %v7814_v13  ;;  %v7891_v4 = vld [vmem:[%s9045_s29 + $0x1258] sm:$0xf0]  ;;  %v8746_v62 = vld [vmem:[%s9045_s29 + $0x134c] sm:$0xf]  ;;  %v10757_v27 = vadd.f32 %v5034_v14, %v5021_v15  ;;  %v7766_v47 = vor.u32 %v8682_v52, %v7763_v39 }
 0x2ae   : > { %5293 = vmatpush.bf16.msrb.mxu2 %v7942_v54  ;;  %v4994_v49 = vpop.f32.mrf.mxu0  ;;  %v8019_v24 = vld [vmem:[%s9045_s29 + $0x1358] sm:$0xf0]  ;;  %v7894_v48 = vor.u32 %v8714_v60, %v7891_v4  ;;  %v8646_v0 = vld [vmem:[%s9045_s29 + $0x102c] sm:$0xf] }
 0x2af   : > { %5307 = vmatpush.bf16.msrb.mxu3 %v8070_v41  ;;  %v4995_v23 = vadd.f32 %v4994_v49, %v10707_v56  ;;  %v7619_v8 = vld [vmem:[%s9045_s29 + $0x1038] sm:$0xf0]  ;;  %v8678_v12 = vld [vmem:[%s9045_s29 + $0x112c] sm:$0xf]  ;;  %v8022_v61 = vor.u32 %v8746_v62, %v8019_v24 }
 0x2b0   : > { %5266 = vmatpush.bf16.msrb.mxu0 %v7670_v5  ;;  %v7747_v18 = vld [vmem:[%s9045_s29 + $0x1138] sm:$0xf0]  ;;  %v8710_v25 = vld [vmem:[%s9045_s29 + $0x122c] sm:$0xf]  ;;  %v7622_v32 = vor.u32 %v8646_v0, %v7619_v8  ;;  %v5022_v35 = vpop.f32.mrf.mxu2 }
 0x2b1   : > { %5280 = vmatpush.bf16.msrb.mxu1 %v7798_v20  ;;  %v5009_v56 = vadd.f32 %v5008_v1, %v4995_v23  ;;  %v7875_v43 = vld [vmem:[%s9045_s29 + $0x1238] sm:$0xf0]  ;;  %v8742_v21 = vld [vmem:[%s9045_s29 + $0x132c] sm:$0xf]  ;;  %v7750_v13 = vor.u32 %v8678_v12, %v7747_v18  ;;  %v5036_v22 = vpop.f32.mrf.mxu3 }
 0x2b2   : > { %5294 = vmatpush.bf16.msrb.mxu2 %v7926_v28  ;;  %v8003_v31 = vld [vmem:[%s9045_s29 + $0x1338] sm:$0xf0]  ;;  %v7878_v54 = vor.u32 %v8710_v25, %v7875_v43  ;;  %v8642_v10 = vld [vmem:[%s9045_s29 + $0x100c] sm:$0xf] }
 0x2b3   : > { %5308 = vmatpush.bf16.msrb.mxu3 %v8054_v50  ;;  %v7603_v51 = vld [vmem:[%s9045_s29 + $0x1018] sm:$0xf0]  ;;  %v8674_v38 = vld [vmem:[%s9045_s29 + $0x110c] sm:$0xf]  ;;  %v8006_v41 = vor.u32 %v8742_v21, %v8003_v31  ;;  %v5023_v11 = vadd.f32 %v5022_v35, %v5009_v56 }
 0x2b4   : > { %5267 = vmatpush.bf16.msrb.mxu0 %v7654_v37  ;;  %v7731_v36 = vld [vmem:[%s9045_s29 + $0x1118] sm:$0xf0]  ;;  %v8706_v44 = vld [vmem:[%s9045_s29 + $0x120c] sm:$0xf]  ;;  %v7606_v26 = vor.u32 %v8642_v10, %v7603_v51  ;;  %v894_v37 = vperm.slane %v8820_v58, 3 }
 0x2b5   : > { %5281 = vmatpush.bf16.msrb.mxu1 %v7782_v2  ;;  %v7859_v46 = vld [vmem:[%s9045_s29 + $0x1218] sm:$0xf0]  ;;  %v8738_v40 = vld [vmem:[%s9045_s29 + $0x130c] sm:$0xf]  ;;  %v10775_v20 = vadd.f32 %v5036_v22, %v5023_v11  ;;  %v7734_v28 = vor.u32 %v8674_v38, %v7731_v36 }
 0x2b6   : > { %5295 = vmatpush.bf16.msrb.mxu2 %v7910_v63  ;;  %v7987_v5 = vld [vmem:[%s9045_s29 + $0x1318] sm:$0xf0]  ;;  %v7862_v30 = vor.u32 %v8706_v44, %v7859_v46 }
 0x2b7   : > { %5309 = vmatpush.bf16.msrb.mxu3 %v8038_v55  ;;  %v7990_v33 = vor.u32 %v8738_v40, %v7987_v5 }
 0x2b8   : > { %5268 = vmatpush.bf16.msrb.mxu0 %v7638_v6 }
 0x2b9   : > { %5282 = vmatpush.bf16.msrb.mxu1 %v7766_v47 }
 0x2ba   : > { %5296 = vmatpush.bf16.msrb.mxu2 %v7894_v48 }
 0x2bb   : > { %5310 = vmatpush.bf16.msrb.mxu3 %v8022_v61 }
 0x2bc   : > { %5269 = vmatpush.bf16.msrb.mxu0 %v7622_v32 }
 0x2bd   : > { %5283 = vmatpush.bf16.msrb.mxu1 %v7750_v13 }
 0x2be   : > { %5297 = vmatpush.bf16.msrb.mxu2 %v7878_v54 }
 0x2bf   : > { %5311 = vmatpush.bf16.msrb.mxu3 %v8006_v41 }
 0x2c0   : > { %5270 = vmatpush.bf16.msrb.mxu0 %v7606_v26  ;;  %v5048_v59 = vpop.f32.mrf.mxu0 }
 0x2c1   : > { %5284 = vmatpush.bf16.msrb.mxu1 %v7734_v28  ;;  %v5062_v50 = vpop.f32.mrf.mxu1  ;;  %v5049_v45 = vadd.f32 %v5048_v59, %v894_v37 }
 0x2c2   : > { %5298 = vmatpush.bf16.msrb.mxu2 %v7862_v30 }
 0x2c3   : > { %5312 = vmatpush.bf16.msrb.mxu3 %v7990_v33  ;;  %5271 = vmatmul.bf16.vlgmr.msrb.gmra.mxu0 %v10857_v17  ;;  %v5063_v17 = vadd.f32 %v5062_v50, %v5049_v45 }
 0x2c4   : > { %5285 = vmatmul.bf16.vlgmr.msrb.gmra.mxu1 %v10859_v57 }
 0x2c5   : > { %5299 = vmatmul.bf16.vlgmr.msrb.gmra.mxu2 %v10858_v9 }
 0x2c6   : > { %5313 = vmatmul.bf16.vlgmr.msrb.gmra.mxu3 %v10860_v53 }
 0x2c8   : > { %v5076_v34 = vpop.f32.mrf.mxu2  ;;  %v5050_v19 = vpop.f32.mrf.mxu0 }
 0x2c9   : > { %v5090_v7 = vpop.f32.mrf.mxu3  ;;  %v5064_v29 = vpop.f32.mrf.mxu1  ;;  %v5077_v55 = vadd.f32 %v5076_v34, %v5063_v17  ;;  %v5051_v16 = vadd.f32 %v5050_v19, %v894_v37 }
 0x2cb   : > { %v5091_v39 = vadd.f32 %v5090_v7, %v5077_v55  ;;  %v5065_v60 = vadd.f32 %v5064_v29, %v5051_v16 }
 0x2d0   : > { %v5078_v3 = vpop.f32.mrf.mxu2 }
 0x2d1   : > { %v5092_v2 = vpop.f32.mrf.mxu3  ;;  %v5079_v62 = vadd.f32 %v5078_v3, %v5065_v60 }
 0x2d3   : > { %v5093_v6 = vadd.f32 %v5092_v2, %v5079_v62 }
 0x2e0   : > { %v5104_v63 = vpop.f32.mrf.mxu0 }
 0x2e1   : > { %v5118_v42 = vpop.f32.mrf.mxu1  ;;  %v5105_v15 = vadd.f32 %v5104_v63, %v5091_v39 }
 0x2e3   : > { %v5119_v23 = vadd.f32 %v5118_v42, %v5105_v15  ;;  %v5325_v15 = vmax.f32 %v10775_v20, 0.0 }
 0x2e8   : > { %v5132_v52 = vpop.f32.mrf.mxu2  ;;  %v5106_v9 = vpop.f32.mrf.mxu0 }
 0x2e9   : > { %v5146_v57 = vpop.f32.mrf.mxu3  ;;  %v5120_v53 = vpop.f32.mrf.mxu1  ;;  %v5133_v47 = vadd.f32 %v5132_v52, %v5119_v23  ;;  %v5107_v0 = vadd.f32 %v5106_v9, %v5093_v6  ;;  %v5321_v52 = vmax.f32 %v10757_v27, 0.0  ;;  %v5357_v27 = vld [vmem:[%s10404_s6] sm:$0xff] (%p8985_p9) }
 0x2ea   : > { %5358 = vst [vmem:[%s5344_s15] sm:$0xff] (%p8985_p9), %v5357_v27 }
 0x2eb   : > { %v5147_v12 = vadd.f32 %v5146_v57, %v5133_v47  ;;  %v5121_v56 = vadd.f32 %v5120_v53, %v5107_v0 }
 0x2f0   : > { %v5134_v4 = vpop.f32.mrf.mxu2 }
 0x2f1   : > { %v5148_v49 = vpop.f32.mrf.mxu3  ;;  %v5135_v25 = vadd.f32 %v5134_v4, %v5121_v56 }
 0x2f3   : > { %v5149_v13 = vadd.f32 %v5148_v49, %v5135_v25 }
 0x300   : > { %v5160_v14 = vpop.f32.mrf.mxu0 }
 0x301   : > { %v5174_v24 = vpop.f32.mrf.mxu1  ;;  %v5161_v18 = vadd.f32 %v5160_v14, %v5147_v12 }
 0x303   : > { %v5175_v21 = vadd.f32 %v5174_v24, %v5161_v18  ;;  %v5361_v24 = vld [vmem:[%s10404_s6 + $0x10] sm:$0xff] (%p8985_p9) }
 0x304   : > { %5362 = vst [vmem:[%s5344_s15 + $0x50] sm:$0xff] (%p8985_p9), %v5361_v24 }
 0x308   : > { %v5188_v1 = vpop.f32.mrf.mxu2  ;;  %v5162_v8 = vpop.f32.mrf.mxu0 }
 0x309   : > { %v5202_v48 = vpop.f32.mrf.mxu3  ;;  %v5176_v61 = vpop.f32.mrf.mxu1  ;;  %v5189_v54 = vadd.f32 %v5188_v1, %v5175_v21  ;;  %v5163_v51 = vadd.f32 %v5162_v8, %v5149_v13 }
 0x30b   : > { %v5203_v38 = vadd.f32 %v5202_v48, %v5189_v54  ;;  %v5177_v35 = vadd.f32 %v5176_v61, %v5163_v51 }
 0x310   : > { %v5190_v43 = vpop.f32.mrf.mxu2 }
 0x311   : > { %v5204_v31 = vpop.f32.mrf.mxu3  ;;  %v5191_v46 = vadd.f32 %v5190_v43, %v5177_v35 }
 0x313   : > { %v5205_v5 = vadd.f32 %v5204_v31, %v5191_v46 }
 0x320   : > { %v5216_v32 = vpop.f32.mrf.mxu0 }
 0x321   : > { %v5230_v10 = vpop.f32.mrf.mxu1  ;;  %v5217_v36 = vadd.f32 %v5216_v32, %v5203_v38 }
 0x323   : > { %v5231_v22 = vadd.f32 %v5230_v10, %v5217_v36 }
 0x328   : > { %v5244_v41 = vpop.f32.mrf.mxu2  ;;  %v5218_v11 = vpop.f32.mrf.mxu0 }
 0x329   : > { %v5258_v44 = vpop.f32.mrf.mxu3  ;;  %v5232_v40 = vpop.f32.mrf.mxu1  ;;  %v5245_v26 = vadd.f32 %v5244_v41, %v5231_v22  ;;  %v5219_v28 = vadd.f32 %v5218_v11, %v5205_v5 }
 0x32b   : > { %v5259_v33 = vadd.f32 %v5258_v44, %v5245_v26  ;;  %v5233_v34 = vadd.f32 %v5232_v40, %v5219_v28 }
 0x330   : > { %v5246_v30 = vpop.f32.mrf.mxu2 }
 0x331   : > { %v5260_v59 = vpop.f32.mrf.mxu3  ;;  %v5247_v29 = vadd.f32 %v5246_v30, %v5233_v34 }
 0x333   : > { %v5261_v37 = vadd.f32 %v5260_v59, %v5247_v29 }
 0x340   : > { %v5272_v50 = vpop.f32.mrf.mxu0 }
 0x341   : > { %v5273_v7 = vadd.f32 %v5272_v50, %v5259_v33  ;;  %v5286_v19 = vpop.f32.mrf.mxu1 }
 0x343   : > { %v5287_v3 = vadd.f32 %v5286_v19, %v5273_v7 }
 0x348   : > { %v5300_v58 = vpop.f32.mrf.mxu2  ;;  %v5274_v45 = vpop.f32.mrf.mxu0 }
 0x349   : > { %v5301_v2 = vadd.f32 %v5300_v58, %v5287_v3  ;;  %v5314_v63 = vpop.f32.mrf.mxu3  ;;  %v5275_v17 = vadd.f32 %v5274_v45, %v5261_v37  ;;  %v5288_v55 = vpop.f32.mrf.mxu1 }
 0x34b   : > { %v5315_v42 = vadd.f32 %v5314_v63, %v5301_v2  ;;  %v5289_v16 = vadd.f32 %v5288_v55, %v5275_v17 }
 0x34d   : > { %v5322_v57 = vmax.f32 %v5315_v42, 0.0 }
 0x34f   : > { %v5328_v9 = vpack.c.bf16 %v5322_v57, %v5321_v52 }
 0x350   : > { %v5302_v53 = vpop.f32.mrf.mxu2 }
 0x351   : > { %5332 = vst [vmem:[%s10404_s6 + $0x8] sm:$0xff] %v5328_v9  ;;  %v5303_v39 = vadd.f32 %v5302_v53, %v5289_v16  ;;  %v5316_v60 = vpop.f32.mrf.mxu3 }
 0x353   : > { %v5317_v4 = vadd.f32 %v5316_v60, %v5303_v39 }
 0x355   : > { %v5326_v49 = vmax.f32 %v5317_v4, 0.0  ;;  %5341 = sbr.rel (!%p8985_p9) target bundleno = 866 (0x362), region = 44 }
 0x357   : > { %v5330_v14 = vpack.c.bf16 %v5326_v49, %v5325_v15 }
 0x358   : > { %v5359_v62 = vld [vmem:[%s10404_s6 + $0x8] sm:$0xff] (%p8985_p9) }
 0x359   : > { %5334 = vst [vmem:[%s10404_s6 + $0x18] sm:$0xff] %v5330_v14 }
 0x35a   : > { %5360 = vst [vmem:[%s5344_s15 + $0x8] sm:$0xff] %v5359_v62 }
 0x360   : > { %v5363_v20 = vld [vmem:[%s10404_s6 + $0x18] sm:$0xff] }
 0x361   : > { %5364 = vst [vmem:[%s5344_s15 + $0x58] sm:$0xff] %v5363_v20 }
 0x362 PF: > { %p16_p7 = scmp.ge.s32.totalorder %s8966_s17, 7   ;;  %s10870_s12 = smov %s8911_s13 }
 0x363   : > { %s10871_s13 = smov %s8915_s14  ;;  %s10872_s14 = smov %s8976_s20 }
 0x364   : > { %s10873_s15 = smov %s8966_s17  ;;  %18 = sbr.rel (!%p16_p7) target bundleno = 5 (0x5), region = 108 }
 0x369   :  { %5380 = vsyncpa [#allocation3], 1 }
 0x36a   :  { %5382 = vsyncpa [#allocation3 + $0x1], 1 }
 0x36b   :  { %5383 = vsyncpa [#allocation5], 1 }
 0x36c   :  { %5385 = vsyncpa [#allocation5 + $0x1], 1 }

</bundles_post_ra>
